<compile_context>
chip_gen: v7x
topology: tpu7x:2x2x1
jax: 0.10.0
libtpu: 0.0.40
codegen_flags: <defaults>
</compile_context>

<pallas_src>
import math

import jax
import jax.numpy as jnp
from jax.experimental import pallas as pl
from jax.experimental.pallas import tpu as pltpu

# ------------------------- model hyper-parameters ---------------------------
BATCH = 2
IMG = 16
PATCH = 4
IN_C = 3
EMBED = 32
DEPTH = 2
NUM_HEADS = 4
HEAD_DIM = EMBED // NUM_HEADS
MLP_RATIO = 4.0
MLP_HIDDEN = int(EMBED * MLP_RATIO)
NUM_CLASSES = 10
LN_EPS = 1e-6                        # reference uses partial(nn.LayerNorm, eps=1e-6)

GRID_HW = IMG // PATCH
NUM_PATCHES = GRID_HW * GRID_HW      # 16 patch tokens
NUM_TOKENS = NUM_PATCHES + 1         # + cls token = 17
PATCH_DIM = IN_C * PATCH * PATCH     # 48
LOGIT_PAD = 128                      # lane-dense logits, sliced to NUM_CLASSES in JAX
ATTN_SCALE = HEAD_DIM ** (-0.5)
GROUPS = BATCH * NUM_HEADS           # batched-attention groups


# ------------------------------ kernel helpers -------------------------------
def _layernorm(x, g, b, eps=LN_EPS):
    mu = jnp.mean(x, axis=-1, keepdims=True)
    var = jnp.mean((x - mu) ** 2, axis=-1, keepdims=True)
    return (x - mu) * jax.lax.rsqrt(var + eps) * g + b


def _gelu(x):
    # exact (erf-based) GELU, matching torch.nn.GELU default
    return 0.5 * x * (1.0 + jax.lax.erf(x * (1.0 / math.sqrt(2.0))))


def _mm(a, b):
    return jnp.dot(a, b, preferred_element_type=jnp.float32)


# --------------------------------- kernel ------------------------------------
def vit_fused_kernel(
    patches_ref,                 # (B*P, PATCH_DIM)
    patch_w_ref, patch_b_ref,    # (PATCH_DIM, C), (1, C)
    cls_pos_ref,                 # (1, C)   = cls_token + pos_embed[cls row]
    pos_ref,                     # (B*P, C) = pos_embed patch rows tiled over batch
    ln1g_ref, ln1b_ref,          # (D, 1, C)
    wq_ref, bq_ref,              # (D, C, C), (D, 1, C)   (attn scale pre-folded)
    wk_ref, bk_ref,              # (D, C, C), (D, 1, C)
    wv_ref, bv_ref,              # (D, C, C), (D, 1, C)
    wproj_ref, bproj_ref,        # (D, B*H, hd, C) head-major & batch-tiled, (D, 1, C)
    ln2g_ref, ln2b_ref,          # (D, 1, C)
    w1_ref, b1_ref,              # (D, C, H), (D, 1, H)
    w2_ref, b2_ref,              # (D, H, C), (D, 1, C)
    normg_ref, normb_ref,        # (1, C)
    headw_ref, headb_ref,        # (C, 128), (1, 128)   (zero-padded past NUM_CLASSES)
    out_ref,                     # (B, 128)
):
    C = EMBED
    N = NUM_TOKENS
    P = NUM_PATCHES
    hd = HEAD_DIM
    H = NUM_HEADS
    B = BATCH

    # --- patch embedding + positional embedding, whole batch in one matmul ---
    pe = _mm(patches_ref[...], patch_w_ref[...]) + patch_b_ref[...] + pos_ref[...]
    cls_row = cls_pos_ref[...]                                        # (1, C)

    # Token slab (B*N, C).  Per-batch token order is [patch tokens..., cls]
    # (attention is permutation equivariant; pos already added per token),
    # so batch b's cls row is row b*N + P.
    x = jnp.concatenate(
        [pe[0:P, :], cls_row, pe[P:2 * P, :], cls_row], axis=0)       # (B*N, C)

    for d in range(DEPTH):                       # static unroll over blocks
        # ---------------- attention branch (batched over B*H groups) --------
        h = _layernorm(x, ln1g_ref[d], ln1b_ref[d])                   # (B*N, C)
        q = _mm(h, wq_ref[d]) + bq_ref[d]        # scale already folded into w/b
        k = _mm(h, wk_ref[d]) + bk_ref[d]
        v = _mm(h, wv_ref[d]) + bv_ref[d]

        def to_heads(t):
            # (B*N, C) -> (B*H, N, hd); group g = b*H + h
            return jnp.stack(
                [t[b * N:(b + 1) * N, hh * hd:(hh + 1) * hd]
                 for b in range(B) for hh in range(H)],
                axis=0)

        qs, ks, vs = to_heads(q), to_heads(k), to_heads(v)            # (G, N, hd)

        s = jnp.einsum('gqd,gkd->gqk', qs, ks,
                       preferred_element_type=jnp.float32)            # (G, N, N)
        s = s - jnp.max(s, axis=-1, keepdims=True)
        p = jnp.exp(s)
        p = p * pl.reciprocal(jnp.sum(p, axis=-1, keepdims=True), approx=True)
        ctx = jnp.einsum('gqk,gkd->gqd', p, vs,
                         preferred_element_type=jnp.float32)          # (G, N, hd)

        # Fold each head's context straight into the output projection via the
        # head-major row blocks of w_proj (no attn scratch, no partial stores).
        po = jnp.einsum('gqd,gdc->gqc', ctx, wproj_ref[d],
                        preferred_element_type=jnp.float32)           # (G, N, C)
        attn = jnp.concatenate(
            [jnp.sum(po[b * H:(b + 1) * H], axis=0) for b in range(B)],
            axis=0)                                                   # (B*N, C)
        x = x + attn + bproj_ref[d]

        # ---------------- MLP branch (whole batch slab) ----------------------
        h2 = _layernorm(x, ln2g_ref[d], ln2b_ref[d])
        m = _gelu(_mm(h2, w1_ref[d]) + b1_ref[d])                     # (B*N, 128)
        x = x + _mm(m, w2_ref[d]) + b2_ref[d]

    # --- final LayerNorm (per-token, so cls-rows-only is equivalent) + head ---
    feats = jnp.concatenate(
        [x[b * N + P:b * N + P + 1, :] for b in range(B)], axis=0)    # (B, C)
    feats = _layernorm(feats, normg_ref[...], normb_ref[...])
    out_ref[...] = _mm(feats, headw_ref[...]) + headb_ref[...]        # (B, 128)


# --------------------------------- glue --------------------------------------
def extract_patches(x_nchw, patch):
    """NCHW -> (B*num_patches, Cin*ph*pw), matching Conv2d weight flattening."""
    B, Cin, H, W = x_nchw.shape
    gh, gw = H // patch, W // patch
    x = x_nchw.reshape(B, Cin, gh, patch, gw, patch)
    x = x.transpose(0, 2, 4, 1, 3, 5)            # (B, gh, gw, Cin, ph, pw)
    return x.reshape(B * gh * gw, Cin * patch * patch)


def init_params(key):
    keys = iter(jax.random.split(key, 8))

    def nrm(shape, std=0.02):
        # TODO(synk): reference uses trunc_normal_(std=0.02) / Linear default
        # init; plain normal(std=0.02) is used here (init-only difference).
        return (std * jax.random.normal(next(keys), shape)).astype(jnp.float32)

    return {
        # patch embedding (Conv2d with kernel==stride, flattened to a matmul)
        "patch_w": nrm((PATCH_DIM, EMBED)),
        "patch_b": jnp.zeros((1, EMBED), jnp.float32),
        # tokens / positional embedding
        "cls_token": nrm((1, EMBED)),
        "pos_embed": nrm((NUM_TOKENS, EMBED)),
        # transformer blocks, stacked over depth
        "ln1_g": jnp.ones((DEPTH, 1, EMBED), jnp.float32),
        "ln1_b": jnp.zeros((DEPTH, 1, EMBED), jnp.float32),
        "w_qkv": nrm((DEPTH, EMBED, 3 * EMBED)),
        "b_qkv": jnp.zeros((DEPTH, 1, 3 * EMBED), jnp.float32),   # qkv_bias=True
        "w_proj": nrm((DEPTH, EMBED, EMBED)),
        "b_proj": jnp.zeros((DEPTH, 1, EMBED), jnp.float32),
        "ln2_g": jnp.ones((DEPTH, 1, EMBED), jnp.float32),
        "ln2_b": jnp.zeros((DEPTH, 1, EMBED), jnp.float32),
        "w1": nrm((DEPTH, EMBED, MLP_HIDDEN)),
        "b1": jnp.zeros((DEPTH, 1, MLP_HIDDEN), jnp.float32),
        "w2": nrm((DEPTH, MLP_HIDDEN, EMBED)),
        "b2": jnp.zeros((DEPTH, 1, EMBED), jnp.float32),
        # final norm + head
        "norm_g": jnp.ones((1, EMBED), jnp.float32),
        "norm_b": jnp.zeros((1, EMBED), jnp.float32),
        "head_w": nrm((EMBED, NUM_CLASSES)),
        "head_b": jnp.zeros((1, NUM_CLASSES), jnp.float32),
    }


def prepare_params(params):
    """One-time parameter repacking (hoisted out of the jitted forward)."""
    C = EMBED
    pos = params["pos_embed"]                                     # (N, C)
    cls_pos = params["cls_token"] + pos[0:1, :]                   # (1, C)
    pos_tiled = jnp.tile(pos[1:, :], (BATCH, 1))                  # (B*P, C)

    # Split fused qkv into lane-aligned per-tensor weights; fold attn scale.
    wqkv, bqkv = params["w_qkv"], params["b_qkv"]
    w_q = wqkv[:, :, 0:C] * ATTN_SCALE
    b_q = bqkv[:, :, 0:C] * ATTN_SCALE
    w_k, b_k = wqkv[:, :, C:2 * C], bqkv[:, :, C:2 * C]
    w_v, b_v = wqkv[:, :, 2 * C:3 * C], bqkv[:, :, 2 * C:3 * C]

    # Head-major projection weight, tiled over batch for the (B*H)-batched fold.
    wproj_hm = params["w_proj"].reshape(DEPTH, NUM_HEADS, HEAD_DIM, C)
    wproj_g = jnp.tile(wproj_hm, (1, BATCH, 1, 1))                # (D, B*H, hd, C)

    # Lane-dense head: pad classes 10 -> 128, sliced back after the kernel.
    head_w = jnp.pad(params["head_w"], ((0, 0), (0, LOGIT_PAD - NUM_CLASSES)))
    head_b = jnp.pad(params["head_b"], ((0, 0), (0, LOGIT_PAD - NUM_CLASSES)))

    return dict(
        patch_w=params["patch_w"], patch_b=params["patch_b"],
        cls_pos=cls_pos, pos_tiled=pos_tiled,
        ln1_g=params["ln1_g"], ln1_b=params["ln1_b"],
        w_q=w_q, b_q=b_q, w_k=w_k, b_k=b_k, w_v=w_v, b_v=b_v,
        w_proj=wproj_g, b_proj=params["b_proj"],
        ln2_g=params["ln2_g"], ln2_b=params["ln2_b"],
        w1=params["w1"], b1=params["b1"], w2=params["w2"], b2=params["b2"],
        norm_g=params["norm_g"], norm_b=params["norm_b"],
        head_w=head_w, head_b=head_b,
    )


@jax.jit
def vit_forward(p, x_nchw):
    patches = extract_patches(x_nchw, PATCH)                      # (B*P, K)

    args = (
        patches,
        p["patch_w"], p["patch_b"],
        p["cls_pos"], p["pos_tiled"],
        p["ln1_g"], p["ln1_b"],
        p["w_q"], p["b_q"], p["w_k"], p["b_k"], p["w_v"], p["b_v"],
        p["w_proj"], p["b_proj"],
        p["ln2_g"], p["ln2_b"],
        p["w1"], p["b1"], p["w2"], p["b2"],
        p["norm_g"], p["norm_b"],
        p["head_w"], p["head_b"],
    )

    vmem_spec = pl.BlockSpec(memory_space=pltpu.MemorySpace.VMEM)
    logits_pad = pl.pallas_call(
        vit_fused_kernel,
        out_shape=jax.ShapeDtypeStruct((BATCH, LOGIT_PAD), jnp.float32),
        in_specs=[vmem_spec] * len(args),
        out_specs=vmem_spec,
    )(*args)
    return logits_pad[:, :NUM_CLASSES]


# ----------------------------------- main -------------------------------------
if __name__ == "__main__":
    key = jax.random.PRNGKey(0)
    k_param, k_input = jax.random.split(key)
    params = init_params(k_param)
    prepped = prepare_params(params)            # one-time repack, outside the jit
    x = jax.random.normal(k_input, (BATCH, IN_C, IMG, IMG), dtype=jnp.float32)

    logits = vit_forward(prepped, x)
    jax.block_until_ready(logits)
    assert logits.shape == (BATCH, NUM_CLASSES)
    assert bool(jnp.all(jnp.isfinite(logits)))
    print("KERNEL_OK")
</pallas_src>

<mosaic_0001>
module attributes {stable_mosaic.version = 11 : i64} {
  func.func @vit_fused_kernel(%arg0: memref<32x48xf32, #tpu.memory_space<vmem>>, %arg1: memref<48x32xf32, #tpu.memory_space<vmem>>, %arg2: memref<1x32xf32, #tpu.memory_space<vmem>>, %arg3: memref<1x32xf32, #tpu.memory_space<vmem>>, %arg4: memref<32x32xf32, #tpu.memory_space<vmem>>, %arg5: memref<2x1x32xf32, #tpu.memory_space<vmem>>, %arg6: memref<2x1x32xf32, #tpu.memory_space<vmem>>, %arg7: memref<2x32x32xf32, #tpu.memory_space<vmem>>, %arg8: memref<2x1x32xf32, #tpu.memory_space<vmem>>, %arg9: memref<2x32x32xf32, #tpu.memory_space<vmem>>, %arg10: memref<2x1x32xf32, #tpu.memory_space<vmem>>, %arg11: memref<2x32x32xf32, #tpu.memory_space<vmem>>, %arg12: memref<2x1x32xf32, #tpu.memory_space<vmem>>, %arg13: memref<2x8x8x32xf32, #tpu.memory_space<vmem>>, %arg14: memref<2x1x32xf32, #tpu.memory_space<vmem>>, %arg15: memref<2x1x32xf32, #tpu.memory_space<vmem>>, %arg16: memref<2x1x32xf32, #tpu.memory_space<vmem>>, %arg17: memref<2x32x128xf32, #tpu.memory_space<vmem>>, %arg18: memref<2x1x128xf32, #tpu.memory_space<vmem>>, %arg19: memref<2x128x32xf32, #tpu.memory_space<vmem>>, %arg20: memref<2x1x32xf32, #tpu.memory_space<vmem>>, %arg21: memref<1x32xf32, #tpu.memory_space<vmem>>, %arg22: memref<1x32xf32, #tpu.memory_space<vmem>>, %arg23: memref<32x128xf32, #tpu.memory_space<vmem>>, %arg24: memref<1x128xf32, #tpu.memory_space<vmem>>, %arg25: memref<2x128xf32, #tpu.memory_space<vmem>>) attributes {dimension_semantics = [], scalar_prefetch = 0 : i64, scratch_operands = 0 : i64, tpu.core_type = #tpu.core_type<tc>} {
    %c0 = arith.constant 0 : index
    %c0_0 = arith.constant 0 : index
    %0 = vector.load %arg0[%c0, %c0_0] : memref<32x48xf32, #tpu.memory_space<vmem>>, vector<32x48xf32>
    %c0_1 = arith.constant 0 : index
    %c0_2 = arith.constant 0 : index
    %1 = vector.load %arg1[%c0_1, %c0_2] : memref<48x32xf32, #tpu.memory_space<vmem>>, vector<48x32xf32>
    %cst = arith.constant dense<0.000000e+00> : vector<32x32xf32>
    %2 = tpu.matmul %0, %1, %cst {dimension_numbers = #tpu.dot_dimension_numbers<[1], [0], [0], [1], [0, 0, 1, 1], [], []>} : vector<32x48xf32>, vector<48x32xf32>, vector<32x32xf32> -> vector<32x32xf32>
    %c0_3 = arith.constant 0 : index
    %c0_4 = arith.constant 0 : index
    %3 = vector.load %arg2[%c0_3, %c0_4] : memref<1x32xf32, #tpu.memory_space<vmem>>, vector<1x32xf32>
    %4 = vector.broadcast %3 : vector<1x32xf32> to vector<32x32xf32>
    %5 = arith.addf %2, %4 : vector<32x32xf32>
    %c0_5 = arith.constant 0 : index
    %c0_6 = arith.constant 0 : index
    %6 = vector.load %arg4[%c0_5, %c0_6] : memref<32x32xf32, #tpu.memory_space<vmem>>, vector<32x32xf32>
    %7 = arith.addf %5, %6 : vector<32x32xf32>
    %c0_7 = arith.constant 0 : index
    %c0_8 = arith.constant 0 : index
    %8 = vector.load %arg3[%c0_7, %c0_8] : memref<1x32xf32, #tpu.memory_space<vmem>>, vector<1x32xf32>
    %9 = vector.extract_strided_slice %7 {offsets = [0, 0], sizes = [16, 32], strides = [1, 1]} : vector<32x32xf32> to vector<16x32xf32>
    %10 = vector.extract_strided_slice %7 {offsets = [16, 0], sizes = [16, 32], strides = [1, 1]} : vector<32x32xf32> to vector<16x32xf32>
    %11 = tpu.concatenate %9, %8, %10, %8 in 0 : vector<16x32xf32>, vector<1x32xf32>, vector<16x32xf32>, vector<1x32xf32> -> vector<34x32xf32>
    %c0_9 = arith.constant 0 : index
    %c0_10 = arith.constant 0 : index
    %c0_11 = arith.constant 0 : index
    %12 = vector.load %arg5[%c0_9, %c0_10, %c0_11] : memref<2x1x32xf32, #tpu.memory_space<vmem>>, vector<1x1x32xf32>
    %13 = vector.shape_cast %12 : vector<1x1x32xf32> to vector<1x32xf32>
    %c0_12 = arith.constant 0 : index
    %c0_13 = arith.constant 0 : index
    %c0_14 = arith.constant 0 : index
    %14 = vector.load %arg6[%c0_12, %c0_13, %c0_14] : memref<2x1x32xf32, #tpu.memory_space<vmem>>, vector<1x1x32xf32>
    %15 = vector.shape_cast %14 : vector<1x1x32xf32> to vector<1x32xf32>
    %cst_15 = arith.constant dense<0.000000e+00> : vector<34xf32>
    %16 = vector.multi_reduction <add>, %11, %cst_15 [1] : vector<34x32xf32> to vector<34xf32>
    %17 = vector.shape_cast %16 : vector<34xf32> to vector<34x1xf32>
    %cst_16 = arith.constant 3.200000e+01 : f32
    %18 = vector.broadcast %cst_16 : f32 to vector<34x1xf32>
    %19 = arith.divf %17, %18 : vector<34x1xf32>
    %20 = vector.broadcast %19 : vector<34x1xf32> to vector<34x32xf32>
    %21 = arith.subf %11, %20 : vector<34x32xf32>
    %22 = arith.mulf %21, %21 : vector<34x32xf32>
    %cst_17 = arith.constant dense<0.000000e+00> : vector<34xf32>
    %23 = vector.multi_reduction <add>, %22, %cst_17 [1] : vector<34x32xf32> to vector<34xf32>
    %24 = vector.shape_cast %23 : vector<34xf32> to vector<34x1xf32>
    %cst_18 = arith.constant 3.200000e+01 : f32
    %25 = vector.broadcast %cst_18 : f32 to vector<34x1xf32>
    %26 = arith.divf %24, %25 : vector<34x1xf32>
    %27 = vector.broadcast %19 : vector<34x1xf32> to vector<34x32xf32>
    %28 = arith.subf %11, %27 : vector<34x32xf32>
    %cst_19 = arith.constant 9.99999997E-7 : f32
    %29 = vector.broadcast %cst_19 : f32 to vector<34x1xf32>
    %30 = arith.addf %26, %29 : vector<34x1xf32>
    %31 = math.rsqrt %30 : vector<34x1xf32>
    %32 = vector.broadcast %31 : vector<34x1xf32> to vector<34x32xf32>
    %33 = arith.mulf %28, %32 : vector<34x32xf32>
    %34 = vector.broadcast %13 : vector<1x32xf32> to vector<34x32xf32>
    %35 = arith.mulf %33, %34 : vector<34x32xf32>
    %36 = vector.broadcast %15 : vector<1x32xf32> to vector<34x32xf32>
    %37 = arith.addf %35, %36 : vector<34x32xf32>
    %c0_20 = arith.constant 0 : index
    %c0_21 = arith.constant 0 : index
    %c0_22 = arith.constant 0 : index
    %38 = vector.load %arg7[%c0_20, %c0_21, %c0_22] : memref<2x32x32xf32, #tpu.memory_space<vmem>>, vector<1x32x32xf32>
    %39 = vector.shape_cast %38 : vector<1x32x32xf32> to vector<32x32xf32>
    %cst_23 = arith.constant dense<0.000000e+00> : vector<34x32xf32>
    %40 = tpu.matmul %37, %39, %cst_23 {dimension_numbers = #tpu.dot_dimension_numbers<[1], [0], [0], [1], [0, 0, 1, 1], [], []>} : vector<34x32xf32>, vector<32x32xf32>, vector<34x32xf32> -> vector<34x32xf32>
    %c0_24 = arith.constant 0 : index
    %c0_25 = arith.constant 0 : index
    %c0_26 = arith.constant 0 : index
    %41 = vector.load %arg8[%c0_24, %c0_25, %c0_26] : memref<2x1x32xf32, #tpu.memory_space<vmem>>, vector<1x1x32xf32>
    %42 = vector.shape_cast %41 : vector<1x1x32xf32> to vector<1x32xf32>
    %43 = vector.broadcast %42 : vector<1x32xf32> to vector<34x32xf32>
    %44 = arith.addf %40, %43 : vector<34x32xf32>
    %c0_27 = arith.constant 0 : index
    %c0_28 = arith.constant 0 : index
    %c0_29 = arith.constant 0 : index
    %45 = vector.load %arg9[%c0_27, %c0_28, %c0_29] : memref<2x32x32xf32, #tpu.memory_space<vmem>>, vector<1x32x32xf32>
    %46 = vector.shape_cast %45 : vector<1x32x32xf32> to vector<32x32xf32>
    %cst_30 = arith.constant dense<0.000000e+00> : vector<34x32xf32>
    %47 = tpu.matmul %37, %46, %cst_30 {dimension_numbers = #tpu.dot_dimension_numbers<[1], [0], [0], [1], [0, 0, 1, 1], [], []>} : vector<34x32xf32>, vector<32x32xf32>, vector<34x32xf32> -> vector<34x32xf32>
    %c0_31 = arith.constant 0 : index
    %c0_32 = arith.constant 0 : index
    %c0_33 = arith.constant 0 : index
    %48 = vector.load %arg10[%c0_31, %c0_32, %c0_33] : memref<2x1x32xf32, #tpu.memory_space<vmem>>, vector<1x1x32xf32>
    %49 = vector.shape_cast %48 : vector<1x1x32xf32> to vector<1x32xf32>
    %50 = vector.broadcast %49 : vector<1x32xf32> to vector<34x32xf32>
    %51 = arith.addf %47, %50 : vector<34x32xf32>
    %c0_34 = arith.constant 0 : index
    %c0_35 = arith.constant 0 : index
    %c0_36 = arith.constant 0 : index
    %52 = vector.load %arg11[%c0_34, %c0_35, %c0_36] : memref<2x32x32xf32, #tpu.memory_space<vmem>>, vector<1x32x32xf32>
    %53 = vector.shape_cast %52 : vector<1x32x32xf32> to vector<32x32xf32>
    %cst_37 = arith.constant dense<0.000000e+00> : vector<34x32xf32>
    %54 = tpu.matmul %37, %53, %cst_37 {dimension_numbers = #tpu.dot_dimension_numbers<[1], [0], [0], [1], [0, 0, 1, 1], [], []>} : vector<34x32xf32>, vector<32x32xf32>, vector<34x32xf32> -> vector<34x32xf32>
    %c0_38 = arith.constant 0 : index
    %c0_39 = arith.constant 0 : index
    %c0_40 = arith.constant 0 : index
    %55 = vector.load %arg12[%c0_38, %c0_39, %c0_40] : memref<2x1x32xf32, #tpu.memory_space<vmem>>, vector<1x1x32xf32>
    %56 = vector.shape_cast %55 : vector<1x1x32xf32> to vector<1x32xf32>
    %57 = vector.broadcast %56 : vector<1x32xf32> to vector<34x32xf32>
    %58 = arith.addf %54, %57 : vector<34x32xf32>
    %59 = vector.extract_strided_slice %44 {offsets = [0, 0], sizes = [17, 8], strides = [1, 1]} : vector<34x32xf32> to vector<17x8xf32>
    %60 = vector.extract_strided_slice %44 {offsets = [0, 8], sizes = [17, 8], strides = [1, 1]} : vector<34x32xf32> to vector<17x8xf32>
    %61 = vector.extract_strided_slice %44 {offsets = [0, 16], sizes = [17, 8], strides = [1, 1]} : vector<34x32xf32> to vector<17x8xf32>
    %62 = vector.extract_strided_slice %44 {offsets = [0, 24], sizes = [17, 8], strides = [1, 1]} : vector<34x32xf32> to vector<17x8xf32>
    %63 = vector.extract_strided_slice %44 {offsets = [17, 0], sizes = [17, 8], strides = [1, 1]} : vector<34x32xf32> to vector<17x8xf32>
    %64 = vector.extract_strided_slice %44 {offsets = [17, 8], sizes = [17, 8], strides = [1, 1]} : vector<34x32xf32> to vector<17x8xf32>
    %65 = vector.extract_strided_slice %44 {offsets = [17, 16], sizes = [17, 8], strides = [1, 1]} : vector<34x32xf32> to vector<17x8xf32>
    %66 = vector.extract_strided_slice %44 {offsets = [17, 24], sizes = [17, 8], strides = [1, 1]} : vector<34x32xf32> to vector<17x8xf32>
    %67 = vector.shape_cast %59 : vector<17x8xf32> to vector<1x17x8xf32>
    %68 = vector.shape_cast %60 : vector<17x8xf32> to vector<1x17x8xf32>
    %69 = vector.shape_cast %61 : vector<17x8xf32> to vector<1x17x8xf32>
    %70 = vector.shape_cast %62 : vector<17x8xf32> to vector<1x17x8xf32>
    %71 = vector.shape_cast %63 : vector<17x8xf32> to vector<1x17x8xf32>
    %72 = vector.shape_cast %64 : vector<17x8xf32> to vector<1x17x8xf32>
    %73 = vector.shape_cast %65 : vector<17x8xf32> to vector<1x17x8xf32>
    %74 = vector.shape_cast %66 : vector<17x8xf32> to vector<1x17x8xf32>
    %75 = tpu.concatenate %67, %68, %69, %70, %71, %72, %73, %74 in 0 : vector<1x17x8xf32>, vector<1x17x8xf32>, vector<1x17x8xf32>, vector<1x17x8xf32>, vector<1x17x8xf32>, vector<1x17x8xf32>, vector<1x17x8xf32>, vector<1x17x8xf32> -> vector<8x17x8xf32>
    %76 = vector.extract_strided_slice %51 {offsets = [0, 0], sizes = [17, 8], strides = [1, 1]} : vector<34x32xf32> to vector<17x8xf32>
    %77 = vector.extract_strided_slice %51 {offsets = [0, 8], sizes = [17, 8], strides = [1, 1]} : vector<34x32xf32> to vector<17x8xf32>
    %78 = vector.extract_strided_slice %51 {offsets = [0, 16], sizes = [17, 8], strides = [1, 1]} : vector<34x32xf32> to vector<17x8xf32>
    %79 = vector.extract_strided_slice %51 {offsets = [0, 24], sizes = [17, 8], strides = [1, 1]} : vector<34x32xf32> to vector<17x8xf32>
    %80 = vector.extract_strided_slice %51 {offsets = [17, 0], sizes = [17, 8], strides = [1, 1]} : vector<34x32xf32> to vector<17x8xf32>
    %81 = vector.extract_strided_slice %51 {offsets = [17, 8], sizes = [17, 8], strides = [1, 1]} : vector<34x32xf32> to vector<17x8xf32>
    %82 = vector.extract_strided_slice %51 {offsets = [17, 16], sizes = [17, 8], strides = [1, 1]} : vector<34x32xf32> to vector<17x8xf32>
    %83 = vector.extract_strided_slice %51 {offsets = [17, 24], sizes = [17, 8], strides = [1, 1]} : vector<34x32xf32> to vector<17x8xf32>
    %84 = vector.shape_cast %76 : vector<17x8xf32> to vector<1x17x8xf32>
    %85 = vector.shape_cast %77 : vector<17x8xf32> to vector<1x17x8xf32>
    %86 = vector.shape_cast %78 : vector<17x8xf32> to vector<1x17x8xf32>
    %87 = vector.shape_cast %79 : vector<17x8xf32> to vector<1x17x8xf32>
    %88 = vector.shape_cast %80 : vector<17x8xf32> to vector<1x17x8xf32>
    %89 = vector.shape_cast %81 : vector<17x8xf32> to vector<1x17x8xf32>
    %90 = vector.shape_cast %82 : vector<17x8xf32> to vector<1x17x8xf32>
    %91 = vector.shape_cast %83 : vector<17x8xf32> to vector<1x17x8xf32>
    %92 = tpu.concatenate %84, %85, %86, %87, %88, %89, %90, %91 in 0 : vector<1x17x8xf32>, vector<1x17x8xf32>, vector<1x17x8xf32>, vector<1x17x8xf32>, vector<1x17x8xf32>, vector<1x17x8xf32>, vector<1x17x8xf32>, vector<1x17x8xf32> -> vector<8x17x8xf32>
    %93 = vector.extract_strided_slice %58 {offsets = [0, 0], sizes = [17, 8], strides = [1, 1]} : vector<34x32xf32> to vector<17x8xf32>
    %94 = vector.extract_strided_slice %58 {offsets = [0, 8], sizes = [17, 8], strides = [1, 1]} : vector<34x32xf32> to vector<17x8xf32>
    %95 = vector.extract_strided_slice %58 {offsets = [0, 16], sizes = [17, 8], strides = [1, 1]} : vector<34x32xf32> to vector<17x8xf32>
    %96 = vector.extract_strided_slice %58 {offsets = [0, 24], sizes = [17, 8], strides = [1, 1]} : vector<34x32xf32> to vector<17x8xf32>
    %97 = vector.extract_strided_slice %58 {offsets = [17, 0], sizes = [17, 8], strides = [1, 1]} : vector<34x32xf32> to vector<17x8xf32>
    %98 = vector.extract_strided_slice %58 {offsets = [17, 8], sizes = [17, 8], strides = [1, 1]} : vector<34x32xf32> to vector<17x8xf32>
    %99 = vector.extract_strided_slice %58 {offsets = [17, 16], sizes = [17, 8], strides = [1, 1]} : vector<34x32xf32> to vector<17x8xf32>
    %100 = vector.extract_strided_slice %58 {offsets = [17, 24], sizes = [17, 8], strides = [1, 1]} : vector<34x32xf32> to vector<17x8xf32>
    %101 = vector.shape_cast %93 : vector<17x8xf32> to vector<1x17x8xf32>
    %102 = vector.shape_cast %94 : vector<17x8xf32> to vector<1x17x8xf32>
    %103 = vector.shape_cast %95 : vector<17x8xf32> to vector<1x17x8xf32>
    %104 = vector.shape_cast %96 : vector<17x8xf32> to vector<1x17x8xf32>
    %105 = vector.shape_cast %97 : vector<17x8xf32> to vector<1x17x8xf32>
    %106 = vector.shape_cast %98 : vector<17x8xf32> to vector<1x17x8xf32>
    %107 = vector.shape_cast %99 : vector<17x8xf32> to vector<1x17x8xf32>
    %108 = vector.shape_cast %100 : vector<17x8xf32> to vector<1x17x8xf32>
    %109 = tpu.concatenate %101, %102, %103, %104, %105, %106, %107, %108 in 0 : vector<1x17x8xf32>, vector<1x17x8xf32>, vector<1x17x8xf32>, vector<1x17x8xf32>, vector<1x17x8xf32>, vector<1x17x8xf32>, vector<1x17x8xf32>, vector<1x17x8xf32> -> vector<8x17x8xf32>
    "tpu.trace_start"() <{level = 10 : i32, message = "gqd,gkd->gqk"}> : () -> ()
    %cst_41 = arith.constant dense<0.000000e+00> : vector<8x17x17xf32>
    %110 = tpu.matmul %75, %92, %cst_41 {dimension_numbers = #tpu.dot_dimension_numbers<[2], [2], [1], [1], [0, 0, 0, 1, 1, 1], [0], [0]>} : vector<8x17x8xf32>, vector<8x17x8xf32>, vector<8x17x17xf32> -> vector<8x17x17xf32>
    "tpu.trace_stop"() : () -> ()
    %cst_42 = arith.constant dense<0xFF800000> : vector<8x17xf32>
    %111 = vector.multi_reduction <maximumf>, %110, %cst_42 [2] : vector<8x17x17xf32> to vector<8x17xf32>
    %112 = vector.shape_cast %111 : vector<8x17xf32> to vector<8x17x1xf32>
    %113 = vector.broadcast %112 : vector<8x17x1xf32> to vector<8x17x17xf32>
    %114 = arith.subf %110, %113 : vector<8x17x17xf32>
    %115 = math.exp %114 : vector<8x17x17xf32>
    %cst_43 = arith.constant dense<0.000000e+00> : vector<8x17xf32>
    %116 = vector.multi_reduction <add>, %115, %cst_43 [2] : vector<8x17x17xf32> to vector<8x17xf32>
    %117 = vector.shape_cast %116 : vector<8x17xf32> to vector<8x17x1xf32>
    %118 = tpu.reciprocal %117 {approx = true} : vector<8x17x1xf32> -> vector<8x17x1xf32>
    %119 = vector.broadcast %118 : vector<8x17x1xf32> to vector<8x17x17xf32>
    %120 = arith.mulf %115, %119 : vector<8x17x17xf32>
    "tpu.trace_start"() <{level = 10 : i32, message = "gqk,gkd->gqd"}> : () -> ()
    %cst_44 = arith.constant dense<0.000000e+00> : vector<8x17x8xf32>
    %121 = tpu.matmul %120, %109, %cst_44 {dimension_numbers = #tpu.dot_dimension_numbers<[2], [1], [1], [2], [0, 0, 0, 1, 1, 2], [0], [0]>} : vector<8x17x17xf32>, vector<8x17x8xf32>, vector<8x17x8xf32> -> vector<8x17x8xf32>
    "tpu.trace_stop"() : () -> ()
    %c0_45 = arith.constant 0 : index
    %c0_46 = arith.constant 0 : index
    %c0_47 = arith.constant 0 : index
    %c0_48 = arith.constant 0 : index
    %122 = vector.load %arg13[%c0_45, %c0_46, %c0_47, %c0_48] : memref<2x8x8x32xf32, #tpu.memory_space<vmem>>, vector<1x8x8x32xf32>
    %123 = vector.shape_cast %122 : vector<1x8x8x32xf32> to vector<8x8x32xf32>
    "tpu.trace_start"() <{level = 10 : i32, message = "gqd,gdc->gqc"}> : () -> ()
    %cst_49 = arith.constant dense<0.000000e+00> : vector<8x17x32xf32>
    %124 = tpu.matmul %121, %123, %cst_49 {dimension_numbers = #tpu.dot_dimension_numbers<[2], [1], [1], [2], [0, 0, 0, 1, 1, 2], [0], [0]>} : vector<8x17x8xf32>, vector<8x8x32xf32>, vector<8x17x32xf32> -> vector<8x17x32xf32>
    "tpu.trace_stop"() : () -> ()
    %125 = vector.extract_strided_slice %124 {offsets = [0, 0, 0], sizes = [4, 17, 32], strides = [1, 1, 1]} : vector<8x17x32xf32> to vector<4x17x32xf32>
    %cst_50 = arith.constant dense<0.000000e+00> : vector<17x32xf32>
    %126 = vector.multi_reduction <add>, %125, %cst_50 [0] : vector<4x17x32xf32> to vector<17x32xf32>
    %127 = vector.extract_strided_slice %124 {offsets = [4, 0, 0], sizes = [4, 17, 32], strides = [1, 1, 1]} : vector<8x17x32xf32> to vector<4x17x32xf32>
    %cst_51 = arith.constant dense<0.000000e+00> : vector<17x32xf32>
    %128 = vector.multi_reduction <add>, %127, %cst_51 [0] : vector<4x17x32xf32> to vector<17x32xf32>
    %129 = tpu.concatenate %126, %128 in 0 : vector<17x32xf32>, vector<17x32xf32> -> vector<34x32xf32>
    %130 = arith.addf %11, %129 : vector<34x32xf32>
    %c0_52 = arith.constant 0 : index
    %c0_53 = arith.constant 0 : index
    %c0_54 = arith.constant 0 : index
    %131 = vector.load %arg14[%c0_52, %c0_53, %c0_54] : memref<2x1x32xf32, #tpu.memory_space<vmem>>, vector<1x1x32xf32>
    %132 = vector.shape_cast %131 : vector<1x1x32xf32> to vector<1x32xf32>
    %133 = vector.broadcast %132 : vector<1x32xf32> to vector<34x32xf32>
    %134 = arith.addf %130, %133 : vector<34x32xf32>
    %c0_55 = arith.constant 0 : index
    %c0_56 = arith.constant 0 : index
    %c0_57 = arith.constant 0 : index
    %135 = vector.load %arg15[%c0_55, %c0_56, %c0_57] : memref<2x1x32xf32, #tpu.memory_space<vmem>>, vector<1x1x32xf32>
    %136 = vector.shape_cast %135 : vector<1x1x32xf32> to vector<1x32xf32>
    %c0_58 = arith.constant 0 : index
    %c0_59 = arith.constant 0 : index
    %c0_60 = arith.constant 0 : index
    %137 = vector.load %arg16[%c0_58, %c0_59, %c0_60] : memref<2x1x32xf32, #tpu.memory_space<vmem>>, vector<1x1x32xf32>
    %138 = vector.shape_cast %137 : vector<1x1x32xf32> to vector<1x32xf32>
    %cst_61 = arith.constant dense<0.000000e+00> : vector<34xf32>
    %139 = vector.multi_reduction <add>, %134, %cst_61 [1] : vector<34x32xf32> to vector<34xf32>
    %140 = vector.shape_cast %139 : vector<34xf32> to vector<34x1xf32>
    %cst_62 = arith.constant 3.200000e+01 : f32
    %141 = vector.broadcast %cst_62 : f32 to vector<34x1xf32>
    %142 = arith.divf %140, %141 : vector<34x1xf32>
    %143 = vector.broadcast %142 : vector<34x1xf32> to vector<34x32xf32>
    %144 = arith.subf %134, %143 : vector<34x32xf32>
    %145 = arith.mulf %144, %144 : vector<34x32xf32>
    %cst_63 = arith.constant dense<0.000000e+00> : vector<34xf32>
    %146 = vector.multi_reduction <add>, %145, %cst_63 [1] : vector<34x32xf32> to vector<34xf32>
    %147 = vector.shape_cast %146 : vector<34xf32> to vector<34x1xf32>
    %cst_64 = arith.constant 3.200000e+01 : f32
    %148 = vector.broadcast %cst_64 : f32 to vector<34x1xf32>
    %149 = arith.divf %147, %148 : vector<34x1xf32>
    %150 = vector.broadcast %142 : vector<34x1xf32> to vector<34x32xf32>
    %151 = arith.subf %134, %150 : vector<34x32xf32>
    %cst_65 = arith.constant 9.99999997E-7 : f32
    %152 = vector.broadcast %cst_65 : f32 to vector<34x1xf32>
    %153 = arith.addf %149, %152 : vector<34x1xf32>
    %154 = math.rsqrt %153 : vector<34x1xf32>
    %155 = vector.broadcast %154 : vector<34x1xf32> to vector<34x32xf32>
    %156 = arith.mulf %151, %155 : vector<34x32xf32>
    %157 = vector.broadcast %136 : vector<1x32xf32> to vector<34x32xf32>
    %158 = arith.mulf %156, %157 : vector<34x32xf32>
    %159 = vector.broadcast %138 : vector<1x32xf32> to vector<34x32xf32>
    %160 = arith.addf %158, %159 : vector<34x32xf32>
    %c0_66 = arith.constant 0 : index
    %c0_67 = arith.constant 0 : index
    %c0_68 = arith.constant 0 : index
    %161 = vector.load %arg17[%c0_66, %c0_67, %c0_68] : memref<2x32x128xf32, #tpu.memory_space<vmem>>, vector<1x32x128xf32>
    %162 = vector.shape_cast %161 : vector<1x32x128xf32> to vector<32x128xf32>
    %cst_69 = arith.constant dense<0.000000e+00> : vector<34x128xf32>
    %163 = tpu.matmul %160, %162, %cst_69 {dimension_numbers = #tpu.dot_dimension_numbers<[1], [0], [0], [1], [0, 0, 1, 1], [], []>} : vector<34x32xf32>, vector<32x128xf32>, vector<34x128xf32> -> vector<34x128xf32>
    %c0_70 = arith.constant 0 : index
    %c0_71 = arith.constant 0 : index
    %c0_72 = arith.constant 0 : index
    %164 = vector.load %arg18[%c0_70, %c0_71, %c0_72] : memref<2x1x128xf32, #tpu.memory_space<vmem>>, vector<1x1x128xf32>
    %165 = vector.shape_cast %164 : vector<1x1x128xf32> to vector<1x128xf32>
    %166 = vector.broadcast %165 : vector<1x128xf32> to vector<34x128xf32>
    %167 = arith.addf %163, %166 : vector<34x128xf32>
    %cst_73 = arith.constant 5.000000e-01 : f32
    %168 = vector.broadcast %cst_73 : f32 to vector<34x128xf32>
    %169 = arith.mulf %168, %167 : vector<34x128xf32>
    %cst_74 = arith.constant 0.707106769 : f32
    %170 = vector.broadcast %cst_74 : f32 to vector<34x128xf32>
    %171 = arith.mulf %167, %170 : vector<34x128xf32>
    %172 = math.erf %171 : vector<34x128xf32>
    %cst_75 = arith.constant 1.000000e+00 : f32
    %173 = vector.broadcast %cst_75 : f32 to vector<34x128xf32>
    %174 = arith.addf %173, %172 : vector<34x128xf32>
    %175 = arith.mulf %169, %174 : vector<34x128xf32>
    %c0_76 = arith.constant 0 : index
    %c0_77 = arith.constant 0 : index
    %c0_78 = arith.constant 0 : index
    %176 = vector.load %arg19[%c0_76, %c0_77, %c0_78] : memref<2x128x32xf32, #tpu.memory_space<vmem>>, vector<1x128x32xf32>
    %177 = vector.shape_cast %176 : vector<1x128x32xf32> to vector<128x32xf32>
    %cst_79 = arith.constant dense<0.000000e+00> : vector<34x32xf32>
    %178 = tpu.matmul %175, %177, %cst_79 {dimension_numbers = #tpu.dot_dimension_numbers<[1], [0], [0], [1], [0, 0, 1, 1], [], []>} : vector<34x128xf32>, vector<128x32xf32>, vector<34x32xf32> -> vector<34x32xf32>
    %179 = arith.addf %134, %178 : vector<34x32xf32>
    %c0_80 = arith.constant 0 : index
    %c0_81 = arith.constant 0 : index
    %c0_82 = arith.constant 0 : index
    %180 = vector.load %arg20[%c0_80, %c0_81, %c0_82] : memref<2x1x32xf32, #tpu.memory_space<vmem>>, vector<1x1x32xf32>
    %181 = vector.shape_cast %180 : vector<1x1x32xf32> to vector<1x32xf32>
    %182 = vector.broadcast %181 : vector<1x32xf32> to vector<34x32xf32>
    %183 = arith.addf %179, %182 : vector<34x32xf32>
    %c1 = arith.constant 1 : index
    %c0_83 = arith.constant 0 : index
    %c0_84 = arith.constant 0 : index
    %184 = vector.load %arg5[%c1, %c0_83, %c0_84] : memref<2x1x32xf32, #tpu.memory_space<vmem>>, vector<1x1x32xf32>
    %185 = vector.shape_cast %184 : vector<1x1x32xf32> to vector<1x32xf32>
    %c1_85 = arith.constant 1 : index
    %c0_86 = arith.constant 0 : index
    %c0_87 = arith.constant 0 : index
    %186 = vector.load %arg6[%c1_85, %c0_86, %c0_87] : memref<2x1x32xf32, #tpu.memory_space<vmem>>, vector<1x1x32xf32>
    %187 = vector.shape_cast %186 : vector<1x1x32xf32> to vector<1x32xf32>
    %cst_88 = arith.constant dense<0.000000e+00> : vector<34xf32>
    %188 = vector.multi_reduction <add>, %183, %cst_88 [1] : vector<34x32xf32> to vector<34xf32>
    %189 = vector.shape_cast %188 : vector<34xf32> to vector<34x1xf32>
    %cst_89 = arith.constant 3.200000e+01 : f32
    %190 = vector.broadcast %cst_89 : f32 to vector<34x1xf32>
    %191 = arith.divf %189, %190 : vector<34x1xf32>
    %192 = vector.broadcast %191 : vector<34x1xf32> to vector<34x32xf32>
    %193 = arith.subf %183, %192 : vector<34x32xf32>
    %194 = arith.mulf %193, %193 : vector<34x32xf32>
    %cst_90 = arith.constant dense<0.000000e+00> : vector<34xf32>
    %195 = vector.multi_reduction <add>, %194, %cst_90 [1] : vector<34x32xf32> to vector<34xf32>
    %196 = vector.shape_cast %195 : vector<34xf32> to vector<34x1xf32>
    %cst_91 = arith.constant 3.200000e+01 : f32
    %197 = vector.broadcast %cst_91 : f32 to vector<34x1xf32>
    %198 = arith.divf %196, %197 : vector<34x1xf32>
    %199 = vector.broadcast %191 : vector<34x1xf32> to vector<34x32xf32>
    %200 = arith.subf %183, %199 : vector<34x32xf32>
    %cst_92 = arith.constant 9.99999997E-7 : f32
    %201 = vector.broadcast %cst_92 : f32 to vector<34x1xf32>
    %202 = arith.addf %198, %201 : vector<34x1xf32>
    %203 = math.rsqrt %202 : vector<34x1xf32>
    %204 = vector.broadcast %203 : vector<34x1xf32> to vector<34x32xf32>
    %205 = arith.mulf %200, %204 : vector<34x32xf32>
    %206 = vector.broadcast %185 : vector<1x32xf32> to vector<34x32xf32>
    %207 = arith.mulf %205, %206 : vector<34x32xf32>
    %208 = vector.broadcast %187 : vector<1x32xf32> to vector<34x32xf32>
    %209 = arith.addf %207, %208 : vector<34x32xf32>
    %c1_93 = arith.constant 1 : index
    %c0_94 = arith.constant 0 : index
    %c0_95 = arith.constant 0 : index
    %210 = vector.load %arg7[%c1_93, %c0_94, %c0_95] : memref<2x32x32xf32, #tpu.memory_space<vmem>>, vector<1x32x32xf32>
    %211 = vector.shape_cast %210 : vector<1x32x32xf32> to vector<32x32xf32>
    %cst_96 = arith.constant dense<0.000000e+00> : vector<34x32xf32>
    %212 = tpu.matmul %209, %211, %cst_96 {dimension_numbers = #tpu.dot_dimension_numbers<[1], [0], [0], [1], [0, 0, 1, 1], [], []>} : vector<34x32xf32>, vector<32x32xf32>, vector<34x32xf32> -> vector<34x32xf32>
    %c1_97 = arith.constant 1 : index
    %c0_98 = arith.constant 0 : index
    %c0_99 = arith.constant 0 : index
    %213 = vector.load %arg8[%c1_97, %c0_98, %c0_99] : memref<2x1x32xf32, #tpu.memory_space<vmem>>, vector<1x1x32xf32>
    %214 = vector.shape_cast %213 : vector<1x1x32xf32> to vector<1x32xf32>
    %215 = vector.broadcast %214 : vector<1x32xf32> to vector<34x32xf32>
    %216 = arith.addf %212, %215 : vector<34x32xf32>
    %c1_100 = arith.constant 1 : index
    %c0_101 = arith.constant 0 : index
    %c0_102 = arith.constant 0 : index
    %217 = vector.load %arg9[%c1_100, %c0_101, %c0_102] : memref<2x32x32xf32, #tpu.memory_space<vmem>>, vector<1x32x32xf32>
    %218 = vector.shape_cast %217 : vector<1x32x32xf32> to vector<32x32xf32>
    %cst_103 = arith.constant dense<0.000000e+00> : vector<34x32xf32>
    %219 = tpu.matmul %209, %218, %cst_103 {dimension_numbers = #tpu.dot_dimension_numbers<[1], [0], [0], [1], [0, 0, 1, 1], [], []>} : vector<34x32xf32>, vector<32x32xf32>, vector<34x32xf32> -> vector<34x32xf32>
    %c1_104 = arith.constant 1 : index
    %c0_105 = arith.constant 0 : index
    %c0_106 = arith.constant 0 : index
    %220 = vector.load %arg10[%c1_104, %c0_105, %c0_106] : memref<2x1x32xf32, #tpu.memory_space<vmem>>, vector<1x1x32xf32>
    %221 = vector.shape_cast %220 : vector<1x1x32xf32> to vector<1x32xf32>
    %222 = vector.broadcast %221 : vector<1x32xf32> to vector<34x32xf32>
    %223 = arith.addf %219, %222 : vector<34x32xf32>
    %c1_107 = arith.constant 1 : index
    %c0_108 = arith.constant 0 : index
    %c0_109 = arith.constant 0 : index
    %224 = vector.load %arg11[%c1_107, %c0_108, %c0_109] : memref<2x32x32xf32, #tpu.memory_space<vmem>>, vector<1x32x32xf32>
    %225 = vector.shape_cast %224 : vector<1x32x32xf32> to vector<32x32xf32>
    %cst_110 = arith.constant dense<0.000000e+00> : vector<34x32xf32>
    %226 = tpu.matmul %209, %225, %cst_110 {dimension_numbers = #tpu.dot_dimension_numbers<[1], [0], [0], [1], [0, 0, 1, 1], [], []>} : vector<34x32xf32>, vector<32x32xf32>, vector<34x32xf32> -> vector<34x32xf32>
    %c1_111 = arith.constant 1 : index
    %c0_112 = arith.constant 0 : index
    %c0_113 = arith.constant 0 : index
    %227 = vector.load %arg12[%c1_111, %c0_112, %c0_113] : memref<2x1x32xf32, #tpu.memory_space<vmem>>, vector<1x1x32xf32>
    %228 = vector.shape_cast %227 : vector<1x1x32xf32> to vector<1x32xf32>
    %229 = vector.broadcast %228 : vector<1x32xf32> to vector<34x32xf32>
    %230 = arith.addf %226, %229 : vector<34x32xf32>
    %231 = vector.extract_strided_slice %216 {offsets = [0, 0], sizes = [17, 8], strides = [1, 1]} : vector<34x32xf32> to vector<17x8xf32>
    %232 = vector.extract_strided_slice %216 {offsets = [0, 8], sizes = [17, 8], strides = [1, 1]} : vector<34x32xf32> to vector<17x8xf32>
    %233 = vector.extract_strided_slice %216 {offsets = [0, 16], sizes = [17, 8], strides = [1, 1]} : vector<34x32xf32> to vector<17x8xf32>
    %234 = vector.extract_strided_slice %216 {offsets = [0, 24], sizes = [17, 8], strides = [1, 1]} : vector<34x32xf32> to vector<17x8xf32>
    %235 = vector.extract_strided_slice %216 {offsets = [17, 0], sizes = [17, 8], strides = [1, 1]} : vector<34x32xf32> to vector<17x8xf32>
    %236 = vector.extract_strided_slice %216 {offsets = [17, 8], sizes = [17, 8], strides = [1, 1]} : vector<34x32xf32> to vector<17x8xf32>
    %237 = vector.extract_strided_slice %216 {offsets = [17, 16], sizes = [17, 8], strides = [1, 1]} : vector<34x32xf32> to vector<17x8xf32>
    %238 = vector.extract_strided_slice %216 {offsets = [17, 24], sizes = [17, 8], strides = [1, 1]} : vector<34x32xf32> to vector<17x8xf32>
    %239 = vector.shape_cast %231 : vector<17x8xf32> to vector<1x17x8xf32>
    %240 = vector.shape_cast %232 : vector<17x8xf32> to vector<1x17x8xf32>
    %241 = vector.shape_cast %233 : vector<17x8xf32> to vector<1x17x8xf32>
    %242 = vector.shape_cast %234 : vector<17x8xf32> to vector<1x17x8xf32>
    %243 = vector.shape_cast %235 : vector<17x8xf32> to vector<1x17x8xf32>
    %244 = vector.shape_cast %236 : vector<17x8xf32> to vector<1x17x8xf32>
    %245 = vector.shape_cast %237 : vector<17x8xf32> to vector<1x17x8xf32>
    %246 = vector.shape_cast %238 : vector<17x8xf32> to vector<1x17x8xf32>
    %247 = tpu.concatenate %239, %240, %241, %242, %243, %244, %245, %246 in 0 : vector<1x17x8xf32>, vector<1x17x8xf32>, vector<1x17x8xf32>, vector<1x17x8xf32>, vector<1x17x8xf32>, vector<1x17x8xf32>, vector<1x17x8xf32>, vector<1x17x8xf32> -> vector<8x17x8xf32>
    %248 = vector.extract_strided_slice %223 {offsets = [0, 0], sizes = [17, 8], strides = [1, 1]} : vector<34x32xf32> to vector<17x8xf32>
    %249 = vector.extract_strided_slice %223 {offsets = [0, 8], sizes = [17, 8], strides = [1, 1]} : vector<34x32xf32> to vector<17x8xf32>
    %250 = vector.extract_strided_slice %223 {offsets = [0, 16], sizes = [17, 8], strides = [1, 1]} : vector<34x32xf32> to vector<17x8xf32>
    %251 = vector.extract_strided_slice %223 {offsets = [0, 24], sizes = [17, 8], strides = [1, 1]} : vector<34x32xf32> to vector<17x8xf32>
    %252 = vector.extract_strided_slice %223 {offsets = [17, 0], sizes = [17, 8], strides = [1, 1]} : vector<34x32xf32> to vector<17x8xf32>
    %253 = vector.extract_strided_slice %223 {offsets = [17, 8], sizes = [17, 8], strides = [1, 1]} : vector<34x32xf32> to vector<17x8xf32>
    %254 = vector.extract_strided_slice %223 {offsets = [17, 16], sizes = [17, 8], strides = [1, 1]} : vector<34x32xf32> to vector<17x8xf32>
    %255 = vector.extract_strided_slice %223 {offsets = [17, 24], sizes = [17, 8], strides = [1, 1]} : vector<34x32xf32> to vector<17x8xf32>
    %256 = vector.shape_cast %248 : vector<17x8xf32> to vector<1x17x8xf32>
    %257 = vector.shape_cast %249 : vector<17x8xf32> to vector<1x17x8xf32>
    %258 = vector.shape_cast %250 : vector<17x8xf32> to vector<1x17x8xf32>
    %259 = vector.shape_cast %251 : vector<17x8xf32> to vector<1x17x8xf32>
    %260 = vector.shape_cast %252 : vector<17x8xf32> to vector<1x17x8xf32>
    %261 = vector.shape_cast %253 : vector<17x8xf32> to vector<1x17x8xf32>
    %262 = vector.shape_cast %254 : vector<17x8xf32> to vector<1x17x8xf32>
    %263 = vector.shape_cast %255 : vector<17x8xf32> to vector<1x17x8xf32>
    %264 = tpu.concatenate %256, %257, %258, %259, %260, %261, %262, %263 in 0 : vector<1x17x8xf32>, vector<1x17x8xf32>, vector<1x17x8xf32>, vector<1x17x8xf32>, vector<1x17x8xf32>, vector<1x17x8xf32>, vector<1x17x8xf32>, vector<1x17x8xf32> -> vector<8x17x8xf32>
    %265 = vector.extract_strided_slice %230 {offsets = [0, 0], sizes = [17, 8], strides = [1, 1]} : vector<34x32xf32> to vector<17x8xf32>
    %266 = vector.extract_strided_slice %230 {offsets = [0, 8], sizes = [17, 8], strides = [1, 1]} : vector<34x32xf32> to vector<17x8xf32>
    %267 = vector.extract_strided_slice %230 {offsets = [0, 16], sizes = [17, 8], strides = [1, 1]} : vector<34x32xf32> to vector<17x8xf32>
    %268 = vector.extract_strided_slice %230 {offsets = [0, 24], sizes = [17, 8], strides = [1, 1]} : vector<34x32xf32> to vector<17x8xf32>
    %269 = vector.extract_strided_slice %230 {offsets = [17, 0], sizes = [17, 8], strides = [1, 1]} : vector<34x32xf32> to vector<17x8xf32>
    %270 = vector.extract_strided_slice %230 {offsets = [17, 8], sizes = [17, 8], strides = [1, 1]} : vector<34x32xf32> to vector<17x8xf32>
    %271 = vector.extract_strided_slice %230 {offsets = [17, 16], sizes = [17, 8], strides = [1, 1]} : vector<34x32xf32> to vector<17x8xf32>
    %272 = vector.extract_strided_slice %230 {offsets = [17, 24], sizes = [17, 8], strides = [1, 1]} : vector<34x32xf32> to vector<17x8xf32>
    %273 = vector.shape_cast %265 : vector<17x8xf32> to vector<1x17x8xf32>
    %274 = vector.shape_cast %266 : vector<17x8xf32> to vector<1x17x8xf32>
    %275 = vector.shape_cast %267 : vector<17x8xf32> to vector<1x17x8xf32>
    %276 = vector.shape_cast %268 : vector<17x8xf32> to vector<1x17x8xf32>
    %277 = vector.shape_cast %269 : vector<17x8xf32> to vector<1x17x8xf32>
    %278 = vector.shape_cast %270 : vector<17x8xf32> to vector<1x17x8xf32>
    %279 = vector.shape_cast %271 : vector<17x8xf32> to vector<1x17x8xf32>
    %280 = vector.shape_cast %272 : vector<17x8xf32> to vector<1x17x8xf32>
    %281 = tpu.concatenate %273, %274, %275, %276, %277, %278, %279, %280 in 0 : vector<1x17x8xf32>, vector<1x17x8xf32>, vector<1x17x8xf32>, vector<1x17x8xf32>, vector<1x17x8xf32>, vector<1x17x8xf32>, vector<1x17x8xf32>, vector<1x17x8xf32> -> vector<8x17x8xf32>
    "tpu.trace_start"() <{level = 10 : i32, message = "gqd,gkd->gqk"}> : () -> ()
    %cst_114 = arith.constant dense<0.000000e+00> : vector<8x17x17xf32>
    %282 = tpu.matmul %247, %264, %cst_114 {dimension_numbers = #tpu.dot_dimension_numbers<[2], [2], [1], [1], [0, 0, 0, 1, 1, 1], [0], [0]>} : vector<8x17x8xf32>, vector<8x17x8xf32>, vector<8x17x17xf32> -> vector<8x17x17xf32>
    "tpu.trace_stop"() : () -> ()
    %cst_115 = arith.constant dense<0xFF800000> : vector<8x17xf32>
    %283 = vector.multi_reduction <maximumf>, %282, %cst_115 [2] : vector<8x17x17xf32> to vector<8x17xf32>
    %284 = vector.shape_cast %283 : vector<8x17xf32> to vector<8x17x1xf32>
    %285 = vector.broadcast %284 : vector<8x17x1xf32> to vector<8x17x17xf32>
    %286 = arith.subf %282, %285 : vector<8x17x17xf32>
    %287 = math.exp %286 : vector<8x17x17xf32>
    %cst_116 = arith.constant dense<0.000000e+00> : vector<8x17xf32>
    %288 = vector.multi_reduction <add>, %287, %cst_116 [2] : vector<8x17x17xf32> to vector<8x17xf32>
    %289 = vector.shape_cast %288 : vector<8x17xf32> to vector<8x17x1xf32>
    %290 = tpu.reciprocal %289 {approx = true} : vector<8x17x1xf32> -> vector<8x17x1xf32>
    %291 = vector.broadcast %290 : vector<8x17x1xf32> to vector<8x17x17xf32>
    %292 = arith.mulf %287, %291 : vector<8x17x17xf32>
    "tpu.trace_start"() <{level = 10 : i32, message = "gqk,gkd->gqd"}> : () -> ()
    %cst_117 = arith.constant dense<0.000000e+00> : vector<8x17x8xf32>
    %293 = tpu.matmul %292, %281, %cst_117 {dimension_numbers = #tpu.dot_dimension_numbers<[2], [1], [1], [2], [0, 0, 0, 1, 1, 2], [0], [0]>} : vector<8x17x17xf32>, vector<8x17x8xf32>, vector<8x17x8xf32> -> vector<8x17x8xf32>
    "tpu.trace_stop"() : () -> ()
    %c1_118 = arith.constant 1 : index
    %c0_119 = arith.constant 0 : index
    %c0_120 = arith.constant 0 : index
    %c0_121 = arith.constant 0 : index
    %294 = vector.load %arg13[%c1_118, %c0_119, %c0_120, %c0_121] : memref<2x8x8x32xf32, #tpu.memory_space<vmem>>, vector<1x8x8x32xf32>
    %295 = vector.shape_cast %294 : vector<1x8x8x32xf32> to vector<8x8x32xf32>
    "tpu.trace_start"() <{level = 10 : i32, message = "gqd,gdc->gqc"}> : () -> ()
    %cst_122 = arith.constant dense<0.000000e+00> : vector<8x17x32xf32>
    %296 = tpu.matmul %293, %295, %cst_122 {dimension_numbers = #tpu.dot_dimension_numbers<[2], [1], [1], [2], [0, 0, 0, 1, 1, 2], [0], [0]>} : vector<8x17x8xf32>, vector<8x8x32xf32>, vector<8x17x32xf32> -> vector<8x17x32xf32>
    "tpu.trace_stop"() : () -> ()
    %297 = vector.extract_strided_slice %296 {offsets = [0, 0, 0], sizes = [4, 17, 32], strides = [1, 1, 1]} : vector<8x17x32xf32> to vector<4x17x32xf32>
    %cst_123 = arith.constant dense<0.000000e+00> : vector<17x32xf32>
    %298 = vector.multi_reduction <add>, %297, %cst_123 [0] : vector<4x17x32xf32> to vector<17x32xf32>
    %299 = vector.extract_strided_slice %296 {offsets = [4, 0, 0], sizes = [4, 17, 32], strides = [1, 1, 1]} : vector<8x17x32xf32> to vector<4x17x32xf32>
    %cst_124 = arith.constant dense<0.000000e+00> : vector<17x32xf32>
    %300 = vector.multi_reduction <add>, %299, %cst_124 [0] : vector<4x17x32xf32> to vector<17x32xf32>
    %301 = tpu.concatenate %298, %300 in 0 : vector<17x32xf32>, vector<17x32xf32> -> vector<34x32xf32>
    %302 = arith.addf %183, %301 : vector<34x32xf32>
    %c1_125 = arith.constant 1 : index
    %c0_126 = arith.constant 0 : index
    %c0_127 = arith.constant 0 : index
    %303 = vector.load %arg14[%c1_125, %c0_126, %c0_127] : memref<2x1x32xf32, #tpu.memory_space<vmem>>, vector<1x1x32xf32>
    %304 = vector.shape_cast %303 : vector<1x1x32xf32> to vector<1x32xf32>
    %305 = vector.broadcast %304 : vector<1x32xf32> to vector<34x32xf32>
    %306 = arith.addf %302, %305 : vector<34x32xf32>
    %c1_128 = arith.constant 1 : index
    %c0_129 = arith.constant 0 : index
    %c0_130 = arith.constant 0 : index
    %307 = vector.load %arg15[%c1_128, %c0_129, %c0_130] : memref<2x1x32xf32, #tpu.memory_space<vmem>>, vector<1x1x32xf32>
    %308 = vector.shape_cast %307 : vector<1x1x32xf32> to vector<1x32xf32>
    %c1_131 = arith.constant 1 : index
    %c0_132 = arith.constant 0 : index
    %c0_133 = arith.constant 0 : index
    %309 = vector.load %arg16[%c1_131, %c0_132, %c0_133] : memref<2x1x32xf32, #tpu.memory_space<vmem>>, vector<1x1x32xf32>
    %310 = vector.shape_cast %309 : vector<1x1x32xf32> to vector<1x32xf32>
    %cst_134 = arith.constant dense<0.000000e+00> : vector<34xf32>
    %311 = vector.multi_reduction <add>, %306, %cst_134 [1] : vector<34x32xf32> to vector<34xf32>
    %312 = vector.shape_cast %311 : vector<34xf32> to vector<34x1xf32>
    %cst_135 = arith.constant 3.200000e+01 : f32
    %313 = vector.broadcast %cst_135 : f32 to vector<34x1xf32>
    %314 = arith.divf %312, %313 : vector<34x1xf32>
    %315 = vector.broadcast %314 : vector<34x1xf32> to vector<34x32xf32>
    %316 = arith.subf %306, %315 : vector<34x32xf32>
    %317 = arith.mulf %316, %316 : vector<34x32xf32>
    %cst_136 = arith.constant dense<0.000000e+00> : vector<34xf32>
    %318 = vector.multi_reduction <add>, %317, %cst_136 [1] : vector<34x32xf32> to vector<34xf32>
    %319 = vector.shape_cast %318 : vector<34xf32> to vector<34x1xf32>
    %cst_137 = arith.constant 3.200000e+01 : f32
    %320 = vector.broadcast %cst_137 : f32 to vector<34x1xf32>
    %321 = arith.divf %319, %320 : vector<34x1xf32>
    %322 = vector.broadcast %314 : vector<34x1xf32> to vector<34x32xf32>
    %323 = arith.subf %306, %322 : vector<34x32xf32>
    %cst_138 = arith.constant 9.99999997E-7 : f32
    %324 = vector.broadcast %cst_138 : f32 to vector<34x1xf32>
    %325 = arith.addf %321, %324 : vector<34x1xf32>
    %326 = math.rsqrt %325 : vector<34x1xf32>
    %327 = vector.broadcast %326 : vector<34x1xf32> to vector<34x32xf32>
    %328 = arith.mulf %323, %327 : vector<34x32xf32>
    %329 = vector.broadcast %308 : vector<1x32xf32> to vector<34x32xf32>
    %330 = arith.mulf %328, %329 : vector<34x32xf32>
    %331 = vector.broadcast %310 : vector<1x32xf32> to vector<34x32xf32>
    %332 = arith.addf %330, %331 : vector<34x32xf32>
    %c1_139 = arith.constant 1 : index
    %c0_140 = arith.constant 0 : index
    %c0_141 = arith.constant 0 : index
    %333 = vector.load %arg17[%c1_139, %c0_140, %c0_141] : memref<2x32x128xf32, #tpu.memory_space<vmem>>, vector<1x32x128xf32>
    %334 = vector.shape_cast %333 : vector<1x32x128xf32> to vector<32x128xf32>
    %cst_142 = arith.constant dense<0.000000e+00> : vector<34x128xf32>
    %335 = tpu.matmul %332, %334, %cst_142 {dimension_numbers = #tpu.dot_dimension_numbers<[1], [0], [0], [1], [0, 0, 1, 1], [], []>} : vector<34x32xf32>, vector<32x128xf32>, vector<34x128xf32> -> vector<34x128xf32>
    %c1_143 = arith.constant 1 : index
    %c0_144 = arith.constant 0 : index
    %c0_145 = arith.constant 0 : index
    %336 = vector.load %arg18[%c1_143, %c0_144, %c0_145] : memref<2x1x128xf32, #tpu.memory_space<vmem>>, vector<1x1x128xf32>
    %337 = vector.shape_cast %336 : vector<1x1x128xf32> to vector<1x128xf32>
    %338 = vector.broadcast %337 : vector<1x128xf32> to vector<34x128xf32>
    %339 = arith.addf %335, %338 : vector<34x128xf32>
    %cst_146 = arith.constant 5.000000e-01 : f32
    %340 = vector.broadcast %cst_146 : f32 to vector<34x128xf32>
    %341 = arith.mulf %340, %339 : vector<34x128xf32>
    %cst_147 = arith.constant 0.707106769 : f32
    %342 = vector.broadcast %cst_147 : f32 to vector<34x128xf32>
    %343 = arith.mulf %339, %342 : vector<34x128xf32>
    %344 = math.erf %343 : vector<34x128xf32>
    %cst_148 = arith.constant 1.000000e+00 : f32
    %345 = vector.broadcast %cst_148 : f32 to vector<34x128xf32>
    %346 = arith.addf %345, %344 : vector<34x128xf32>
    %347 = arith.mulf %341, %346 : vector<34x128xf32>
    %c1_149 = arith.constant 1 : index
    %c0_150 = arith.constant 0 : index
    %c0_151 = arith.constant 0 : index
    %348 = vector.load %arg19[%c1_149, %c0_150, %c0_151] : memref<2x128x32xf32, #tpu.memory_space<vmem>>, vector<1x128x32xf32>
    %349 = vector.shape_cast %348 : vector<1x128x32xf32> to vector<128x32xf32>
    %cst_152 = arith.constant dense<0.000000e+00> : vector<34x32xf32>
    %350 = tpu.matmul %347, %349, %cst_152 {dimension_numbers = #tpu.dot_dimension_numbers<[1], [0], [0], [1], [0, 0, 1, 1], [], []>} : vector<34x128xf32>, vector<128x32xf32>, vector<34x32xf32> -> vector<34x32xf32>
    %351 = arith.addf %306, %350 : vector<34x32xf32>
    %c1_153 = arith.constant 1 : index
    %c0_154 = arith.constant 0 : index
    %c0_155 = arith.constant 0 : index
    %352 = vector.load %arg20[%c1_153, %c0_154, %c0_155] : memref<2x1x32xf32, #tpu.memory_space<vmem>>, vector<1x1x32xf32>
    %353 = vector.shape_cast %352 : vector<1x1x32xf32> to vector<1x32xf32>
    %354 = vector.broadcast %353 : vector<1x32xf32> to vector<34x32xf32>
    %355 = arith.addf %351, %354 : vector<34x32xf32>
    %356 = vector.extract_strided_slice %355 {offsets = [16, 0], sizes = [1, 32], strides = [1, 1]} : vector<34x32xf32> to vector<1x32xf32>
    %357 = vector.extract_strided_slice %355 {offsets = [33, 0], sizes = [1, 32], strides = [1, 1]} : vector<34x32xf32> to vector<1x32xf32>
    %358 = tpu.concatenate %356, %357 in 0 : vector<1x32xf32>, vector<1x32xf32> -> vector<2x32xf32>
    %c0_156 = arith.constant 0 : index
    %c0_157 = arith.constant 0 : index
    %359 = vector.load %arg21[%c0_156, %c0_157] : memref<1x32xf32, #tpu.memory_space<vmem>>, vector<1x32xf32>
    %c0_158 = arith.constant 0 : index
    %c0_159 = arith.constant 0 : index
    %360 = vector.load %arg22[%c0_158, %c0_159] : memref<1x32xf32, #tpu.memory_space<vmem>>, vector<1x32xf32>
    %cst_160 = arith.constant dense<0.000000e+00> : vector<2xf32>
    %361 = vector.multi_reduction <add>, %358, %cst_160 [1] : vector<2x32xf32> to vector<2xf32>
    %362 = vector.shape_cast %361 : vector<2xf32> to vector<2x1xf32>
    %cst_161 = arith.constant 3.200000e+01 : f32
    %363 = vector.broadcast %cst_161 : f32 to vector<2x1xf32>
    %364 = arith.divf %362, %363 : vector<2x1xf32>
    %365 = vector.broadcast %364 : vector<2x1xf32> to vector<2x32xf32>
    %366 = arith.subf %358, %365 : vector<2x32xf32>
    %367 = arith.mulf %366, %366 : vector<2x32xf32>
    %cst_162 = arith.constant dense<0.000000e+00> : vector<2xf32>
    %368 = vector.multi_reduction <add>, %367, %cst_162 [1] : vector<2x32xf32> to vector<2xf32>
    %369 = vector.shape_cast %368 : vector<2xf32> to vector<2x1xf32>
    %cst_163 = arith.constant 3.200000e+01 : f32
    %370 = vector.broadcast %cst_163 : f32 to vector<2x1xf32>
    %371 = arith.divf %369, %370 : vector<2x1xf32>
    %372 = vector.broadcast %364 : vector<2x1xf32> to vector<2x32xf32>
    %373 = arith.subf %358, %372 : vector<2x32xf32>
    %cst_164 = arith.constant 9.99999997E-7 : f32
    %374 = vector.broadcast %cst_164 : f32 to vector<2x1xf32>
    %375 = arith.addf %371, %374 : vector<2x1xf32>
    %376 = math.rsqrt %375 : vector<2x1xf32>
    %377 = vector.broadcast %376 : vector<2x1xf32> to vector<2x32xf32>
    %378 = arith.mulf %373, %377 : vector<2x32xf32>
    %379 = vector.broadcast %359 : vector<1x32xf32> to vector<2x32xf32>
    %380 = arith.mulf %378, %379 : vector<2x32xf32>
    %381 = vector.broadcast %360 : vector<1x32xf32> to vector<2x32xf32>
    %382 = arith.addf %380, %381 : vector<2x32xf32>
    %c0_165 = arith.constant 0 : index
    %c0_166 = arith.constant 0 : index
    %383 = vector.load %arg23[%c0_165, %c0_166] : memref<32x128xf32, #tpu.memory_space<vmem>>, vector<32x128xf32>
    %cst_167 = arith.constant dense<0.000000e+00> : vector<2x128xf32>
    %384 = tpu.matmul %382, %383, %cst_167 {dimension_numbers = #tpu.dot_dimension_numbers<[1], [0], [0], [1], [0, 0, 1, 1], [], []>} : vector<2x32xf32>, vector<32x128xf32>, vector<2x128xf32> -> vector<2x128xf32>
    %c0_168 = arith.constant 0 : index
    %c0_169 = arith.constant 0 : index
    %385 = vector.load %arg24[%c0_168, %c0_169] : memref<1x128xf32, #tpu.memory_space<vmem>>, vector<1x128xf32>
    %386 = vector.broadcast %385 : vector<1x128xf32> to vector<2x128xf32>
    %387 = arith.addf %384, %386 : vector<2x128xf32>
    %c0_170 = arith.constant 0 : index
    %c0_171 = arith.constant 0 : index
    %388 = vector.load %arg25[%c0_170, %c0_171] : memref<2x128xf32, #tpu.memory_space<vmem>>, vector<2x128xf32>
    tpu.vector_store %arg25[%c0_170, %c0_171], %387 {strides = array<i32>} : memref<2x128xf32, #tpu.memory_space<vmem>>, vector<2x128xf32>,
    return
  }
}

</mosaic_0001>

<bundles_post_ra>
// kernel: vit_forward.1
= control target key start
LH: loop header
LB: loop body
LE: loop exit
PB: predicated region body
PF: predicated region fallthrough
CT: control target
= control target key end

     0   :  { %s11965_s0 = inlined_call_operand.vmem [shape: f32[32,48], index: 0, kind: input, shape index: {}]   ;;  %s11966_s1 = inlined_call_operand.vmem [shape: f32[48,32], index: 1, kind: input, shape index: {}]   ;;  %s11967_s2 = inlined_call_operand.vmem [shape: f32[1,32], index: 2, kind: input, shape index: {}]   ;;  %s11968_s3 = inlined_call_operand.vmem [shape: f32[1,32], index: 3, kind: input, shape index: {}]   ;;  %s11969_s4 = inlined_call_operand.vmem [shape: f32[32,32], index: 4, kind: input, shape index: {}]   ;;  %s11970_s5 = inlined_call_operand.vmem [shape: f32[2,1,32], index: 5, kind: input, shape index: {}]   ;;  %s11971_s6 = inlined_call_operand.vmem [shape: f32[2,1,32], index: 6, kind: input, shape index: {}]   ;;  %s11972_s7 = inlined_call_operand.vmem [shape: f32[2,32,32], index: 7, kind: input, shape index: {}]   ;;  %s11973_s8 = inlined_call_operand.vmem [shape: f32[2,1,32], index: 8, kind: input, shape index: {}]   ;;  %s11974_s9 = inlined_call_operand.vmem [shape: f32[2,32,32], index: 9, kind: input, shape index: {}]   ;;  %s11975_s10 = inlined_call_operand.vmem [shape: f32[2,1,32], index: 10, kind: input, shape index: {}]   ;;  %s11976_s11 = inlined_call_operand.vmem [shape: f32[2,32,32], index: 11, kind: input, shape index: {}]   ;;  %s11977_s12 = inlined_call_operand.vmem [shape: f32[2,1,32], index: 12, kind: input, shape index: {}]   ;;  %s11978_s13 = inlined_call_operand.vmem [shape: f32[2,8,8,32], index: 13, kind: input, shape index: {}]   ;;  %s11979_s14 = inlined_call_operand.vmem [shape: f32[2,1,32], index: 14, kind: input, shape index: {}]   ;;  %s11980_s15 = inlined_call_operand.vmem [shape: f32[2,1,32], index: 15, kind: input, shape index: {}]   ;;  %s11981_s16 = inlined_call_operand.vmem [shape: f32[2,1,32], index: 16, kind: input, shape index: {}]   ;;  %s11982_s17 = inlined_call_operand.vmem [shape: f32[2,32,128], index: 17, kind: input, shape index: {}]   ;;  %s11983_s18 = inlined_call_operand.vmem [shape: f32[2,1,128], index: 18, kind: input, shape index: {}]   ;;  %s11984_s19 = inlined_call_operand.vmem [shape: f32[2,128,32], index: 19, kind: input, shape index: {}]   ;;  %s11985_s20 = inlined_call_operand.vmem [shape: f32[2,1,32], index: 20, kind: input, shape index: {}]   ;;  %s11986_s21 = inlined_call_operand.vmem [shape: f32[1,32], index: 21, kind: input, shape index: {}]   ;;  %s11987_s22 = inlined_call_operand.vmem [shape: f32[1,32], index: 22, kind: input, shape index: {}]   ;;  %s11988_s23 = inlined_call_operand.vmem [shape: f32[32,128], index: 23, kind: input, shape index: {}]   ;;  %s11989_s24 = inlined_call_operand.vmem [shape: f32[1,128], index: 24, kind: input, shape index: {}]   ;;  %s11990_s25 = inlined_call_operand.hbm [shape: f32[2,128], index: 25, kind: output, shape index: {}]  }
   0x1   :  { %12003 = sst [smem:[#allocation5_spill]] %s11965_s0 }
   0x2   :  { %12004 = sst [smem:[#allocation6_spill]] %s11966_s1 }
   0x3   :  { %12005 = sst [smem:[#allocation7_spill]] %s11967_s2 }
   0x4   :  { %12006 = sst [smem:[#allocation8_spill]] %s11968_s3 }
   0x5   :  { %12007 = sst [smem:[#allocation9_spill]] %s11969_s4 }
   0x6   :  { %12008 = sst [smem:[#allocation10_spill]] %s11970_s5 }
   0x7   :  { %12009 = sst [smem:[#allocation11_spill]] %s11971_s6 }
   0x8   :  { %12010 = sst [smem:[#allocation12_spill]] %s11972_s7 }
   0x9   :  { %12011 = sst [smem:[#allocation13_spill]] %s11973_s8 }
   0xa   :  { %12012 = sst [smem:[#allocation14_spill]] %s11974_s9 }
   0xb   :  { %s12013_s6 = sld [smem:[#allocation6_spill]]  ;;  %vm98_vm0 = vcmask 392192   ;;  %s12014_s29 = sld [smem:[#allocation5_spill]] }
  0x11   :  { %v85_v0 = vld [vmem:[%s12013_s6] sm:$0xff]  ;;  %v86_v1 = vld [vmem:[%s12013_s6 + $0x8] sm:$0xff]  ;;  %v87_v2 = vld [vmem:[%s12013_s6 + $0x10] sm:$0xff] }
  0x12   :  { %v8903_v3 = vpack.c.bf16 %v86_v1, %v85_v0  ;;  %v88_v4 = vld [vmem:[%s12013_s6 + $0x18] sm:$0xff]  ;;  %v89_v6 = vld [vmem:[%s12013_s6 + $0x20] sm:$0xff]  ;;  %v90_v7 = vld [vmem:[%s12013_s6 + $0x28] sm:$0xff] }
  0x13   :  { %v8907_v5 = vpack.c.bf16 %v88_v4, %v87_v2  ;;  %v81_v8 = vld [vmem:[%s12014_s29] sm:$0xff] }
  0x14   :  { %8904 = vmatprep.subr.bf16.mxu0 %v8903_v3  ;;  %7952 = vmatprep.mubr.msk.f32.mxu0 %vm98_vm0, %v81_v8 }
  0x15   :  { %30 = vsyncpa [#allocation3], 0  ;;  %8906 = vmatpush3.bf16.msra.mxu0 %v8903_v3  ;;  %v8911_v9 = vpack.c.bf16 %v90_v7, %v89_v6  ;;  %v82_v10 = vld [vmem:[%s12014_s29 + $0x8] sm:$0xff]  ;;  %v83_v11 = vld [vmem:[%s12014_s29 + $0x10] sm:$0xff]  ;;  %v215_v13 = vlaneseq  ;;  %s12015_s27 = sld [smem:[#allocation7_spill]]  ;;  %s12016_s9 = sld [smem:[#allocation9_spill]] }
  0x16   :  { %8908 = vmatprep.subr.bf16.mxu0 %v8907_v5  ;;  %v84_v12 = vld [vmem:[%s12014_s29 + $0x18] sm:$0xff]  ;;  %vm224_vm1 = vcmask 261120   ;;  %s12017_s6 = sld [smem:[#allocation8_spill]]  ;;  %vm207_vm2 = vcmask 1040384   ;;  %vm237_vm3 = vcmask 254976   ;;  %vm9539_vm4 = vmmov 0  }
  0x17   :  { %v216_v15 = vshrl.u32 %v215_v13, 7  ;;  %v9540_v13 = vmov 0.0   ;;  %s12019_s7 = sld [smem:[#allocation10_spill]]  ;;  %s12020_s26 = sld [smem:[#allocation14_spill]]  ;;  %vm655_vm5 = vcmask 1046528   ;;  %vm785_vm6 = vcmask 64512  }
  0x18   :  { %7975 = vmatprep.mubr.msk.f32.mxu1 %vm9539_vm4, %v9540_v13  ;;  %s12022_s2 = sld [smem:[#allocation13_spill]]  ;;  %s9541_s30 = smov 120   ;;  %vm9916_vm7 = vmpackc.low %vm785_vm6, %vm785_vm6  ;;  %vm1522_vm8 = vcmask 138240   ;;  %vm1529_vm9 = vcmask 131072   ;;  %vm3250_vm10 = vcmask 253952  }
  0x19   :  { %8910 = vmatpush3.bf16.msra.mxu0 %v8907_v5  ;;  %v217_v22 = vsub.s32 0, %v216_v15  ;;  %s12001_s1 = smov 112   ;;  %s11999_s28 = smov 104  }
  0x1a   :  { %8912 = vmatprep.subr.bf16.mxu0 %v8911_v9  ;;  %s12025_s8 = smov 112   ;;  %s9544_s3 = smov [#allocation2]  }
  0x1b   :  { %v7228_v14 = vld [vmem:[%s12015_s27] ss:$0 sm:$0xff]  ;;  %v197_v21 = vld [vmem:[%s12016_s9 + $0x8] sm:$0xff]  ;;  %v199_v25 = vld [vmem:[%s12016_s9 + $0x18] sm:$0xff]  ;;  %s12018_s27 = sld [smem:[#allocation12_spill]] }
  0x1c   :  { %v196_v18 = vld [vmem:[%s12016_s9] sm:$0xff]  ;;  %v198_v29 = vld [vmem:[%s12016_s9 + $0x10] sm:$0xff]  ;;  %s12021_s9 = sld [smem:[#allocation11_spill]] }
  0x1d   :  { %8914 = vmatpush3.bf16.msra.mxu0 %v8911_v9  ;;  %v204_v26 = vld [vmem:[%s12017_s6] sm:$0x1]  ;;  %v9538_v9 = vmov 0.0|0.0  }
  0x1e   :  { %v218_v34 = vrot.slane %v204_v26, %v217_v22  ;;  %8915 = vmatprep.subr.bf16.mxu0 %v9538_v9  ;;  %9129 = vmatprep.subr.bf16.mxu1 %v9538_v9 }
  0x20   :  { %7953 = vmatmul.mubr.msk.f32.vlgmr.msra.gmra.mrb[0].mxu0 %vm98_vm0, %v82_v10 }
  0x21   :  { %7955 = vmatprep.mubr.msk.f32.mxu0 %vm98_vm0, %v83_v11  ;;  %v314_v6 = vld [vmem:[%s12018_s27] sm:$0xff]  ;;  %v315_v7 = vld [vmem:[%s12018_s27 + $0x8] sm:$0xff]  ;;  %v316_v10 = vld [vmem:[%s12018_s27 + $0x10] sm:$0xff] }
  0x22   :  { %v8916_v8 = vpack.c.bf16 %v315_v7, %v314_v6  ;;  %v317_v11 = vld [vmem:[%s12018_s27 + $0x18] sm:$0xff]  ;;  %v9889_v6 = vld [vmem:[%s12022_s2] ss:$0 sm:$0xff] }
  0x24   :  { %7956 = vmatmul.mubr.msk.f32.gmra.mrb[2].mxu0 %vm98_vm0, %v84_v12  ;;  %9131 = vmatpush3.bf16.msra.mxu1 %v8916_v8  ;;  %v8919_v12 = vpack.c.bf16 %v317_v11, %v316_v10 }
  0x25   :  { %8917 = vmatpush3.bf16.msra.mxu0 %v8916_v8  ;;  %9130 = vmatprep.subr.bf16.mxu1 %v9538_v9 }
  0x26   :  { %8918 = vmatprep.subr.bf16.mxu0 %v9538_v9  ;;  %7966 = vmatprep.mubr.msk.f32.mxu0 %vm9539_vm4, %v9540_v13 }
  0x28   :  { %9132 = vmatpush3.bf16.msra.mxu1 %v8919_v12 }
  0x29   :  { %8920 = vmatpush3.bf16.msra.mxu0 %v8919_v12  ;;  %8927 = vmatprep.subr.bf16.mxu1 %v9538_v9 }
  0x2a   :  { %8921 = vmatprep.subr.bf16.mxu0 %v9538_v9 }
  0xf3   :  { %v7954_v16 = vpop.f32.mrb[0].mxu0 }
  0xf4   :  { %v177_v17 = vpop.f32.mrb[1].mxu0  ;;  %v183_v19 = vadd.f32 %v7954_v16, %v7228_v14 }
  0xf5   :  { %v178_v20 = vadd.f32 %v7228_v14, %v177_v17 }
  0xf6   :  { %v9729_v30 = vadd.f32 %v197_v21, %v183_v19 }
  0xf7   :  { %v9718_v23 = vadd.f32 %v196_v18, %v178_v20  ;;  %v7957_v24 = vpop.f32.mrb[2].mxu0 }
  0xf8   :  { %v193_v27 = vadd.f32 %v7957_v24, %v7228_v14  ;;  %v187_v28 = vpop.f32.mrb[3].mxu0  ;;  %v228_v38 = vsel %vm224_vm1, %v9729_v30, 0.0 }
  0xf9   :  { %v188_v31 = vadd.f32 %v7228_v14, %v187_v28  ;;  %v225_v32 = vsel %vm224_vm1, %v9718_v23, 0.0 }
  0xfa   :  { %v203_v33 = vadd.f32 %v199_v25, %v193_v27  ;;  %226 = vadd.xlane.f32.xlu0 %v225_v32  ;;  %v7233_v32 = vld [vmem:[%s12019_s7] ss:$0 sm:$0xff] }
  0xfb   :  { %v202_v35 = vadd.f32 %v198_v29, %v188_v31 }
  0xfc   :  { %v209_v36 = vrot.slane %v203_v33, 7 }
  0xfd   :  { %v208_v37 = vrot.slane %v202_v35, 7  ;;  %v431_v35 = vld [vmem:[%s12020_s26 + $0x8] sm:$0xff] }
  0xfe   :  { %229 = vadd.xlane.f32.xlu0 %v228_v38  ;;  %v9736_v39 = vsel %vm207_vm2, %v209_v36, %v218_v34  ;;  %v430_v34 = vld [vmem:[%s12020_s26] sm:$0xff] }
  0xff   :  { %v9739_v40 = vsel %vm207_vm2, %v204_v26, %v208_v37  ;;  %v238_v41 = vsel %vm237_vm3, %v9736_v39, 0.0  ;;  %v9744_v42 = vsel %vm207_vm2, %v208_v37, %v209_v36  ;;  %v7234_v36 = vld [vmem:[%s12021_s9] ss:$0 sm:$0xff] }
 0x100   :  { %v231_v43 = vsel %vm224_vm1, %v9739_v40, 0.0  ;;  %v234_v44 = vsel %vm224_vm1, %v9744_v42, 0.0 }
 0x101   :  { %232 = vadd.xlane.f32.xlu1 %v231_v43 }
 0x102   :  { %239 = vadd.xlane.f32.xlu0 %v238_v41  ;;  %v8922_v41 = vpack.c.bf16 %v431_v35, %v430_v34 }
 0x105   :  { %235 = vadd.xlane.f32.xlu1 %v234_v44 }
 0x187   :  { %v227_v45 = vpop.xlane.xlu0 %226 }
 0x188   :  { %v242_v46 = vmul.f32 0.03125, %v227_v45  ;;  %v432_v45 = vld [vmem:[%s12020_s26 + $0x10] sm:$0xff] }
 0x18a   :  { %v9751_v47 = vsub.f32 %v9718_v23, %v242_v46  ;;  %v433_v46 = vld [vmem:[%s12020_s26 + $0x18] sm:$0xff] }
 0x18b   :  { %v230_v48 = vpop.xlane.xlu0 %229 }
 0x18c   :  { %v243_v49 = vmul.f32 0.03125, %v230_v48  ;;  %v252_v50 = vmul.f32 %v9751_v47, %v9751_v47 }
 0x18e   :  { %v9756_v51 = vsub.f32 %v9729_v30, %v243_v49  ;;  %v233_v52 = vpop.xlane.xlu1 %232  ;;  %v257_v53 = vsel %vm224_vm1, %v252_v50, 0.0  ;;  %v8925_v50 = vpack.c.bf16 %v433_v46, %v432_v45 }
 0x18f   :  { %v244_v54 = vmul.f32 0.03125, %v233_v52  ;;  %258 = vadd.xlane.f32.xlu1 %v257_v53  ;;  %v240_v55 = vpop.xlane.xlu0 %239 }
 0x190   :  { %v246_v56 = vmul.f32 0.03125, %v240_v55  ;;  %v253_v57 = vmul.f32 %v9756_v51, %v9756_v51 }
 0x191   :  { %v9762_v58 = vsub.f32 %v9739_v40, %v244_v54 }
 0x192   :  { %v9765_v59 = vsub.f32 %v9736_v39, %v246_v56  ;;  %v236_v60 = vpop.xlane.xlu1 %235  ;;  %v260_v61 = vsel %vm224_vm1, %v253_v57, 0.0  ;;  %v531_v57 = vld [vmem:[%s11976_s11] sm:$0xff] }
 0x193   :  { %v245_v62 = vmul.f32 0.03125, %v236_v60  ;;  %261 = vadd.xlane.f32.xlu0 %v260_v61  ;;  %v254_v63 = vmul.f32 %v9762_v58, %v9762_v58 }
 0x194   :  { %v256_v2 = vmul.f32 %v9765_v59, %v9765_v59 }
 0x195   :  { %v9771_v0 = vsub.f32 %v9744_v42, %v245_v62  ;;  %v263_v1 = vsel %vm224_vm1, %v254_v63, 0.0 }
 0x196   :  { %264 = vadd.xlane.f32.xlu1 %v263_v1  ;;  %v269_v5 = vsel %vm237_vm3, %v256_v2, 0.0  ;;  %v533_v1 = vld [vmem:[%s11976_s11 + $0x10] sm:$0xff]  ;;  %v534_v2 = vld [vmem:[%s11976_s11 + $0x18] sm:$0xff] }
 0x197   :  { %v255_v3 = vmul.f32 %v9771_v0, %v9771_v0 }
 0x199   :  { %v266_v4 = vsel %vm224_vm1, %v255_v3, 0.0 }
 0x19a   :  { %267 = vadd.xlane.f32.xlu0 %v266_v4  ;;  %270 = vadd.xlane.f32.xlu1 %v269_v5 }
 0x21c   :  { %v259_v14 = vpop.xlane.xlu1 %258 }
 0x21d   :  { %v272_v15 = vmul.f32 0.03125, %v259_v14 }
 0x21f   :  { %v277_v16 = vadd.f32 1e-06, %v272_v15 }
 0x220   :  { %v262_v17 = vpop.xlane.xlu0 %261 }
 0x221   :  { %9260 = vrsqrt.f32 %v277_v16  ;;  %v273_v18 = vmul.f32 0.03125, %v262_v17 }
 0x223   :  { %v278_v19 = vadd.f32 1e-06, %v273_v18  ;;  %v265_v20 = vpop.xlane.xlu1 %264 }
 0x224   :  { %v274_v21 = vmul.f32 0.03125, %v265_v20  ;;  %v7241_v20 = vld [vmem:[%s11975_s10] ss:$0 sm:$0xff] }
 0x225   :  { %9262 = vrsqrt.f32 %v278_v19 }
 0x226   :  { %v279_v22 = vadd.f32 1e-06, %v274_v21 }
 0x227   :  { %v271_v24 = vpop.xlane.xlu1 %270  ;;  %v268_v25 = vpop.xlane.xlu0 %267 }
 0x228   :  { %9264 = vrsqrt.f32 %v279_v22  ;;  %v276_v26 = vmul.f32 0.03125, %v271_v24  ;;  %v275_v27 = vmul.f32 0.03125, %v268_v25 }
 0x22a   :  { %v281_v28 = vadd.f32 1e-06, %v276_v26  ;;  %v280_v29 = vadd.f32 1e-06, %v275_v27 }
 0x22b   :  { %v9261_v31 = vpop.eup %9260 }
 0x22c   :  { %v287_v33 = vmul.f32 %v9261_v31, %v9751_v47  ;;  %9266 = vrsqrt.f32 %v281_v28 }
 0x22d   :  { %9268 = vrsqrt.f32 %v280_v29 }
 0x22e   :  { %v298_v37 = vmul.f32 %v7233_v32, %v287_v33 }
 0x22f   :  { %v9263_v38 = vpop.eup %9262 }
 0x230   :  { %v309_v43 = vadd.f32 %v7234_v36, %v298_v37  ;;  %v288_v44 = vmul.f32 %v9263_v38, %v9756_v51 }
 0x232   :  { %v9265_v47 = vpop.eup %9264  ;;  %7967 = vmatmul.mubr.msk.f32.vlgmr.msra.gmra.mrb[4].mxu0 %vm224_vm1, %v309_v43  ;;  %v299_v48 = vmul.f32 %v7233_v32, %v288_v44 }
 0x233   :  { %7969 = vmatprep.mubr.msk.f32.mxu0 %vm9539_vm4, %v9540_v13  ;;  %8923 = vmatpush3.bf16.msra.mxu0 %v8922_v41  ;;  %v289_v49 = vmul.f32 %v9265_v47, %v9762_v58  ;;  %v532_v58 = vld [vmem:[%s11976_s11 + $0x8] sm:$0xff]  ;;  %v7247_v41 = vld [vmem:[%s11977_s12] ss:$0 sm:$0xff] }
 0x234   :  { %v310_v51 = vadd.f32 %v7234_v36, %v299_v48  ;;  %8924 = vmatprep.subr.bf16.mxu0 %v9538_v9  ;;  %v8928_v62 = vpack.c.bf16 %v532_v58, %v531_v57 }
 0x235   :  { %v300_v52 = vmul.f32 %v7233_v32, %v289_v49 }
 0x236   :  { %v9267_v53 = vpop.eup %9266  ;;  %7970 = vmatmul.mubr.msk.f32.gmra.mrb[6].mxu0 %vm224_vm1, %v310_v51 }
 0x237   :  { %v9269_v54 = vpop.eup %9268  ;;  %7972 = vmatprep.mubr.msk.f32.mxu0 %vm9539_vm4, %v9540_v13  ;;  %v311_v55 = vadd.f32 %v7234_v36, %v300_v52  ;;  %8926 = vmatpush3.bf16.msra.mxu0 %v8925_v50  ;;  %v291_v60 = vmul.f32 %v9267_v53, %v9765_v59  ;;  %v8931_v59 = vpack.c.bf16 %v534_v2, %v533_v1 }
 0x238   :  { %v290_v56 = vmul.f32 %v9269_v54, %v9771_v0  ;;  %8933 = vmatprep.subr.bf16.mxu0 %v9538_v9 }
 0x239   :  { %v302_v0 = vmul.f32 %v7233_v32, %v291_v60 }
 0x23a   :  { %7973 = vmatmul.mubr.msk.f32.gmra.mrb[8].mxu0 %vm224_vm1, %v311_v55  ;;  %v301_v61 = vmul.f32 %v7233_v32, %v290_v56 }
 0x23b   :  { %7989 = vmatprep.mubr.msk.f32.mxu0 %vm9539_vm4, %v9540_v13  ;;  %v313_v3 = vadd.f32 %v7234_v36, %v302_v0 }
 0x23c   :  { %v312_v63 = vadd.f32 %v7234_v36, %v301_v61 }
 0x23e   :  { %7976 = vmatmul.mubr.msk.f32.vlgmr.msra.gmra.mrb[0].mxu1 %vm224_vm1, %v312_v63  ;;  %7990 = vmatmul.mubr.msk.f32.vlgmr.msra.gmra.mrb[10].mxu0 %vm224_vm1, %v309_v43 }
 0x23f   :  { %8929 = vmatpush3.bf16.msra.mxu1 %v8928_v62  ;;  %7978 = vmatprep.mubr.msk.f32.mxu1 %vm9539_vm4, %v9540_v13 }
 0x240   :  { %7992 = vmatprep.mubr.msk.f32.mxu0 %vm9539_vm4, %v9540_v13  ;;  %8930 = vmatprep.subr.bf16.mxu1 %v9538_v9 }
 0x242   :  { %7979 = vmatmul.mubr.msk.f32.gmra.mrb[2].mxu1 %vm224_vm1, %v313_v3  ;;  %7993 = vmatmul.mubr.msk.f32.gmra.mrb[12].mxu0 %vm224_vm1, %v310_v51 }
 0x243   :  { %8932 = vmatpush3.bf16.msra.mxu1 %v8931_v59  ;;  %8012 = vmatprep.mubr.msk.f32.mxu1 %vm9539_vm4, %v9540_v13 }
 0x244   :  { %7995 = vmatprep.mubr.msk.f32.mxu0 %vm9539_vm4, %v9540_v13  ;;  %8937 = vmatprep.subr.bf16.mxu1 %v9538_v9 }
 0x246   :  { %8013 = vmatmul.mubr.msk.f32.vlgmr.msra.gmra.mrb[4].mxu1 %vm224_vm1, %v309_v43  ;;  %7996 = vmatmul.mubr.msk.f32.gmra.mrb[14].mxu0 %vm224_vm1, %v311_v55 }
 0x247   :  { %8015 = vmatprep.mubr.msk.f32.mxu1 %vm9539_vm4, %v9540_v13  ;;  %7998 = vmatprep.mubr.msk.f32.mxu0 %vm9539_vm4, %v9540_v13 }
 0x24a   :  { %8016 = vmatmul.mubr.msk.f32.gmra.mrb[6].mxu1 %vm224_vm1, %v310_v51  ;;  %7999 = vmatmul.mubr.msk.f32.gmra.mrb[16].mxu0 %vm224_vm1, %v312_v63 }
 0x24b   :  { %8018 = vmatprep.mubr.msk.f32.mxu1 %vm9539_vm4, %v9540_v13  ;;  %8001 = vmatprep.mubr.msk.f32.mxu0 %vm9539_vm4, %v9540_v13 }
 0x24e   :  { %8019 = vmatmul.mubr.msk.f32.gmra.mrb[8].mxu1 %vm224_vm1, %v311_v55  ;;  %8002 = vmatmul.mubr.msk.f32.gmra.mrb[18].mxu0 %vm224_vm1, %v313_v3 }
 0x24f   :  { %8021 = vmatprep.mubr.msk.f32.mxu1 %vm9539_vm4, %v9540_v13  ;;  %8033 = vmatprep.mubr.msk.f32.mxu0 %vm9539_vm4, %v9540_v13 }
 0x252   :  { %8022 = vmatmul.mubr.msk.f32.gmra.mrb[10].mxu1 %vm224_vm1, %v312_v63 }
 0x253   :  { %8024 = vmatprep.mubr.msk.f32.mxu1 %vm9539_vm4, %v9540_v13 }
 0x256   :  { %8025 = vmatmul.mubr.msk.f32.gmra.mrb[12].mxu1 %vm224_vm1, %v313_v3 }
 0x257   :  { %8048 = vmatprep.mubr.msk.f32.mxu1 %vm9539_vm4, %v9540_v13 }
 0x305   :  { %v406_v4 = vpop.f32.mrb[4].mxu0 }
 0x306   :  { %v7968_v5 = vpop.f32.mrb[5].mxu0  ;;  %v407_v44 = vadd.f32 %v9889_v6, %v406_v4 }
 0x309   :  { %v411_v7 = vpop.f32.mrb[6].mxu0 }
 0x30a   :  { %v9892_v8 = vadd.f32 %v9889_v6, %v411_v7  ;;  %v7971_v10 = vpop.f32.mrb[7].mxu0 }
 0x30c   :  { %637 = vrot.lane.b32.xlu1 %v9892_v8, %s9541_s30 }
 0x30d   :  { %v416_v11 = vpop.f32.mrb[8].mxu0 }
 0x30e   :  { %v7974_v12 = vpop.f32.mrb[9].mxu0  ;;  %v9897_v14 = vadd.f32 %v9889_v6, %v416_v11 }
 0x310   :  { %v656_v22 = vrot.slane %v9897_v14, 1 }
 0x311   :  { %v421_v15 = vpop.f32.mrb[0].mxu1  ;;  %v507_v16 = vpop.f32.mrb[10].mxu0 }
 0x312   :  { %v9900_v17 = vadd.f32 %v9889_v6, %v421_v15  ;;  %v7977_v18 = vpop.f32.mrb[1].mxu1  ;;  %v7991_v19 = vpop.f32.mrb[11].mxu0  ;;  %v508_v26 = vadd.f32 %v7241_v20, %v507_v16 }
 0x314   :  { %v657_v21 = vrot.slane %v9900_v17, 1 }
 0x315   :  { %v9907_v24 = vpop.f32.mrb[2].mxu1  ;;  %v512_v25 = vpop.f32.mrb[12].mxu0 }
 0x316   :  { %v7980_v27 = vpop.f32.mrb[3].mxu1  ;;  %v513_v28 = vadd.f32 %v7241_v20, %v512_v25  ;;  %v7994_v29 = vpop.f32.mrb[13].mxu0  ;;  %v9912_v31 = vsel %vm655_vm5, %v656_v22, %v657_v21  ;;  %v427_v22 = vadd.f32 %v9889_v6, %v9907_v24 }
 0x318   :  { %v8934_v32 = vpack.c.bf16 %v513_v28, %v508_v26  ;;  %v9145_v33 = vpack.i.bf16 %v513_v28, %v508_v26  ;;  %v10001_v25 = vrot.slane %v427_v22, 1 }
 0x319   :  { %v608_v35 = vpop.f32.mrb[4].mxu1  ;;  %v517_v36 = vpop.f32.mrb[14].mxu0 }
 0x31a   :  { %v8014_v37 = vpop.f32.mrb[5].mxu1  ;;  %9146 = vrot.lane.b32.xlu1 %v9145_v33, %s12001_s1  ;;  %9141 = vrot.lane.b32.xlu0 %v9145_v33, %s9541_s30  ;;  %v7997_v38 = vpop.f32.mrb[15].mxu0  ;;  %v518_v43 = vadd.f32 %v7241_v20, %v517_v36  ;;  %v9929_v47 = vadd.f32 %v7247_v41, %v608_v35 }
 0x31b   :  { %8936 = vmatpush3.bf16.xpose.msk.msra.mxu0 %vm9916_vm7, %v8934_v32 }
 0x31c   :  { %8031 = vmatprep.subr.mxu0 %v9540_v13  ;;  %v702_v52 = vrot.slane %v518_v43, 1 }
 0x31d   :  { %v613_v45 = vpop.f32.mrb[6].mxu1  ;;  %v522_v46 = vpop.f32.mrb[16].mxu0 }
 0x31e   :  { %v9931_v48 = vadd.f32 %v7247_v41, %v613_v45  ;;  %v523_v49 = vadd.f32 %v7241_v20, %v522_v46  ;;  %v8017_v50 = vpop.f32.mrb[7].mxu1  ;;  %9151 = vrot.lane.b32.xlu1 %v9145_v33, %s11999_s28  ;;  %635 = vrot.lane.b32.xlu0 %v407_v44, %s9541_s30  ;;  %v8000_v51 = vpop.f32.mrb[17].mxu0 }
 0x320   :  { %v703_v53 = vrot.slane %v523_v49, 1  ;;  %v9937_v54 = vpack.i.bf16 %v9931_v48, %v9929_v47  ;;  %v8966_v57 = vpack.c.bf16 %v9931_v48, %v9929_v47 }
 0x321   :  { %v618_v55 = vpop.f32.mrb[8].mxu1  ;;  %v527_v56 = vpop.f32.mrb[18].mxu0 }
 0x322   :  { %v9942_v58 = vsel %vm655_vm5, %v702_v52, %v703_v53  ;;  %v528_v60 = vadd.f32 %v7241_v20, %v527_v56  ;;  %v8020_v61 = vpop.f32.mrb[9].mxu1  ;;  %643 = vrot.lane.b32.xlu0 %v9892_v8, %s12001_s1  ;;  %686 = vrot.lane.b32.xlu1 %v518_v43, %s9541_s30  ;;  %v8003_v62 = vpop.f32.mrb[19].mxu0  ;;  %v9965_v5 = vadd.f32 %v7247_v41, %v618_v55 }
 0x323   :  { %8032 = vmatpush3.xpose.msk.msra.mxu0 %vm785_vm6, %v518_v43 }
 0x324   :  { %v9948_v63 = vrot.slane %v528_v60, 1  ;;  %8941 = vmatprep.subr.bf16.mxu0 %v9538_v9  ;;  %v754_v16 = vrot.slane %v9965_v5, 1 }
 0x325   :  { %v623_v0 = vpop.f32.mrb[10].mxu1 }
 0x326   :  { %v624_v1 = vadd.f32 %v7247_v41, %v623_v0  ;;  %v8023_v2 = vpop.f32.mrb[11].mxu1  ;;  %8034 = vmatmul.mubr.msk.f32.vlgmr.msra.gmra.mrb[20].mxu0 %vm785_vm6, %v407_v44  ;;  %692 = vrot.lane.b32.xlu0 %v518_v43, %s12001_s1  ;;  %v9955_v59 = vsel %vm655_vm5, %v703_v53, %v9948_v63 }
 0x327   :  { %639 = vrot.lane.b32.xlu1 %v9897_v14, %s9541_s30  ;;  %8036 = vmatprep.mubr.msk.f32.mxu0 %vm9539_vm4, %v9540_v13  ;;  %v9155_v3 = vpack.i.bf16 %v9955_v59, %v9942_v58  ;;  %v8950_v4 = vpack.c.bf16 %v9955_v59, %v9942_v58 }
 0x328   :  { %v755_v12 = vrot.slane %v624_v1, 1 }
 0x329   :  { %v628_v7 = vpop.f32.mrb[12].mxu1 }
 0x32a   :  { %v629_v10 = vadd.f32 %v7247_v41, %v628_v7  ;;  %v8026_v11 = vpop.f32.mrb[13].mxu1  ;;  %8037 = vmatmul.mubr.msk.f32.gmra.mrb[22].mxu0 %vm785_vm6, %v9892_v8  ;;  %698 = vrot.lane.b32.xlu0 %v518_v43, %s11999_s28  ;;  %v9984_v19 = vsel %vm655_vm5, %v754_v16, %v755_v12 }
 0x32b   :  { %641 = vrot.lane.b32.xlu1 %v407_v44, %s12001_s1  ;;  %8039 = vmatprep.mubr.msk.f32.mxu0 %vm9539_vm4, %v9540_v13 }
 0x32c   :  { %v9973_v15 = vrot.slane %v629_v10, 1 }
 0x32e   :  { %8040 = vmatmul.mubr.msk.f32.gmra.mrb[24].mxu0 %vm785_vm6, %v9897_v14  ;;  %9156 = vrot.lane.b32.xlu0 %v9155_v3, %s9541_s30  ;;  %v9981_v18 = vsel %vm655_vm5, %v755_v12, %v9973_v15 }
 0x32f   :  { %647 = vrot.lane.b32.xlu1 %v407_v44, %s11999_s28  ;;  %8063 = vmatprep.mubr.msk.f32.mxu0 %vm9539_vm4, %v9540_v13  ;;  %v8978_v20 = vpack.c.bf16 %v9981_v18, %v9984_v19 }
 0x332   :  { %645 = vrot.lane.b32.xlu0 %v9897_v14, %s12001_s1 }
 0x333   :  { %649 = vrot.lane.b32.xlu1 %v9892_v8, %s11999_s28  ;;  %v10009_v8 = vsel %vm655_vm5, %v657_v21, %v10001_v25 }
 0x336   :  { %711 = vrot.lane.b32.xlu0 %v9948_v63, %s9541_s30 }
 0x337   :  { %651 = vrot.lane.b32.xlu1 %v9897_v14, %s11999_s28 }
 0x33a   :  { %9166 = vrot.lane.b32.xlu0 %v9155_v3, %s11999_s28 }
 0x33b   :  { %9161 = vrot.lane.b32.xlu1 %v9155_v3, %s12001_s1 }
 0x33e   :  { %663 = vrot.lane.b32.xlu0 %v10009_v8, %s9541_s30 }
 0x33f   :  { %661 = vrot.lane.b32.xlu1 %v9912_v31, %s9541_s30 }
 0x342   :  { %665 = vrot.lane.b32.xlu0 %v10001_v25, %s9541_s30 }
 0x343   :  { %717 = vrot.lane.b32.xlu1 %v9948_v63, %s12001_s1 }
 0x346   :  { %667 = vrot.lane.b32.xlu0 %v9912_v31, %s12001_s1 }
 0x347   :  { %723 = vrot.lane.b32.xlu1 %v9948_v63, %s11999_s28 }
 0x34a   :  { %669 = vrot.lane.b32.xlu0 %v10009_v8, %s12001_s1 }
 0x34b   :  { %673 = vrot.lane.b32.xlu1 %v9912_v31, %s11999_s28 }
 0x34e   :  { %671 = vrot.lane.b32.xlu0 %v10001_v25, %s12001_s1 }
 0x34f   :  { %675 = vrot.lane.b32.xlu1 %v10009_v8, %s11999_s28 }
 0x352   :  { %732 = vrot.lane.b32.xlu0 %v9965_v5, %s9541_s30 }
 0x353   :  { %677 = vrot.lane.b32.xlu1 %v10001_v25, %s11999_s28 }
 0x356   :  { %740 = vrot.lane.b32.xlu0 %v9965_v5, %s12001_s1 }
 0x357   :  { %9171 = vrot.lane.b32.xlu1 %v9937_v54, %s9541_s30 }
 0x35b   :  { %9176 = vrot.lane.b32.xlu1 %v9937_v54, %s12001_s1 }
 0x35f   :  { %9181 = vrot.lane.b32.xlu1 %v9937_v54, %s11999_s28 }
 0x363   :  { %748 = vrot.lane.b32.xlu1 %v9965_v5, %s11999_s28 }
 0x37e   :  { %v638_v6 = vpop.permute.xlu1 %637 }
 0x38c   :  { %v9147_v14 = vpop.permute.xlu1 %9146  ;;  %v9142_v17 = vpop.permute.xlu0 %9141 }
 0x38d   :  { %v9149_v21 = vunpack.i.h.bf16 %v9147_v14  ;;  %v9148_v24 = vunpack.i.l.bf16 %v9147_v14  ;;  %v9144_v26 = vunpack.i.h.bf16 %v9142_v17  ;;  %v9143_v27 = vunpack.i.l.bf16 %v9142_v17 }
 0x38f   :  { %v8942_v28 = vpack.c.bf16 %v9149_v21, %v9148_v24  ;;  %v8938_v29 = vpack.c.bf16 %v9144_v26, %v9143_v27 }
 0x390   :  { %v9152_v32 = vpop.permute.xlu1 %9151  ;;  %v636_v33 = vpop.permute.xlu0 %635 }
 0x391   :  { %8940 = vmatpush3.bf16.xpose.msk.msra.mxu1 %vm9916_vm7, %v8938_v29  ;;  %8944 = vmatpush3.bf16.xpose.msk.msra.mxu0 %vm9916_vm7, %v8942_v28  ;;  %v9154_v37 = vunpack.i.h.bf16 %v9152_v32  ;;  %v9153_v38 = vunpack.i.l.bf16 %v9152_v32 }
 0x392   :  { %8061 = vmatprep.subr.mxu0 %v9540_v13  ;;  %8046 = vmatprep.subr.mxu1 %v9540_v13 }
 0x393   :  { %v8946_v44 = vpack.c.bf16 %v9154_v37, %v9153_v38 }
 0x394   :  { %v687_v35 = vpop.permute.xlu1 %686  ;;  %v644_v36 = vpop.permute.xlu0 %643 }
 0x398   :  { %v693_v41 = vpop.permute.xlu0 %692 }
 0x399   :  { %v640_v43 = vpop.permute.xlu1 %639  ;;  %8047 = vmatpush3.xpose.msk.msra.mxu1 %vm785_vm6, %v687_v35  ;;  %8062 = vmatpush3.xpose.msk.msra.mxu0 %vm785_vm6, %v693_v41 }
 0x39a   :  { %8949 = vmatprep.subr.bf16.mxu0 %v9538_v9  ;;  %8945 = vmatprep.subr.bf16.mxu1 %v9538_v9 }
 0x39c   :  { %v699_v45 = vpop.permute.xlu0 %698  ;;  %8049 = vmatmul.mubr.msk.f32.vlgmr.msra.gmra.mrb[14].mxu1 %vm785_vm6, %v636_v33 }
 0x39d   :  { %v642_v46 = vpop.permute.xlu1 %641  ;;  %8948 = vmatpush3.bf16.xpose.msk.msra.mxu1 %vm9916_vm7, %v8946_v44  ;;  %8051 = vmatprep.mubr.msk.f32.mxu1 %vm9539_vm4, %v9540_v13 }
 0x39e   :  { %8064 = vmatmul.mubr.msk.f32.vlgmr.msra.gmra.mrb[26].mxu0 %vm785_vm6, %v642_v46  ;;  %8076 = vmatprep.subr.mxu1 %v9540_v13 }
 0x39f   :  { %8952 = vmatpush3.bf16.xpose.msk.msra.mxu0 %vm9916_vm7, %v8950_v4  ;;  %8066 = vmatprep.mubr.msk.f32.mxu0 %vm9539_vm4, %v9540_v13 }
 0x3a0   :  { %v9157_v49 = vpop.permute.xlu0 %9156  ;;  %8052 = vmatmul.mubr.msk.f32.gmra.mrb[16].mxu1 %vm785_vm6, %v638_v6  ;;  %8091 = vmatprep.subr.mxu0 %v9540_v13 }
 0x3a1   :  { %v648_v50 = vpop.permute.xlu1 %647  ;;  %8054 = vmatprep.mubr.msk.f32.mxu1 %vm9539_vm4, %v9540_v13  ;;  %v9159_v51 = vunpack.i.h.bf16 %v9157_v49  ;;  %v9158_v52 = vunpack.i.l.bf16 %v9157_v49 }
 0x3a2   :  { %8067 = vmatmul.mubr.msk.f32.gmra.mrb[28].mxu0 %vm785_vm6, %v644_v36 }
 0x3a3   :  { %8069 = vmatprep.mubr.msk.f32.mxu0 %vm9539_vm4, %v9540_v13  ;;  %v8954_v55 = vpack.c.bf16 %v9159_v51, %v9158_v52 }
 0x3a4   :  { %v646_v53 = vpop.permute.xlu0 %645  ;;  %8055 = vmatmul.mubr.msk.f32.gmra.mrb[18].mxu1 %vm785_vm6, %v640_v43 }
 0x3a5   :  { %v650_v54 = vpop.permute.xlu1 %649  ;;  %8077 = vmatpush3.xpose.msk.msra.mxu1 %vm785_vm6, %v699_v45  ;;  %8078 = vmatprep.mubr.msk.f32.mxu1 %vm9539_vm4, %v9540_v13 }
 0x3a6   :  { %8070 = vmatmul.mubr.msk.f32.gmra.mrb[30].mxu0 %vm785_vm6, %v646_v53  ;;  %8953 = vmatprep.subr.bf16.mxu1 %v9538_v9 }
 0x3a7   :  { %8092 = vmatpush3.xpose.msk.msra.mxu0 %vm785_vm6, %v9948_v63  ;;  %8093 = vmatprep.mubr.msk.f32.mxu0 %vm9539_vm4, %v9540_v13 }
 0x3a8   :  { %v712_v56 = vpop.permute.xlu0 %711  ;;  %8079 = vmatmul.mubr.msk.f32.vlgmr.msra.gmra.mrb[20].mxu1 %vm785_vm6, %v648_v50  ;;  %8957 = vmatprep.subr.bf16.mxu0 %v9538_v9 }
 0x3a9   :  { %v652_v58 = vpop.permute.xlu1 %651  ;;  %8956 = vmatpush3.bf16.xpose.msk.msra.mxu1 %vm9916_vm7, %v8954_v55  ;;  %8081 = vmatprep.mubr.msk.f32.mxu1 %vm9539_vm4, %v9540_v13 }
 0x3aa   :  { %8094 = vmatmul.mubr.msk.f32.vlgmr.msra.gmra.mrb[32].mxu0 %vm785_vm6, %v9912_v31  ;;  %8106 = vmatprep.subr.mxu1 %v9540_v13 }
 0x3ab   :  { %8096 = vmatprep.mubr.msk.f32.mxu0 %vm9539_vm4, %v9540_v13 }
 0x3ac   :  { %v9167_v60 = vpop.permute.xlu0 %9166  ;;  %8082 = vmatmul.mubr.msk.f32.gmra.mrb[22].mxu1 %vm785_vm6, %v650_v54 }
 0x3ad   :  { %v9162_v61 = vpop.permute.xlu1 %9161  ;;  %8084 = vmatprep.mubr.msk.f32.mxu1 %vm9539_vm4, %v9540_v13  ;;  %v9169_v0 = vunpack.i.h.bf16 %v9167_v60  ;;  %v9168_v1 = vunpack.i.l.bf16 %v9167_v60 }
 0x3ae   :  { %v9164_v62 = vunpack.i.h.bf16 %v9162_v61  ;;  %v9163_v63 = vunpack.i.l.bf16 %v9162_v61  ;;  %8097 = vmatmul.mubr.msk.f32.gmra.mrb[34].mxu0 %vm785_vm6, %v10009_v8 }
 0x3af   :  { %8099 = vmatprep.mubr.msk.f32.mxu0 %vm9539_vm4, %v9540_v13  ;;  %v8962_v3 = vpack.c.bf16 %v9169_v0, %v9168_v1 }
 0x3b0   :  { %v8958_v31 = vpack.c.bf16 %v9164_v62, %v9163_v63  ;;  %v664_v2 = vpop.permute.xlu0 %663  ;;  %8085 = vmatmul.mubr.msk.f32.gmra.mrb[24].mxu1 %vm785_vm6, %v652_v58 }
 0x3b1   :  { %v662_v59 = vpop.permute.xlu1 %661  ;;  %8107 = vmatpush3.xpose.msk.msra.mxu1 %vm785_vm6, %v712_v56  ;;  %8108 = vmatprep.mubr.msk.f32.mxu1 %vm9539_vm4, %v9540_v13 }
 0x3b2   :  { %8100 = vmatmul.mubr.msk.f32.gmra.mrb[36].mxu0 %vm785_vm6, %v10001_v25  ;;  %8961 = vmatprep.subr.bf16.mxu1 %v9538_v9 }
 0x3b3   :  { %8960 = vmatpush3.bf16.xpose.msk.msra.mxu0 %vm9916_vm7, %v8958_v31  ;;  %8123 = vmatprep.mubr.msk.f32.mxu0 %vm9539_vm4, %v9540_v13 }
 0x3b4   :  { %v666_v4 = vpop.permute.xlu0 %665  ;;  %8109 = vmatmul.mubr.msk.f32.vlgmr.msra.gmra.mrb[26].mxu1 %vm785_vm6, %v662_v59  ;;  %8121 = vmatprep.subr.mxu0 %v9540_v13 }
 0x3b5   :  { %v718_v7 = vpop.permute.xlu1 %717  ;;  %8964 = vmatpush3.bf16.xpose.msk.msra.mxu1 %vm9916_vm7, %v8962_v3  ;;  %8111 = vmatprep.mubr.msk.f32.mxu1 %vm9539_vm4, %v9540_v13 }
 0x3b6   :  { %8136 = vmatprep.subr.mxu1 %v9540_v13 }
 0x3b8   :  { %8112 = vmatmul.mubr.msk.f32.gmra.mrb[28].mxu1 %vm785_vm6, %v664_v2  ;;  %v668_v11 = vpop.permute.xlu0 %667 }
 0x3b9   :  { %v724_v10 = vpop.permute.xlu1 %723  ;;  %8114 = vmatprep.mubr.msk.f32.mxu1 %vm9539_vm4, %v9540_v13 }
 0x3bb   :  { %8122 = vmatpush3.xpose.msk.msra.mxu0 %vm785_vm6, %v718_v7 }
 0x3bc   :  { %8965 = vmatprep.subr.bf16.mxu0 %v9538_v9  ;;  %8115 = vmatmul.mubr.msk.f32.gmra.mrb[30].mxu1 %vm785_vm6, %v666_v4  ;;  %v670_v16 = vpop.permute.xlu0 %669 }
 0x3bd   :  { %v674_v12 = vpop.permute.xlu1 %673  ;;  %8137 = vmatpush3.xpose.msk.msra.mxu1 %vm785_vm6, %v724_v10  ;;  %8138 = vmatprep.mubr.msk.f32.mxu1 %vm9539_vm4, %v9540_v13 }
 0x3be   :  { %8124 = vmatmul.mubr.msk.f32.vlgmr.msra.gmra.mrb[38].mxu0 %vm785_vm6, %v668_v11  ;;  %8968 = vmatprep.subr.bf16.mxu1 %v9538_v9 }
 0x3bf   :  { %8967 = vmatpush3.bf16.msra.mxu0 %v8966_v57  ;;  %8126 = vmatprep.mubr.msk.f32.mxu0 %vm9539_vm4, %v9540_v13 }
 0x3c0   :  { %8151 = vmatprep.subr.mxu0 %v9540_v13  ;;  %8139 = vmatmul.mubr.msk.f32.vlgmr.msra.gmra.mrb[32].mxu1 %vm785_vm6, %v674_v12  ;;  %v672_v47 = vpop.permute.xlu0 %671 }
 0x3c1   :  { %v676_v22 = vpop.permute.xlu1 %675  ;;  %8141 = vmatprep.mubr.msk.f32.mxu1 %vm9539_vm4, %v9540_v13 }
 0x3c2   :  { %8127 = vmatmul.mubr.msk.f32.gmra.mrb[40].mxu0 %vm785_vm6, %v670_v16 }
 0x3c3   :  { %8152 = vmatpush3.msk.msra.mxu0 %vm207_vm2, %v9965_v5  ;;  %8129 = vmatprep.mubr.msk.f32.mxu0 %vm9539_vm4, %v9540_v13 }
 0x3c4   :  { %8142 = vmatmul.mubr.msk.f32.gmra.mrb[34].mxu1 %vm785_vm6, %v676_v22  ;;  %8971 = vmatprep.subr.bf16.mxu0 %v9538_v9  ;;  %v733_v6 = vpop.permute.xlu0 %732 }
 0x3c5   :  { %v678_v48 = vpop.permute.xlu1 %677  ;;  %8144 = vmatprep.mubr.msk.f32.mxu1 %vm9539_vm4, %v9540_v13 }
 0x3c6   :  { %8130 = vmatmul.mubr.msk.f32.gmra.mrb[42].mxu0 %vm785_vm6, %v672_v47 }
 0x3c7   :  { %8153 = vmatprep.mubr.msk.f32.mxu0 %vm9539_vm4, %v9540_v13 }
 0x3c8   :  { %8145 = vmatmul.mubr.msk.f32.gmra.mrb[36].mxu1 %vm785_vm6, %v678_v48 }
 0x3c9   :  { %v9172_v57 = vpop.permute.xlu1 %9171  ;;  %8168 = vmatprep.mubr.msk.f32.mxu1 %vm9539_vm4, %v9540_v13 }
 0x3ca   :  { %v9174_v5 = vunpack.i.h.bf16 %v9172_v57  ;;  %v9173_v25 = vunpack.i.l.bf16 %v9172_v57 }
 0x3cc   :  { %v8969_v8 = vpack.c.bf16 %v9174_v5, %v9173_v25 }
 0x3ce   :  { %8970 = vmatpush3.bf16.msra.mxu1 %v8969_v8 }
 0x3cf   :  { %8166 = vmatprep.subr.mxu1 %v9540_v13 }
 0x3d2   :  { %8167 = vmatpush3.msk.msra.mxu1 %vm207_vm2, %v733_v6 }
 0x3d3   :  { %8974 = vmatprep.subr.bf16.mxu1 %v9538_v9 }
 0x3f9   :  { %v10160_v14 = vpop.f32.mrb[20].mxu0 }
 0x3fa   :  { %v8035_v17 = vpop.f32.mrb[21].mxu0  ;;  %v1523_v21 = vsel %vm1522_vm8, %v10160_v14, -inf }
 0x3fb   :  { %1524 = vmax.xlane.f32.xlu0 %v1523_v21 }
 0x3fd   :  { %v10164_v24 = vpop.f32.mrb[22].mxu0 }
 0x3fe   :  { %v8038_v26 = vpop.f32.mrb[23].mxu0  ;;  %v1526_v27 = vsel %vm1522_vm8, %v10164_v24, -inf }
 0x3ff   :  { %1527 = vmax.xlane.f32.xlu0 %v1526_v27 }
 0x401   :  { %v10168_v28 = vpop.f32.mrb[24].mxu0 }
 0x402   :  { %v8041_v29 = vpop.f32.mrb[25].mxu0  ;;  %v1530_v32 = vsel %vm1529_vm9, %v10168_v28, -inf }
 0x403   :  { %1531 = vmax.xlane.f32.xlu0 %v1530_v32 }
 0x46f   :  { %v10172_v33 = vpop.f32.mrb[14].mxu1 }
 0x470   :  { %v8050_v35 = vpop.f32.mrb[15].mxu1  ;;  %v1533_v36 = vsel %vm1522_vm8, %v10172_v33, -inf }
 0x471   :  { %v10176_v37 = vpop.f32.mrb[26].mxu0  ;;  %1534 = vmax.xlane.f32.xlu1 %v1533_v36 }
 0x472   :  { %v8065_v38 = vpop.f32.mrb[27].mxu0  ;;  %v1542_v41 = vsel %vm1522_vm8, %v10176_v37, -inf }
 0x473   :  { %1543 = vmax.xlane.f32.xlu0 %v1542_v41  ;;  %v10180_v43 = vpop.f32.mrb[16].mxu1 }
 0x474   :  { %v8053_v44 = vpop.f32.mrb[17].mxu1  ;;  %v1536_v45 = vsel %vm1522_vm8, %v10180_v43, -inf }
 0x475   :  { %v10184_v46 = vpop.f32.mrb[28].mxu0 }
 0x476   :  { %v8068_v49 = vpop.f32.mrb[29].mxu0  ;;  %v1545_v55 = vsel %vm1522_vm8, %v10184_v46, -inf }
 0x477   :  { %1537 = vmax.xlane.f32.xlu0 %v1536_v45  ;;  %v10186_v50 = vpop.f32.mrb[18].mxu1 }
 0x478   :  { %v8056_v51 = vpop.f32.mrb[19].mxu1  ;;  %v1539_v52 = vsel %vm1529_vm9, %v10186_v50, -inf }
 0x479   :  { %v10190_v53 = vpop.f32.mrb[30].mxu0  ;;  %1540 = vmax.xlane.f32.xlu1 %v1539_v52 }
 0x47a   :  { %v8071_v54 = vpop.f32.mrb[31].mxu0  ;;  %v1548_v63 = vsel %vm1529_vm9, %v10190_v53, -inf }
 0x47b   :  { %1546 = vmax.xlane.f32.xlu0 %v1545_v55  ;;  %v10194_v56 = vpop.f32.mrb[20].mxu1 }
 0x47c   :  { %v8080_v58 = vpop.f32.mrb[21].mxu1  ;;  %v1551_v60 = vsel %vm1522_vm8, %v10194_v56, -inf }
 0x47d   :  { %v10198_v61 = vpop.f32.mrb[32].mxu0  ;;  %1552 = vmax.xlane.f32.xlu1 %v1551_v60  ;;  %v9190_v58 = vpack.i.bf16 %v9981_v18, %v9984_v19  ;;  %v10255_v60 = vpop.permute.xlu0 %740 }
 0x47e   :  { %v8095_v62 = vpop.f32.mrb[33].mxu0  ;;  %v1560_v3 = vsel %vm1522_vm8, %v10198_v61, -inf }
 0x47f   :  { %1549 = vmax.xlane.f32.xlu0 %v1548_v63  ;;  %v10202_v0 = vpop.f32.mrb[22].mxu1 }
 0x480   :  { %v8083_v1 = vpop.f32.mrb[23].mxu1  ;;  %v1554_v31 = vsel %vm1522_vm8, %v10202_v0, -inf }
 0x481   :  { %v10206_v2 = vpop.f32.mrb[34].mxu0  ;;  %1555 = vmax.xlane.f32.xlu1 %v1554_v31 }
 0x482   :  { %v8098_v59 = vpop.f32.mrb[35].mxu0  ;;  %v1563_v16 = vsel %vm1522_vm8, %v10206_v2, -inf }
 0x483   :  { %1561 = vmax.xlane.f32.xlu0 %v1560_v3  ;;  %v10210_v4 = vpop.f32.mrb[24].mxu1 }
 0x484   :  { %v8086_v7 = vpop.f32.mrb[25].mxu1  ;;  %v1557_v10 = vsel %vm1529_vm9, %v10210_v4, -inf }
 0x485   :  { %v10214_v11 = vpop.f32.mrb[36].mxu0  ;;  %1558 = vmax.xlane.f32.xlu1 %v1557_v10 }
 0x486   :  { %v8101_v12 = vpop.f32.mrb[37].mxu0  ;;  %v1566_v57 = vsel %vm1529_vm9, %v10214_v11, -inf }
 0x487   :  { %1564 = vmax.xlane.f32.xlu0 %v1563_v16  ;;  %v10218_v22 = vpop.f32.mrb[26].mxu1 }
 0x488   :  { %v8110_v47 = vpop.f32.mrb[27].mxu1  ;;  %v1569_v48 = vsel %vm1522_vm8, %v10218_v22, -inf  ;;  %v1525_v62 = vpop.xlane.xlu0 %1524 }
 0x489   :  { %1570 = vmax.xlane.f32.xlu1 %v1569_v48  ;;  %v1596_v1 = vsub.f32 %v10160_v14, %v1525_v62 }
 0x48b   :  { %1567 = vmax.xlane.f32.xlu0 %v1566_v57  ;;  %v10224_v5 = vpop.f32.mrb[28].mxu1  ;;  %v1620_v31 = vmul.f32 1.442695, %v1596_v1 }
 0x48c   :  { %v8113_v25 = vpop.f32.mrb[29].mxu1  ;;  %v1572_v8 = vsel %vm1522_vm8, %v10224_v5, -inf  ;;  %v1528_v63 = vpop.xlane.xlu0 %1527 }
 0x48d   :  { %1573 = vmax.xlane.f32.xlu1 %v1572_v8  ;;  %v1597_v59 = vsub.f32 %v10164_v24, %v1528_v63  ;;  %9270 = vpow2.f32 %v1620_v31 }
 0x48f   :  { %v10228_v6 = vpop.f32.mrb[30].mxu1  ;;  %v1622_v7 = vmul.f32 1.442695, %v1597_v59 }
 0x490   :  { %v8116_v17 = vpop.f32.mrb[31].mxu1  ;;  %v1575_v21 = vsel %vm1529_vm9, %v10228_v6, -inf  ;;  %v1532_v3 = vpop.xlane.xlu0 %1531 }
 0x491   :  { %v10232_v26 = vpop.f32.mrb[38].mxu0  ;;  %1576 = vmax.xlane.f32.xlu1 %v1575_v21  ;;  %v1598_v10 = vsub.f32 %v10168_v28, %v1532_v3  ;;  %9272 = vpow2.f32 %v1622_v7  ;;  %v10280_v17 = vpop.permute.xlu1 %9176 }
 0x492   :  { %v8125_v27 = vpop.f32.mrb[39].mxu0  ;;  %v1578_v29 = vsel %vm1522_vm8, %v10232_v26, -inf }
 0x493   :  { %1579 = vmax.xlane.f32.xlu0 %v1578_v29  ;;  %v10236_v32 = vpop.f32.mrb[32].mxu1  ;;  %v1624_v12 = vmul.f32 1.442695, %v1598_v10 }
 0x494   :  { %v8140_v35 = vpop.f32.mrb[33].mxu1  ;;  %v1587_v16 = vsel %vm1522_vm8, %v10236_v32, -inf }
 0x495   :  { %v10238_v36 = vpop.f32.mrb[40].mxu0  ;;  %9274 = vpow2.f32 %v1624_v12  ;;  %v10282_v21 = vpop.permute.xlu1 %9181 }
 0x496   :  { %v8128_v38 = vpop.f32.mrb[41].mxu0  ;;  %v1581_v41 = vsel %vm1522_vm8, %v10238_v36, -inf }
 0x497   :  { %1582 = vmax.xlane.f32.xlu0 %v1581_v41  ;;  %v10242_v44 = vpop.f32.mrb[34].mxu1  ;;  %v10263_v47 = vpop.eup %9270 }
 0x498   :  { %v8143_v45 = vpop.f32.mrb[35].mxu1  ;;  %v1590_v14 = vsel %vm1522_vm8, %v10242_v44, -inf  ;;  %v1668_v24 = vsel %vm1522_vm8, %v10263_v47, 0.0 }
 0x499   :  { %v10244_v49 = vpop.f32.mrb[42].mxu0  ;;  %v10284_v27 = vpop.permute.xlu1 %748 }
 0x49a   :  { %v8131_v51 = vpop.f32.mrb[43].mxu0  ;;  %v1584_v52 = vsel %vm1529_vm9, %v10244_v49, -inf }
 0x49b   :  { %1585 = vmax.xlane.f32.xlu0 %v1584_v52  ;;  %v10248_v54 = vpop.f32.mrb[36].mxu1  ;;  %v10269_v48 = vpop.eup %9272 }
 0x49c   :  { %v8146_v55 = vpop.f32.mrb[37].mxu1  ;;  %v1593_v28 = vsel %vm1529_vm9, %v10248_v54, -inf  ;;  %v1671_v57 = vsel %vm1522_vm8, %v10269_v48, 0.0 }
 0x49f   :  { %v10275_v25 = vpop.eup %9274 }
 0x4a0   :  { %v1674_v8 = vsel %vm1529_vm9, %v10275_v25, 0.0 }
 0x4a2   :  { %765 = vrot.lane.b32.xlu1 %v9973_v15, %s9541_s30 }
 0x4a6   :  { %9191 = vrot.lane.b32.xlu1 %v9190_v58, %s12001_s1 }
 0x4b1   :  { %9186 = vrot.lane.b32.xlu0 %v9190_v58, %s9541_s30 }
 0x4ca   :  { %1588 = vmax.xlane.f32.xlu1 %v1587_v16 }
 0x4ce   :  { %1591 = vmax.xlane.f32.xlu1 %v1590_v14 }
 0x4d0   :  { %1669 = vadd.xlane.f32.xlu0 %v1668_v24 }
 0x4d2   :  { %1594 = vmax.xlane.f32.xlu1 %v1593_v28 }
 0x4d4   :  { %1672 = vadd.xlane.f32.xlu0 %v1671_v57 }
 0x4d8   :  { %1675 = vadd.xlane.f32.xlu0 %v1674_v8 }
 0x4e3   :  { %9196 = vrot.lane.b32.xlu1 %v9190_v58, %s11999_s28 }
 0x4fe   :  { %v1535_v29 = vpop.xlane.xlu1 %1534 }
 0x4ff   :  { %v1599_v35 = vsub.f32 %v10172_v33, %v1535_v29 }
 0x500   :  { %v1544_v38 = vpop.xlane.xlu0 %1543 }
 0x501   :  { %v1626_v41 = vmul.f32 1.442695, %v1599_v35  ;;  %v1602_v45 = vsub.f32 %v10176_v37, %v1544_v38 }
 0x503   :  { %9276 = vpow2.f32 %v1626_v41  ;;  %v1632_v51 = vmul.f32 1.442695, %v1602_v45 }
 0x504   :  { %v1538_v52 = vpop.xlane.xlu0 %1537 }
 0x505   :  { %9278 = vpow2.f32 %v1632_v51  ;;  %v1600_v55 = vsub.f32 %v10180_v43, %v1538_v52 }
 0x506   :  { %v1541_v58 = vpop.xlane.xlu1 %1540 }
 0x507   :  { %v1628_v62 = vmul.f32 1.442695, %v1600_v55  ;;  %v1601_v63 = vsub.f32 %v10186_v50, %v1541_v58 }
 0x508   :  { %v1547_v1 = vpop.xlane.xlu0 %1546 }
 0x509   :  { %9280 = vpow2.f32 %v1628_v62  ;;  %v1630_v31 = vmul.f32 1.442695, %v1601_v63  ;;  %v1603_v59 = vsub.f32 %v10184_v46, %v1547_v1 }
 0x50a   :  { %v1553_v33 = vpop.xlane.xlu1 %1552 }
 0x50b   :  { %9282 = vpow2.f32 %v1630_v31  ;;  %v1634_v3 = vmul.f32 1.442695, %v1603_v59  ;;  %v1605_v37 = vsub.f32 %v10194_v56, %v1553_v33 }
 0x50c   :  { %v1550_v7 = vpop.xlane.xlu0 %1549 }
 0x50d   :  { %v10292_v10 = vpop.eup %9276  ;;  %9284 = vpow2.f32 %v1634_v3  ;;  %v1638_v12 = vmul.f32 1.442695, %v1605_v37  ;;  %v1604_v43 = vsub.f32 %v10190_v53, %v1550_v7 }
 0x50e   :  { %v1556_v16 = vpop.xlane.xlu1 %1555  ;;  %v1677_v50 = vsel %vm1522_vm8, %v10292_v10, 0.0 }
 0x50f   :  { %v10297_v14 = vpop.eup %9278  ;;  %9286 = vpow2.f32 %v1638_v12  ;;  %v1636_v46 = vmul.f32 1.442695, %v1604_v43  ;;  %v1606_v24 = vsub.f32 %v10202_v0, %v1556_v16  ;;  %1678 = vadd.xlane.f32.xlu1 %v1677_v50 }
 0x510   :  { %v1562_v28 = vpop.xlane.xlu0 %1561  ;;  %v1686_v56 = vsel %vm1522_vm8, %v10297_v14, 0.0 }
 0x511   :  { %9288 = vpow2.f32 %v1636_v46  ;;  %v1640_v57 = vmul.f32 1.442695, %v1606_v24  ;;  %v1608_v8 = vsub.f32 %v10198_v61, %v1562_v28  ;;  %1687 = vadd.xlane.f32.xlu0 %v1686_v56 }
 0x512   :  { %v1559_v53 = vpop.xlane.xlu1 %1558 }
 0x513   :  { %v10303_v29 = vpop.eup %9280  ;;  %9290 = vpow2.f32 %v1640_v57  ;;  %v1644_v35 = vmul.f32 1.442695, %v1608_v8  ;;  %v1607_v38 = vsub.f32 %v10210_v4, %v1559_v53 }
 0x514   :  { %v1565_v41 = vpop.xlane.xlu0 %1564  ;;  %v1680_v0 = vsel %vm1522_vm8, %v10303_v29, 0.0 }
 0x515   :  { %v10308_v45 = vpop.eup %9282  ;;  %9292 = vpow2.f32 %v1644_v35  ;;  %v1642_v51 = vmul.f32 1.442695, %v1607_v38  ;;  %v1609_v52 = vsub.f32 %v10206_v2, %v1565_v41  ;;  %1681 = vadd.xlane.f32.xlu1 %v1680_v0 }
 0x516   :  { %v1571_v61 = vpop.xlane.xlu1 %1570  ;;  %v1683_v55 = vsel %vm1529_vm9, %v10308_v45, 0.0 }
 0x517   :  { %v10313_v58 = vpop.eup %9284  ;;  %9294 = vpow2.f32 %v1642_v51  ;;  %v1646_v62 = vmul.f32 1.442695, %v1609_v52  ;;  %v1611_v4 = vsub.f32 %v10218_v22, %v1571_v61 }
 0x518   :  { %v1568_v63 = vpop.xlane.xlu0 %1567  ;;  %v1689_v1 = vsel %vm1522_vm8, %v10313_v58, 0.0 }
 0x519   :  { %v10318_v31 = vpop.eup %9286  ;;  %9296 = vpow2.f32 %v1646_v62  ;;  %v1610_v2 = vsub.f32 %v10214_v11, %v1568_v63  ;;  %1690 = vadd.xlane.f32.xlu0 %v1689_v1  ;;  %1684 = vadd.xlane.f32.xlu1 %v1683_v55  ;;  %v1650_v37 = vmul.f32 1.442695, %v1611_v4 }
 0x51a   :  { %v1574_v59 = vpop.xlane.xlu1 %1573  ;;  %v1695_v33 = vsel %vm1522_vm8, %v10318_v31, 0.0 }
 0x51b   :  { %v10323_v3 = vpop.eup %9288  ;;  %v1648_v7 = vmul.f32 1.442695, %v1610_v2  ;;  %v1612_v22 = vsub.f32 %v10224_v5, %v1574_v59 }
 0x51c   :  { %v1692_v12 = vsel %vm1529_vm9, %v10323_v3, 0.0 }
 0x51d   :  { %v10328_v43 = vpop.eup %9290  ;;  %9298 = vpow2.f32 %v1648_v7  ;;  %1693 = vadd.xlane.f32.xlu0 %v1692_v12  ;;  %1696 = vadd.xlane.f32.xlu1 %v1695_v33  ;;  %v1652_v46 = vmul.f32 1.442695, %v1612_v22 }
 0x51e   :  { %v1577_v11 = vpop.xlane.xlu1 %1576  ;;  %v1698_v16 = vsel %vm1522_vm8, %v10328_v43, 0.0  ;;  %9300 = vpow2.f32 %v1650_v37 }
 0x51f   :  { %v10332_v50 = vpop.eup %9292  ;;  %v1613_v24 = vsub.f32 %v10228_v6, %v1577_v11  ;;  %9302 = vpow2.f32 %v1652_v46 }
 0x520   :  { %v1580_v28 = vpop.xlane.xlu0 %1579  ;;  %v1704_v5 = vsel %vm1522_vm8, %v10332_v50, 0.0 }
 0x521   :  { %v10337_v56 = vpop.eup %9294  ;;  %v1614_v57 = vsub.f32 %v10232_v26, %v1580_v28  ;;  %1705 = vadd.xlane.f32.xlu0 %v1704_v5  ;;  %1699 = vadd.xlane.f32.xlu1 %v1698_v16  ;;  %v1654_v38 = vmul.f32 1.442695, %v1613_v24 }
 0x522   :  { %v1701_v8 = vsel %vm1529_vm9, %v10337_v56, 0.0  ;;  %v10378_v11 = vpop.permute.xlu1 %765 }
 0x523   :  { %v10342_v53 = vpop.eup %9296  ;;  %v1656_v35 = vmul.f32 1.442695, %v1614_v57 }
 0x524   :  { %v1583_v41 = vpop.xlane.xlu0 %1582  ;;  %v1707_v6 = vsel %vm1522_vm8, %v10342_v53, 0.0 }
 0x525   :  { %9304 = vpow2.f32 %v1656_v35  ;;  %v1615_v0 = vsub.f32 %v10238_v36, %v1583_v41  ;;  %1702 = vadd.xlane.f32.xlu0 %v1701_v8  ;;  %1708 = vadd.xlane.f32.xlu1 %v1707_v6 }
 0x526   :  { %9306 = vpow2.f32 %v1654_v38  ;;  %v10380_v16 = vpop.permute.xlu1 %9191 }
 0x527   :  { %v10347_v26 = vpop.eup %9298  ;;  %v1658_v51 = vmul.f32 1.442695, %v1615_v0 }
 0x528   :  { %v1586_v52 = vpop.xlane.xlu0 %1585  ;;  %v1710_v61 = vsel %vm1529_vm9, %v10347_v26, 0.0  ;;  %v10351_v55 = vpop.eup %9300 }
 0x529   :  { %9308 = vpow2.f32 %v1658_v51  ;;  %v1616_v62 = vsub.f32 %v10244_v49, %v1586_v52  ;;  %1711 = vadd.xlane.f32.xlu0 %v1710_v61  ;;  %v1713_v36 = vsel %vm1522_vm8, %v10351_v55, 0.0  ;;  %v10356_v63 = vpop.eup %9302  ;;  %v9179_v61 = vunpack.i.h.bf16 %v10280_v17 }
 0x52a   :  { %v1716_v59 = vsel %vm1522_vm8, %v10356_v63, 0.0 }
 0x52b   :  { %v1660_v4 = vmul.f32 1.442695, %v1616_v62  ;;  %v9178_v62 = vunpack.i.l.bf16 %v10280_v17 }
 0x52c   :  { %v10383_v28 = vpop.permute.xlu0 %9186 }
 0x52d   :  { %9310 = vpow2.f32 %v1660_v4  ;;  %1714 = vadd.xlane.f32.xlu0 %v1713_v36 }
 0x52f   :  { %v10358_v1 = vpop.eup %9304 }
 0x530   :  { %v1722_v2 = vsel %vm1522_vm8, %v10358_v1, 0.0  ;;  %v10364_v33 = vpop.eup %9306 }
 0x531   :  { %1723 = vadd.xlane.f32.xlu1 %v1722_v2  ;;  %1717 = vadd.xlane.f32.xlu0 %v1716_v59  ;;  %v1719_v7 = vsel %vm1529_vm9, %v10364_v33, 0.0  ;;  %v8972_v2 = vpack.c.bf16 %v9179_v61, %v9178_v62 }
 0x533   :  { %v10366_v49 = vpop.eup %9308 }
 0x534   :  { %v1725_v37 = vsel %vm1522_vm8, %v10366_v49, 0.0 }
 0x535   :  { %1726 = vadd.xlane.f32.xlu1 %v1725_v37  ;;  %1720 = vadd.xlane.f32.xlu0 %v1719_v7 }
 0x537   :  { %v10372_v22 = vpop.eup %9310 }
 0x538   :  { %v1728_v12 = vsel %vm1529_vm9, %v10372_v22, 0.0 }
 0x539   :  { %1729 = vadd.xlane.f32.xlu0 %v1728_v12 }
 0x546   :  { %773 = vrot.lane.b32.xlu1 %v9973_v15, %s12001_s1 }
 0x557   :  { %v1589_v46 = vpop.xlane.xlu1 %1588 }
 0x558   :  { %v1617_v24 = vsub.f32 %v10236_v32, %v1589_v46 }
 0x55a   :  { %v1662_v5 = vmul.f32 1.442695, %v1617_v24 }
 0x55b   :  { %v1592_v57 = vpop.xlane.xlu1 %1591 }
 0x55c   :  { %9312 = vpow2.f32 %v1662_v5  ;;  %v1618_v8 = vsub.f32 %v10242_v44, %v1592_v57  ;;  %v9183_v57 = vunpack.i.l.bf16 %v10282_v21 }
 0x55d   :  { %v1670_v35 = vpop.xlane.xlu0 %1669 }
 0x55e   :  { %9314 = vrcp.f32 %v1670_v35  ;;  %v1664_v38 = vmul.f32 1.442695, %v1618_v8 }
 0x55f   :  { %v1595_v41 = vpop.xlane.xlu1 %1594 }
 0x560   :  { %9316 = vpow2.f32 %v1664_v38  ;;  %v1619_v6 = vsub.f32 %v10248_v54, %v1595_v41 }
 0x561   :  { %v1673_v0 = vpop.xlane.xlu0 %1672 }
 0x562   :  { %9318 = vrcp.f32 %v1673_v0  ;;  %v1666_v51 = vmul.f32 1.442695, %v1619_v6 }
 0x564   :  { %9320 = vpow2.f32 %v1666_v51 }
 0x565   :  { %v1676_v52 = vpop.xlane.xlu0 %1675 }
 0x566   :  { %v10387_v32 = vpop.eup %9312  ;;  %9322 = vrcp.f32 %v1676_v52 }
 0x567   :  { %v1731_v44 = vsel %vm1522_vm8, %v10387_v32, 0.0 }
 0x568   :  { %v9315_v4 = vpop.eup %9314  ;;  %1732 = vadd.xlane.f32.xlu0 %v1731_v44 }
 0x569   :  { %v1764_v36 = vmul.f32 %v9315_v4, %v10263_v47  ;;  %v9189_v4 = vunpack.i.h.bf16 %v10383_v28 }
 0x56a   :  { %v10394_v54 = vpop.eup %9316 }
 0x56b   :  { %8154 = vmatmul.mubr.msk.f32.vlgmr.msra.gmra.mrb[44].mxu0 %vm1522_vm8, %v1764_v36  ;;  %v1734_v59 = vsel %vm1522_vm8, %v10394_v54, 0.0  ;;  %v9188_v36 = vunpack.i.l.bf16 %v10383_v28  ;;  %v9193_v28 = vunpack.i.l.bf16 %v10380_v16 }
 0x56c   :  { %v9319_v37 = vpop.eup %9318  ;;  %8973 = vmatpush3.bf16.msra.mxu0 %v8972_v2  ;;  %8156 = vmatprep.mubr.msk.f32.mxu0 %vm9539_vm4, %v9540_v13 }
 0x56d   :  { %8181 = vmatprep.subr.mxu0 %v9540_v13  ;;  %1735 = vadd.xlane.f32.xlu0 %v1734_v59  ;;  %v1765_v17 = vmul.f32 %v9319_v37, %v10269_v48  ;;  %v10419_v48 = vpop.permute.xlu1 %9196  ;;  %v9194_v59 = vunpack.i.h.bf16 %v10380_v16 }
 0x56e   :  { %v10403_v7 = vpop.eup %9320 }
 0x56f   :  { %8157 = vmatmul.mubr.msk.f32.gmra.mrb[46].mxu0 %vm1522_vm8, %v1765_v17  ;;  %v1737_v47 = vsel %vm1529_vm9, %v10403_v7, 0.0  ;;  %v8981_v17 = vpack.c.bf16 %v9189_v4, %v9188_v36  ;;  %v8984_v16 = vpack.c.bf16 %v9194_v59, %v9193_v28  ;;  %v2518_v36 = vld [vmem:[%s11978_s13 + $0x10] sm:$0xff]  ;;  %v2519_v59 = vld [vmem:[%s11978_s13 + $0x18] sm:$0xff] }
 0x570   :  { %v9323_v12 = vpop.eup %9322  ;;  %8182 = vmatpush3.msk.msra.mxu0 %vm207_vm2, %v10255_v60  ;;  %8159 = vmatprep.mubr.msk.f32.mxu0 %vm9539_vm4, %v9540_v13 }
 0x571   :  { %1738 = vadd.xlane.f32.xlu0 %v1737_v47  ;;  %v1766_v46 = vmul.f32 %v9323_v12, %v10275_v25  ;;  %8977 = vmatprep.subr.bf16.mxu0 %v9538_v9  ;;  %v9184_v25 = vunpack.i.h.bf16 %v10282_v21 }
 0x573   :  { %8160 = vmatmul.mubr.msk.f32.gmra.mrb[48].mxu0 %vm1522_vm8, %v1766_v46  ;;  %v8975_v0 = vpack.c.bf16 %v9184_v25, %v9183_v57 }
 0x574   :  { %8183 = vmatprep.mubr.msk.f32.mxu0 %vm9539_vm4, %v9540_v13 }
 0x587   :  { %781 = vrot.lane.b32.xlu0 %v9973_v15, %s11999_s28 }
 0x59c   :  { %v1679_v24 = vpop.xlane.xlu1 %1678 }
 0x59d   :  { %9324 = vrcp.f32 %v1679_v24 }
 0x59e   :  { %v1688_v60 = vpop.xlane.xlu0 %1687 }
 0x59f   :  { %9326 = vrcp.f32 %v1688_v60 }
 0x5a2   :  { %v1682_v5 = vpop.xlane.xlu1 %1681 }
 0x5a3   :  { %9328 = vrcp.f32 %v1682_v5 }
 0x5a6   :  { %v1691_v8 = vpop.xlane.xlu0 %1690  ;;  %v1685_v35 = vpop.xlane.xlu1 %1684 }
 0x5a7   :  { %v9325_v38 = vpop.eup %9324  ;;  %9330 = vrcp.f32 %v1691_v8 }
 0x5a8   :  { %v1767_v41 = vmul.f32 %v9325_v38, %v10292_v10  ;;  %9332 = vrcp.f32 %v1685_v35  ;;  %v9198_v35 = vunpack.i.l.bf16 %v10419_v48 }
 0x5a9   :  { %v9327_v6 = vpop.eup %9326 }
 0x5aa   :  { %v1770_v51 = vmul.f32 %v9327_v6, %v10297_v14  ;;  %v1694_v52 = vpop.xlane.xlu0 %1693  ;;  %v1697_v61 = vpop.xlane.xlu1 %1696  ;;  %8169 = vmatmul.mubr.msk.f32.vlgmr.msra.gmra.mrb[38].mxu1 %vm1522_vm8, %v1767_v41 }
 0x5ab   :  { %9334 = vrcp.f32 %v1694_v52  ;;  %8976 = vmatpush3.bf16.msra.mxu1 %v8975_v0  ;;  %8171 = vmatprep.mubr.msk.f32.mxu1 %vm9539_vm4, %v9540_v13 }
 0x5ac   :  { %9336 = vrcp.f32 %v1697_v61  ;;  %8184 = vmatmul.mubr.msk.f32.vlgmr.msra.gmra.mrb[50].mxu0 %vm1522_vm8, %v1770_v51  ;;  %8196 = vmatprep.subr.mxu1 %v9540_v13  ;;  %v2516_v61 = vld [vmem:[%s11978_s13] sm:$0xff] }
 0x5ad   :  { %v9329_v21 = vpop.eup %9328  ;;  %8979 = vmatpush3.bf16.msra.mxu0 %v8978_v20  ;;  %8186 = vmatprep.mubr.msk.f32.mxu0 %vm9539_vm4, %v9540_v13 }
 0x5ae   :  { %v1706_v10 = vpop.xlane.xlu0 %1705  ;;  %v1700_v14 = vpop.xlane.xlu1 %1699  ;;  %8211 = vmatprep.subr.mxu0 %v9540_v13  ;;  %v1768_v62 = vmul.f32 %v9329_v21, %v10303_v29 }
 0x5af   :  { %9338 = vrcp.f32 %v1706_v10  ;;  %8197 = vmatpush3.msk.msra.mxu1 %vm207_vm2, %v10284_v27 }
 0x5b0   :  { %9340 = vrcp.f32 %v1700_v14  ;;  %8172 = vmatmul.mubr.msk.f32.gmra.mrb[40].mxu1 %vm1522_vm8, %v1768_v62  ;;  %8980 = vmatprep.subr.bf16.mxu1 %v9538_v9 }
 0x5b1   :  { %v9331_v18 = vpop.eup %9330  ;;  %8212 = vmatpush3.msk.msra.mxu0 %vm207_vm2, %v9973_v15  ;;  %8174 = vmatprep.mubr.msk.f32.mxu1 %vm9539_vm4, %v9540_v13 }
 0x5b2   :  { %v9333_v19 = vpop.eup %9332  ;;  %v1703_v20 = vpop.xlane.xlu0 %1702  ;;  %v1771_v29 = vmul.f32 %v9331_v18, %v10313_v58  ;;  %8983 = vmatprep.subr.bf16.mxu0 %v9538_v9 }
 0x5b3   :  { %v1709_v44 = vpop.xlane.xlu1 %1708  ;;  %9342 = vrcp.f32 %v1703_v20  ;;  %v1769_v27 = vmul.f32 %v9333_v19, %v10308_v45 }
 0x5b4   :  { %9344 = vrcp.f32 %v1709_v44  ;;  %8187 = vmatmul.mubr.msk.f32.gmra.mrb[52].mxu0 %vm1522_vm8, %v1771_v29 }
 0x5b5   :  { %v9335_v15 = vpop.eup %9334  ;;  %8175 = vmatmul.mubr.msk.f32.gmra.mrb[42].mxu1 %vm1522_vm8, %v1769_v27  ;;  %8189 = vmatprep.mubr.msk.f32.mxu0 %vm9539_vm4, %v9540_v13 }
 0x5b6   :  { %v9337_v2 = vpop.eup %9336  ;;  %v1712_v58 = vpop.xlane.xlu0 %1711  ;;  %8198 = vmatprep.mubr.msk.f32.mxu1 %vm9539_vm4, %v9540_v13  ;;  %v1772_v45 = vmul.f32 %v9335_v15, %v10323_v3 }
 0x5b7   :  { %v1773_v37 = vmul.f32 %v9337_v2, %v10318_v31  ;;  %9346 = vrcp.f32 %v1712_v58 }
 0x5b8   :  { %8190 = vmatmul.mubr.msk.f32.gmra.mrb[54].mxu0 %vm1522_vm8, %v1772_v45 }
 0x5b9   :  { %v9339_v47 = vpop.eup %9338  ;;  %8199 = vmatmul.mubr.msk.f32.vlgmr.msra.gmra.mrb[44].mxu1 %vm1522_vm8, %v1773_v37  ;;  %8213 = vmatprep.mubr.msk.f32.mxu0 %vm9539_vm4, %v9540_v13 }
 0x5ba   :  { %v9341_v12 = vpop.eup %9340  ;;  %v1776_v46 = vmul.f32 %v9339_v47, %v10332_v50  ;;  %8982 = vmatpush3.bf16.msra.mxu1 %v8981_v17  ;;  %v1715_v3 = vpop.xlane.xlu0 %1714  ;;  %8201 = vmatprep.mubr.msk.f32.mxu1 %vm9539_vm4, %v9540_v13  ;;  %v2520_v17 = vld [vmem:[%s11978_s13 + $0x20] sm:$0xff] }
 0x5bb   :  { %9348 = vrcp.f32 %v1715_v3  ;;  %8226 = vmatprep.subr.mxu1 %v9540_v13  ;;  %v1774_v31 = vmul.f32 %v9341_v12, %v10328_v43 }
 0x5bc   :  { %8214 = vmatmul.mubr.msk.f32.vlgmr.msra.gmra.mrb[56].mxu0 %vm1522_vm8, %v1776_v46 }
 0x5bd   :  { %v9343_v24 = vpop.eup %9342  ;;  %8202 = vmatmul.mubr.msk.f32.gmra.mrb[46].mxu1 %vm1522_vm8, %v1774_v31  ;;  %8985 = vmatpush3.bf16.msra.mxu0 %v8984_v16 }
 0x5be   :  { %v9345_v60 = vpop.eup %9344  ;;  %8227 = vmatpush3.msk.msra.mxu1 %vm207_vm2, %v10378_v11  ;;  %v1724_v50 = vpop.xlane.xlu1 %1723  ;;  %8204 = vmatprep.mubr.msk.f32.mxu1 %vm9539_vm4, %v9540_v13  ;;  %v1775_v25 = vmul.f32 %v9343_v24, %v10337_v56 }
 0x5bf   :  { %v1718_v5 = vpop.xlane.xlu0 %1717  ;;  %9350 = vrcp.f32 %v1724_v50  ;;  %8216 = vmatprep.mubr.msk.f32.mxu0 %vm9539_vm4, %v9540_v13  ;;  %v1777_v43 = vmul.f32 %v9345_v60, %v10342_v53  ;;  %8241 = vmatprep.subr.mxu0 %v9540_v13  ;;  %v9199_v53 = vunpack.i.h.bf16 %v10419_v48 }
 0x5c0   :  { %9352 = vrcp.f32 %v1718_v5  ;;  %8986 = vmatprep.subr.bf16.mxu1 %v9538_v9  ;;  %v2521_v5 = vld [vmem:[%s11978_s13 + $0x28] sm:$0xff] }
 0x5c1   :  { %v9347_v57 = vpop.eup %9346  ;;  %8205 = vmatmul.mubr.msk.f32.gmra.mrb[48].mxu1 %vm1522_vm8, %v1775_v25  ;;  %8217 = vmatmul.mubr.msk.f32.gmra.mrb[58].mxu0 %vm1522_vm8, %v1777_v43 }
 0x5c2   :  { %v1727_v11 = vpop.xlane.xlu1 %1726  ;;  %8219 = vmatprep.mubr.msk.f32.mxu0 %vm9539_vm4, %v9540_v13  ;;  %v1778_v56 = vmul.f32 %v9347_v57, %v10347_v26  ;;  %8228 = vmatprep.mubr.msk.f32.mxu1 %vm9539_vm4, %v9540_v13  ;;  %v8987_v26 = vpack.c.bf16 %v9199_v53, %v9198_v35 }
 0x5c3   :  { %v1721_v8 = vpop.xlane.xlu0 %1720  ;;  %9354 = vrcp.f32 %v1727_v11 }
 0x5c4   :  { %9356 = vrcp.f32 %v1721_v8  ;;  %v2522_v8 = vld [vmem:[%s11978_s13 + $0x30] sm:$0xff] }
 0x5c5   :  { %v9349_v38 = vpop.eup %9348  ;;  %8220 = vmatmul.mubr.msk.f32.gmra.mrb[60].mxu0 %vm1522_vm8, %v1778_v56 }
 0x5c6   :  { %v1779_v41 = vmul.f32 %v9349_v38, %v10351_v55  ;;  %v774_v6 = vpop.permute.xlu1 %773  ;;  %8243 = vmatprep.mubr.msk.f32.mxu0 %vm9539_vm4, %v9540_v13 }
 0x5c7   :  { %v1730_v0 = vpop.xlane.xlu0 %1729  ;;  %8242 = vmatpush3.msk.msra.mxu0 %vm207_vm2, %v774_v6 }
 0x5c8   :  { %9358 = vrcp.f32 %v1730_v0  ;;  %8229 = vmatmul.mubr.msk.f32.vlgmr.msra.gmra.mrb[50].mxu1 %vm1522_vm8, %v1779_v41  ;;  %8267 = vmatprep.subr.mxu0 %v9540_v13 }
 0x5c9   :  { %v9351_v48 = vpop.eup %9350  ;;  %8988 = vmatpush3.bf16.msra.mxu1 %v8987_v26  ;;  %8231 = vmatprep.mubr.msk.f32.mxu1 %vm9539_vm4, %v9540_v13 }
 0x5ca   :  { %v9353_v51 = vpop.eup %9352  ;;  %v1782_v55 = vmul.f32 %v9351_v48, %v10358_v1  ;;  %8256 = vmatprep.subr.mxu1 %v9540_v13 }
 0x5cb   :  { %v1780_v52 = vmul.f32 %v9353_v51, %v10356_v63  ;;  %v2523_v51 = vld [vmem:[%s11978_s13 + $0x38] sm:$0xff] }
 0x5cc   :  { %8244 = vmatmul.mubr.msk.f32.vlgmr.msra.gmra.mrb[62].mxu0 %vm1522_vm8, %v1782_v55 }
 0x5cd   :  { %v9355_v21 = vpop.eup %9354  ;;  %8232 = vmatmul.mubr.msk.f32.gmra.mrb[52].mxu1 %vm1522_vm8, %v1780_v52  ;;  %8246 = vmatprep.mubr.msk.f32.mxu0 %vm9539_vm4, %v9540_v13 }
 0x5ce   :  { %v9357_v10 = vpop.eup %9356  ;;  %8234 = vmatprep.mubr.msk.f32.mxu1 %vm9539_vm4, %v9540_v13  ;;  %v1783_v1 = vmul.f32 %v9355_v21, %v10366_v49  ;;  %8268 = vmatpush3.msra.mxu0 %v2516_v61 }
 0x5cf   :  { %v1781_v63 = vmul.f32 %v9357_v10, %v10364_v33  ;;  %8289 = vmatprep.subr.mxu0 %v9540_v13 }
 0x5d0   :  { %8247 = vmatmul.mubr.msk.f32.gmra.mrb[64].mxu0 %vm1522_vm8, %v1783_v1 }
 0x5d1   :  { %8235 = vmatmul.mubr.msk.f32.gmra.mrb[54].mxu1 %vm1522_vm8, %v1781_v63  ;;  %8249 = vmatprep.mubr.msk.f32.mxu0 %vm9539_vm4, %v9540_v13 }
 0x5d2   :  { %v9359_v14 = vpop.eup %9358  ;;  %8258 = vmatprep.mubr.msk.f32.mxu1 %vm9539_vm4, %v9540_v13 }
 0x5d3   :  { %v1784_v62 = vmul.f32 %v9359_v14, %v10372_v22  ;;  %v2517_v22 = vld [vmem:[%s11978_s13 + $0x8] sm:$0xff] }
 0x5d5   :  { %8250 = vmatmul.mubr.msk.f32.gmra.mrb[66].mxu0 %vm1522_vm8, %v1784_v62 }
 0x5d6   :  { %8269 = vmatprep.mubr.msk.f32.mxu0 %vm9539_vm4, %v9540_v13 }
 0x5f5   :  { %v1733_v33 = vpop.xlane.xlu0 %1732 }
 0x5f6   :  { %9360 = vrcp.f32 %v1733_v33 }
 0x5fa   :  { %v1736_v49 = vpop.xlane.xlu0 %1735 }
 0x5fb   :  { %9362 = vrcp.f32 %v1736_v49 }
 0x5fe   :  { %v1739_v18 = vpop.xlane.xlu0 %1738 }
 0x5ff   :  { %9364 = vrcp.f32 %v1739_v18 }
 0x600   :  { %v9361_v19 = vpop.eup %9360 }
 0x601   :  { %v1785_v20 = vmul.f32 %v9361_v19, %v10387_v32 }
 0x602   :  { %v782_v44 = vpop.permute.xlu0 %781 }
 0x603   :  { %8257 = vmatpush3.msk.msra.mxu1 %vm207_vm2, %v782_v44 }
 0x604   :  { %8259 = vmatmul.mubr.msk.f32.vlgmr.msra.gmra.mrb[56].mxu1 %vm1522_vm8, %v1785_v20  ;;  %8278 = vmatprep.subr.mxu1 %v9540_v13 }
 0x605   :  { %v9363_v29 = vpop.eup %9362  ;;  %8261 = vmatprep.mubr.msk.f32.mxu1 %vm9539_vm4, %v9540_v13  ;;  %8279 = vmatpush3.msra.mxu1 %v2517_v22 }
 0x606   :  { %v1786_v27 = vmul.f32 %v9363_v29, %v10394_v54  ;;  %8300 = vmatprep.subr.mxu1 %v9540_v13 }
 0x608   :  { %8262 = vmatmul.mubr.msk.f32.gmra.mrb[58].mxu1 %vm1522_vm8, %v1786_v27 }
 0x609   :  { %v9365_v32 = vpop.eup %9364  ;;  %8264 = vmatprep.mubr.msk.f32.mxu1 %vm9539_vm4, %v9540_v13 }
 0x60a   :  { %v1787_v4 = vmul.f32 %v9365_v32, %v10403_v7 }
 0x60c   :  { %8265 = vmatmul.mubr.msk.f32.gmra.mrb[60].mxu1 %vm1522_vm8, %v1787_v4 }
 0x60d   :  { %8280 = vmatprep.mubr.msk.f32.mxu1 %vm9539_vm4, %v9540_v13 }
 0x63e   :  { %v1865_v54 = vpop.f32.mrb[44].mxu0 }
 0x63f   :  { %v8155_v15 = vpop.f32.mrb[45].mxu0  ;;  %8270 = vmatmul.mubr.msk.f32.vlgmr.msra.gmra.mrb[68].mxu0 %vm785_vm6, %v1865_v54 }
 0x640   :  { %8272 = vmatprep.mubr.msk.f32.mxu0 %vm9539_vm4, %v9540_v13  ;;  %8290 = vmatpush3.msra.mxu0 %v2518_v36 }
 0x641   :  { %8311 = vmatprep.subr.mxu0 %v9540_v13 }
 0x642   :  { %v1870_v7 = vpop.f32.mrb[46].mxu0 }
 0x643   :  { %v8158_v2 = vpop.f32.mrb[47].mxu0  ;;  %8273 = vmatmul.mubr.msk.f32.gmra.mrb[70].mxu0 %vm785_vm6, %v1870_v7 }
 0x644   :  { %8275 = vmatprep.mubr.msk.f32.mxu0 %vm9539_vm4, %v9540_v13 }
 0x646   :  { %v1875_v58 = vpop.f32.mrb[48].mxu0 }
 0x647   :  { %v8161_v45 = vpop.f32.mrb[49].mxu0  ;;  %8276 = vmatmul.mubr.msk.f32.gmra.mrb[72].mxu0 %vm785_vm6, %v1875_v58 }
 0x648   :  { %8291 = vmatprep.mubr.msk.f32.mxu0 %vm9539_vm4, %v9540_v13 }
 0x67d   :  { %v1956_v28 = vpop.f32.mrb[38].mxu1 }
 0x67e   :  { %v8170_v37 = vpop.f32.mrb[39].mxu1  ;;  %8281 = vmatmul.mubr.msk.f32.vlgmr.msra.gmra.mrb[62].mxu1 %vm785_vm6, %v1956_v28 }
 0x67f   :  { %v2047_v47 = vpop.f32.mrb[50].mxu0  ;;  %8283 = vmatprep.mubr.msk.f32.mxu1 %vm9539_vm4, %v9540_v13  ;;  %8301 = vmatpush3.msra.mxu1 %v2519_v59 }
 0x680   :  { %v8185_v12 = vpop.f32.mrb[51].mxu0  ;;  %8292 = vmatmul.mubr.msk.f32.vlgmr.msra.gmra.mrb[74].mxu0 %vm785_vm6, %v2047_v47  ;;  %8322 = vmatprep.subr.mxu1 %v9540_v13 }
 0x681   :  { %8294 = vmatprep.mubr.msk.f32.mxu0 %vm9539_vm4, %v9540_v13  ;;  %8312 = vmatpush3.msra.mxu0 %v2520_v17 }
 0x682   :  { %8333 = vmatprep.subr.mxu0 %v9540_v13 }
 0x683   :  { %v1961_v46 = vpop.f32.mrb[40].mxu1 }
 0x684   :  { %v8173_v3 = vpop.f32.mrb[41].mxu1  ;;  %8284 = vmatmul.mubr.msk.f32.gmra.mrb[64].mxu1 %vm785_vm6, %v1961_v46 }
 0x685   :  { %8286 = vmatprep.mubr.msk.f32.mxu1 %vm9539_vm4, %v9540_v13 }
 0x687   :  { %v2052_v16 = vpop.f32.mrb[52].mxu0 }
 0x688   :  { %v1966_v31 = vpop.f32.mrb[42].mxu1  ;;  %v8188_v24 = vpop.f32.mrb[53].mxu0  ;;  %8295 = vmatmul.mubr.msk.f32.gmra.mrb[76].mxu0 %vm785_vm6, %v2052_v16 }
 0x689   :  { %v8176_v60 = vpop.f32.mrb[43].mxu1  ;;  %8287 = vmatmul.mubr.msk.f32.gmra.mrb[66].mxu1 %vm785_vm6, %v1966_v31  ;;  %8297 = vmatprep.mubr.msk.f32.mxu0 %vm9539_vm4, %v9540_v13 }
 0x68a   :  { %8302 = vmatprep.mubr.msk.f32.mxu1 %vm9539_vm4, %v9540_v13 }
 0x68b   :  { %v2057_v50 = vpop.f32.mrb[54].mxu0 }
 0x68c   :  { %v2138_v25 = vpop.f32.mrb[44].mxu1  ;;  %v8191_v43 = vpop.f32.mrb[55].mxu0  ;;  %8298 = vmatmul.mubr.msk.f32.gmra.mrb[78].mxu0 %vm785_vm6, %v2057_v50 }
 0x68d   :  { %v8200_v57 = vpop.f32.mrb[45].mxu1  ;;  %8303 = vmatmul.mubr.msk.f32.vlgmr.msra.gmra.mrb[68].mxu1 %vm785_vm6, %v2138_v25  ;;  %8313 = vmatprep.mubr.msk.f32.mxu0 %vm9539_vm4, %v9540_v13 }
 0x68e   :  { %8305 = vmatprep.mubr.msk.f32.mxu1 %vm9539_vm4, %v9540_v13  ;;  %8323 = vmatpush3.msra.mxu1 %v2521_v5 }
 0x68f   :  { %v2229_v11 = vpop.f32.mrb[56].mxu0  ;;  %8344 = vmatprep.subr.mxu1 %v9540_v13 }
 0x690   :  { %v2143_v56 = vpop.f32.mrb[46].mxu1  ;;  %v8215_v53 = vpop.f32.mrb[57].mxu0  ;;  %8314 = vmatmul.mubr.msk.f32.vlgmr.msra.gmra.mrb[80].mxu0 %vm785_vm6, %v2229_v11 }
 0x691   :  { %v8203_v35 = vpop.f32.mrb[47].mxu1  ;;  %8306 = vmatmul.mubr.msk.f32.gmra.mrb[70].mxu1 %vm785_vm6, %v2143_v56  ;;  %8316 = vmatprep.mubr.msk.f32.mxu0 %vm9539_vm4, %v9540_v13 }
 0x692   :  { %8308 = vmatprep.mubr.msk.f32.mxu1 %vm9539_vm4, %v9540_v13  ;;  %8334 = vmatpush3.msra.mxu0 %v2522_v8 }
 0x693   :  { %8989 = vmatprep.subr.bf16.mxu0 %v9538_v9 }
 0x694   :  { %v2148_v38 = vpop.f32.mrb[48].mxu1  ;;  %v2234_v41 = vpop.f32.mrb[58].mxu0 }
 0x695   :  { %v8206_v6 = vpop.f32.mrb[49].mxu1  ;;  %v8218_v0 = vpop.f32.mrb[59].mxu0  ;;  %8309 = vmatmul.mubr.msk.f32.gmra.mrb[72].mxu1 %vm785_vm6, %v2148_v38  ;;  %8317 = vmatmul.mubr.msk.f32.gmra.mrb[82].mxu0 %vm785_vm6, %v2234_v41 }
 0x696   :  { %8319 = vmatprep.mubr.msk.f32.mxu0 %vm9539_vm4, %v9540_v13  ;;  %8324 = vmatprep.mubr.msk.f32.mxu1 %vm9539_vm4, %v9540_v13 }
 0x698   :  { %v2239_v26 = vpop.f32.mrb[60].mxu0 }
 0x699   :  { %v8221_v48 = vpop.f32.mrb[61].mxu0  ;;  %8320 = vmatmul.mubr.msk.f32.gmra.mrb[84].mxu0 %vm785_vm6, %v2239_v26 }
 0x69a   :  { %8335 = vmatprep.mubr.msk.f32.mxu0 %vm9539_vm4, %v9540_v13 }
 0x69b   :  { %v2320_v55 = vpop.f32.mrb[50].mxu1 }
 0x69c   :  { %v8230_v52 = vpop.f32.mrb[51].mxu1  ;;  %8325 = vmatmul.mubr.msk.f32.vlgmr.msra.gmra.mrb[74].mxu1 %vm785_vm6, %v2320_v55 }
 0x69d   :  { %8327 = vmatprep.mubr.msk.f32.mxu1 %vm9539_vm4, %v9540_v13  ;;  %8345 = vmatpush3.msra.mxu1 %v2523_v51  ;;  %v10651_v51 = vld [vmem:[%s11979_s14] ss:$0 sm:$0xff] }
 0x69e   :  { %8995 = vmatprep.subr.bf16.mxu1 %v9538_v9 }
 0x69f   :  { %v2411_v61 = vpop.f32.mrb[62].mxu0 }
 0x6a0   :  { %v2325_v21 = vpop.f32.mrb[52].mxu1  ;;  %v8245_v10 = vpop.f32.mrb[63].mxu0  ;;  %8336 = vmatmul.mubr.msk.f32.vlgmr.msra.gmra.mrb[86].mxu0 %vm785_vm6, %v2411_v61 }
 0x6a1   :  { %v8233_v1 = vpop.f32.mrb[53].mxu1  ;;  %8328 = vmatmul.mubr.msk.f32.gmra.mrb[76].mxu1 %vm785_vm6, %v2325_v21  ;;  %8338 = vmatprep.mubr.msk.f32.mxu0 %vm9539_vm4, %v9540_v13 }
 0x6a2   :  { %8330 = vmatprep.mubr.msk.f32.mxu1 %vm9539_vm4, %v9540_v13 }
 0x6a3   :  { %v2416_v63 = vpop.f32.mrb[64].mxu0 }
 0x6a4   :  { %v2330_v14 = vpop.f32.mrb[54].mxu1  ;;  %v8248_v62 = vpop.f32.mrb[65].mxu0  ;;  %8339 = vmatmul.mubr.msk.f32.gmra.mrb[88].mxu0 %vm785_vm6, %v2416_v63 }
 0x6a5   :  { %v8236_v33 = vpop.f32.mrb[55].mxu1  ;;  %8331 = vmatmul.mubr.msk.f32.gmra.mrb[78].mxu1 %vm785_vm6, %v2330_v14  ;;  %8341 = vmatprep.mubr.msk.f32.mxu0 %vm9539_vm4, %v9540_v13 }
 0x6a6   :  { %8346 = vmatprep.mubr.msk.f32.mxu1 %vm9539_vm4, %v9540_v13 }
 0x6a8   :  { %v2421_v49 = vpop.f32.mrb[66].mxu0 }
 0x6a9   :  { %v8251_v18 = vpop.f32.mrb[67].mxu0  ;;  %8342 = vmatmul.mubr.msk.f32.gmra.mrb[90].mxu0 %vm785_vm6, %v2421_v49 }
 0x6aa   :  { %8363 = vmatprep.mubr.msk.f32.mxu0 %vm9539_vm4, %v9540_v13 }
 0x6d7   :  { %v2502_v19 = vpop.f32.mrb[56].mxu1 }
 0x6d8   :  { %v8260_v20 = vpop.f32.mrb[57].mxu1  ;;  %8347 = vmatmul.mubr.msk.f32.vlgmr.msra.gmra.mrb[80].mxu1 %vm785_vm6, %v2502_v19 }
 0x6d9   :  { %8349 = vmatprep.mubr.msk.f32.mxu1 %vm9539_vm4, %v9540_v13 }
 0x6db   :  { %v2507_v44 = vpop.f32.mrb[58].mxu1 }
 0x6dc   :  { %v8263_v22 = vpop.f32.mrb[59].mxu1  ;;  %8350 = vmatmul.mubr.msk.f32.gmra.mrb[82].mxu1 %vm785_vm6, %v2507_v44 }
 0x6dd   :  { %8352 = vmatprep.mubr.msk.f32.mxu1 %vm9539_vm4, %v9540_v13 }
 0x6df   :  { %v2512_v29 = vpop.f32.mrb[60].mxu1 }
 0x6e0   :  { %v8266_v27 = vpop.f32.mrb[61].mxu1  ;;  %8353 = vmatmul.mubr.msk.f32.gmra.mrb[84].mxu1 %vm785_vm6, %v2512_v29 }
 0x6e1   :  { %8410 = vmatprep.mubr.msk.f32.mxu1 %vm9539_vm4, %v9540_v13 }
 0x712   :  { %v2599_v32 = vpop.f32.mrb[68].mxu0 }
 0x713   :  { %v8271_v4 = vpop.f32.mrb[69].mxu0  ;;  %v3236_v58 = vsel %vm224_vm1, %v2599_v32, 0.0 }
 0x716   :  { %v2604_v36 = vpop.f32.mrb[70].mxu0 }
 0x717   :  { %v8274_v54 = vpop.f32.mrb[71].mxu0  ;;  %v3243_v3 = vsel %vm224_vm1, %v2604_v36, 0.0 }
 0x71a   :  { %v2609_v15 = vpop.f32.mrb[72].mxu0 }
 0x71b   :  { %v8277_v7 = vpop.f32.mrb[73].mxu0  ;;  %v3251_v43 = vsel %vm3250_vm10, %v2609_v15, 0.0 }
 0x751   :  { %v2688_v2 = vpop.f32.mrb[62].mxu1 }
 0x752   :  { %v3237_v45 = vsel %vm224_vm1, %v2688_v2, 0.0  ;;  %v8282_v59 = vpop.f32.mrb[63].mxu1 }
 0x753   :  { %v3238_v28 = vadd.f32 %v3237_v45, %v3236_v58  ;;  %v2777_v37 = vpop.f32.mrb[74].mxu0 }
 0x754   :  { %v3239_v17 = vsel %vm224_vm1, %v2777_v37, 0.0  ;;  %v8293_v47 = vpop.f32.mrb[75].mxu0 }
 0x755   :  { %v3240_v12 = vadd.f32 %v3239_v17, %v3238_v28 }
 0x757   :  { %v2693_v46 = vpop.f32.mrb[64].mxu1 }
 0x758   :  { %v3244_v16 = vsel %vm224_vm1, %v2693_v46, 0.0  ;;  %v8285_v31 = vpop.f32.mrb[65].mxu1 }
 0x759   :  { %v3245_v24 = vadd.f32 %v3244_v16, %v3243_v3 }
 0x75b   :  { %v2782_v60 = vpop.f32.mrb[76].mxu0 }
 0x75c   :  { %v2698_v50 = vpop.f32.mrb[66].mxu1  ;;  %v3246_v5 = vsel %vm224_vm1, %v2782_v60, 0.0  ;;  %v8296_v25 = vpop.f32.mrb[77].mxu0 }
 0x75d   :  { %v3252_v57 = vsel %vm3250_vm10, %v2698_v50, 0.0  ;;  %v3247_v11 = vadd.f32 %v3246_v5, %v3245_v24  ;;  %v8288_v8 = vpop.f32.mrb[67].mxu1 }
 0x75e   :  { %v3253_v56 = vadd.f32 %v3252_v57, %v3251_v43 }
 0x75f   :  { %v2787_v53 = vpop.f32.mrb[78].mxu0 }
 0x760   :  { %v3254_v35 = vsel %vm3250_vm10, %v2787_v53, 0.0  ;;  %v2866_v38 = vpop.f32.mrb[68].mxu1  ;;  %v8299_v41 = vpop.f32.mrb[79].mxu0 }
 0x761   :  { %v3255_v6 = vadd.f32 %v3254_v35, %v3253_v56  ;;  %v3241_v0 = vsel %vm224_vm1, %v2866_v38, 0.0  ;;  %v8304_v26 = vpop.f32.mrb[69].mxu1 }
 0x762   :  { %v3242_v48 = vadd.f32 %v3241_v0, %v3240_v12 }
 0x763   :  { %v2955_v55 = vpop.f32.mrb[80].mxu0 }
 0x764   :  { %v3291_v52 = vadd.f32 %v3242_v48, %v9718_v23  ;;  %v2871_v61 = vpop.f32.mrb[70].mxu1  ;;  %v8315_v21 = vpop.f32.mrb[81].mxu0  ;;  %v3258_v4 = vsel %vm224_vm1, %v2955_v55, 0.0 }
 0x765   :  { %v3248_v10 = vsel %vm224_vm1, %v2871_v61, 0.0  ;;  %v8307_v1 = vpop.f32.mrb[71].mxu1 }
 0x766   :  { %v3249_v63 = vadd.f32 %v3248_v10, %v3247_v11  ;;  %v10656_v14 = vadd.f32 %v10651_v51, %v3291_v52 }
 0x768   :  { %v3292_v62 = vadd.f32 %v3249_v63, %v9729_v30  ;;  %v2876_v33 = vpop.f32.mrb[72].mxu1  ;;  %v2960_v49 = vpop.f32.mrb[82].mxu0  ;;  %v3310_v18 = vsel %vm224_vm1, %v10656_v14, 0.0 }
 0x769   :  { %v3256_v19 = vsel %vm3250_vm10, %v2876_v33, 0.0  ;;  %v8318_v20 = vpop.f32.mrb[83].mxu0  ;;  %3311 = vadd.xlane.f32.xlu1 %v3310_v18  ;;  %v8310_v23 = vpop.f32.mrb[73].mxu1  ;;  %v3265_v59 = vsel %vm224_vm1, %v2960_v49, 0.0 }
 0x76a   :  { %v10663_v44 = vadd.f32 %v10651_v51, %v3292_v62  ;;  %v3257_v22 = vadd.f32 %v3256_v19, %v3255_v6 }
 0x76c   :  { %v2965_v29 = vpop.f32.mrb[84].mxu0  ;;  %v3313_v27 = vsel %vm224_vm1, %v10663_v44, 0.0 }
 0x76d   :  { %v8321_v32 = vpop.f32.mrb[85].mxu0  ;;  %3314 = vadd.xlane.f32.xlu0 %v3313_v27  ;;  %v3272_v31 = vsel %vm3250_vm10, %v2965_v29, 0.0 }
 0x76f   :  { %v3044_v30 = vpop.f32.mrb[74].mxu1 }
 0x770   :  { %v3259_v36 = vsel %vm224_vm1, %v3044_v30, 0.0  ;;  %v8326_v54 = vpop.f32.mrb[75].mxu1 }
 0x771   :  { %v3260_v15 = vadd.f32 %v3259_v36, %v3258_v4 }
 0x773   :  { %v3133_v7 = vpop.f32.mrb[86].mxu0 }
 0x774   :  { %v3261_v2 = vsel %vm224_vm1, %v3133_v7, 0.0  ;;  %v3049_v58 = vpop.f32.mrb[76].mxu1  ;;  %v8337_v45 = vpop.f32.mrb[87].mxu0  ;;  %v3397_v7 = vld [vmem:[%s11982_s17] sm:$0xff] }
 0x775   :  { %v3262_v28 = vadd.f32 %v3261_v2, %v3260_v15  ;;  %v3266_v37 = vsel %vm224_vm1, %v3049_v58, 0.0  ;;  %v8329_v17 = vpop.f32.mrb[77].mxu1  ;;  %v3398_v2 = vld [vmem:[%s11982_s17 + $0x8] sm:$0xff]  ;;  %v3399_v45 = vld [vmem:[%s11982_s17 + $0x10] sm:$0xff] }
 0x776   :  { %v3267_v47 = vadd.f32 %v3266_v37, %v3265_v59  ;;  %v8990_v58 = vpack.c.bf16 %v3398_v2, %v3397_v7  ;;  %v3400_v59 = vld [vmem:[%s11982_s17 + $0x18] sm:$0xff] }
 0x777   :  { %v3138_v12 = vpop.f32.mrb[88].mxu0 }
 0x778   :  { %v3268_v46 = vsel %vm224_vm1, %v3138_v12, 0.0  ;;  %v3054_v3 = vpop.f32.mrb[78].mxu1  ;;  %v8340_v16 = vpop.f32.mrb[89].mxu0  ;;  %8991 = vmatpush3.bf16.msra.mxu0 %v8990_v58 }
 0x779   :  { %v3269_v24 = vadd.f32 %v3268_v46, %v3267_v47  ;;  %v3273_v60 = vsel %vm3250_vm10, %v3054_v3, 0.0  ;;  %v8332_v50 = vpop.f32.mrb[79].mxu1  ;;  %8992 = vmatprep.subr.bf16.mxu0 %v9538_v9 }
 0x77a   :  { %v3274_v5 = vadd.f32 %v3273_v60, %v3272_v31 }
 0x77c   :  { %v3143_v25 = vpop.f32.mrb[90].mxu0 }
 0x77d   :  { %v3275_v43 = vsel %vm3250_vm10, %v3143_v25, 0.0  ;;  %v8343_v57 = vpop.f32.mrb[91].mxu0 }
 0x77e   :  { %v3276_v11 = vadd.f32 %v3275_v43, %v3274_v5 }
 0x7ab   :  { %v3222_v8 = vpop.f32.mrb[80].mxu1 }
 0x7ac   :  { %v3263_v56 = vsel %vm224_vm1, %v3222_v8, 0.0  ;;  %v8348_v53 = vpop.f32.mrb[81].mxu1  ;;  %v3539_v8 = vld [vmem:[%s11984_s19 + $0x8] sm:$0xff] }
 0x7ad   :  { %v3264_v35 = vadd.f32 %v3263_v56, %v3262_v28  ;;  %v8993_v28 = vpack.c.bf16 %v3400_v59, %v3399_v45  ;;  %v3540_v56 = vld [vmem:[%s11984_s19 + $0x10] sm:$0xff] }
 0x7af   :  { %v3282_v38 = vrot.slane %v3264_v35, 7  ;;  %v3227_v41 = vpop.f32.mrb[82].mxu1  ;;  %8994 = vmatpush3.bf16.msra.mxu0 %v8993_v28  ;;  %v3541_v35 = vld [vmem:[%s11984_s19 + $0x18] sm:$0xff] }
 0x7b0   :  { %v3270_v6 = vsel %vm224_vm1, %v3227_v41, 0.0  ;;  %v8351_v0 = vpop.f32.mrb[83].mxu1  ;;  %9019 = vmatprep.subr.bf16.mxu0 %v9538_v9  ;;  %v3542_v41 = vld [vmem:[%s11984_s19 + $0x20] sm:$0xff] }
 0x7b1   :  { %v3290_v26 = vsel %vm207_vm2, %v3257_v22, %v3282_v38  ;;  %v3271_v48 = vadd.f32 %v3270_v6, %v3269_v24  ;;  %v3543_v6 = vld [vmem:[%s11984_s19 + $0x28] sm:$0xff] }
 0x7b2   :  { %v3293_v55 = vadd.f32 %v3290_v26, %v9739_v40  ;;  %v9002_v0 = vpack.c.bf16 %v3543_v6, %v3542_v41 }
 0x7b3   :  { %v3283_v52 = vrot.slane %v3271_v48, 7  ;;  %v3232_v61 = vpop.f32.mrb[84].mxu1 }
 0x7b4   :  { %v3277_v21 = vsel %vm3250_vm10, %v3232_v61, 0.0  ;;  %v8354_v10 = vpop.f32.mrb[85].mxu1  ;;  %v10682_v1 = vadd.f32 %v10651_v51, %v3293_v55 }
 0x7b5   :  { %v3284_v63 = vsel %vm207_vm2, %v3282_v38, %v3283_v52  ;;  %v3278_v62 = vadd.f32 %v3277_v21, %v3276_v11  ;;  %v3538_v11 = vld [vmem:[%s11984_s19] sm:$0xff]  ;;  %v8999_v38 = vpack.c.bf16 %v3541_v35, %v3540_v56  ;;  %v3552_v56 = vld [vmem:[%s11984_s19 + $0x70] sm:$0xff] }
 0x7b6   :  { %v3294_v33 = vadd.f32 %v3284_v63, %v9744_v42  ;;  %v3316_v49 = vsel %vm224_vm1, %v10682_v1, 0.0  ;;  %v8996_v53 = vpack.c.bf16 %v3539_v8, %v3538_v11  ;;  %v7358_v63 = vld [vmem:[%s11980_s15] ss:$0 sm:$0xff]  ;;  %v3551_v11 = vld [vmem:[%s11984_s19 + $0x68] sm:$0xff] }
 0x7b7   :  { %v3285_v18 = vrot.slane %v3278_v62, 7  ;;  %3317 = vadd.xlane.f32.xlu1 %v3316_v49 }
 0x7b8   :  { %v10689_v40 = vadd.f32 %v10651_v51, %v3294_v33  ;;  %8997 = vmatpush3.bf16.msra.mxu1 %v8996_v53  ;;  %v7359_v33 = vld [vmem:[%s11981_s16] ss:$0 sm:$0xff]  ;;  %v3553_v53 = vld [vmem:[%s11984_s19 + $0x78] sm:$0xff] }
 0x7b9   :  { %v3286_v19 = vsel %vm207_vm2, %v3283_v52, %v3285_v18  ;;  %8998 = vmatprep.subr.bf16.mxu1 %v9538_v9  ;;  %v9017_v35 = vpack.c.bf16 %v3553_v53, %v3552_v56 }
 0x7ba   :  { %v3295_v20 = vadd.f32 %v3286_v19, %v9736_v39  ;;  %v3319_v23 = vsel %vm224_vm1, %v10689_v40, 0.0 }
 0x7bb   :  { %3320 = vadd.xlane.f32.xlu1 %v3319_v23 }
 0x7bc   :  { %v10696_v22 = vadd.f32 %v10651_v51, %v3295_v20  ;;  %9000 = vmatpush3.bf16.msra.mxu1 %v8999_v38  ;;  %v7360_v38 = vld [vmem:[%s11983_s18] ss:$0 sm:$0xff] }
 0x7bd   :  { %9001 = vmatprep.subr.bf16.mxu1 %v9538_v9 }
 0x7be   :  { %v3322_v42 = vsel %vm237_vm3, %v10696_v22, 0.0 }
 0x7bf   :  { %3323 = vadd.xlane.f32.xlu1 %v3322_v42 }
 0x7c0   :  { %9003 = vmatpush3.bf16.msra.mxu1 %v9002_v0 }
 0x7c1   :  { %9004 = vmatprep.subr.bf16.mxu1 %v9538_v9 }
 0x7f6   :  { %v3312_v29 = vpop.xlane.xlu1 %3311 }
 0x7f7   :  { %v3325_v27 = vmul.f32 0.03125, %v3312_v29 }
 0x7f9   :  { %v10701_v32 = vsub.f32 %v10656_v14, %v3325_v27 }
 0x7fa   :  { %v3315_v30 = vpop.xlane.xlu0 %3314 }
 0x7fb   :  { %v3326_v4 = vmul.f32 0.03125, %v3315_v30  ;;  %v3335_v39 = vmul.f32 %v10701_v32, %v10701_v32 }
 0x7fd   :  { %v10706_v36 = vsub.f32 %v10663_v44, %v3326_v4  ;;  %v3340_v51 = vsel %vm224_vm1, %v3335_v39, 0.0 }
 0x7fe   :  { %3341 = vadd.xlane.f32.xlu1 %v3340_v51 }
 0x7ff   :  { %v3336_v54 = vmul.f32 %v10706_v36, %v10706_v36 }
 0x801   :  { %v3343_v15 = vsel %vm224_vm1, %v3336_v54, 0.0 }
 0x802   :  { %3344 = vadd.xlane.f32.xlu0 %v3343_v15 }
 0x844   :  { %v3318_v37 = vpop.xlane.xlu1 %3317 }
 0x845   :  { %v3327_v17 = vmul.f32 0.03125, %v3318_v37 }
 0x847   :  { %v10727_v47 = vsub.f32 %v10682_v1, %v3327_v17 }
 0x848   :  { %v3321_v12 = vpop.xlane.xlu1 %3320 }
 0x849   :  { %v3328_v46 = vmul.f32 0.03125, %v3321_v12  ;;  %v3337_v3 = vmul.f32 %v10727_v47, %v10727_v47 }
 0x84b   :  { %v10732_v16 = vsub.f32 %v10689_v40, %v3328_v46  ;;  %v3346_v31 = vsel %vm224_vm1, %v3337_v3, 0.0  ;;  %v3545_v3 = vld [vmem:[%s11984_s19 + $0x38] sm:$0xff] }
 0x84c   :  { %3347 = vadd.xlane.f32.xlu1 %v3346_v31  ;;  %v3324_v24 = vpop.xlane.xlu1 %3323 }
 0x84d   :  { %v3329_v60 = vmul.f32 0.03125, %v3324_v24  ;;  %v3338_v50 = vmul.f32 %v10732_v16, %v10732_v16  ;;  %v3546_v24 = vld [vmem:[%s11984_s19 + $0x40] sm:$0xff] }
 0x84f   :  { %v10738_v5 = vsub.f32 %v10696_v22, %v3329_v60  ;;  %v3349_v25 = vsel %vm224_vm1, %v3338_v50, 0.0  ;;  %v3547_v60 = vld [vmem:[%s11984_s19 + $0x48] sm:$0xff] }
 0x850   :  { %3350 = vadd.xlane.f32.xlu0 %v3349_v25  ;;  %v9008_v50 = vpack.c.bf16 %v3547_v60, %v3546_v24  ;;  %v3549_v25 = vld [vmem:[%s11984_s19 + $0x58] sm:$0xff] }
 0x851   :  { %v3339_v43 = vmul.f32 %v10738_v5, %v10738_v5 }
 0x853   :  { %v3352_v57 = vsel %vm237_vm3, %v3339_v43, 0.0 }
 0x854   :  { %3353 = vadd.xlane.f32.xlu1 %v3352_v57  ;;  %v3550_v57 = vld [vmem:[%s11984_s19 + $0x60] sm:$0xff] }
 0x855   :  { %v9014_v8 = vpack.c.bf16 %v3551_v11, %v3550_v57 }
 0x88b   :  { %v3342_v26 = vpop.xlane.xlu1 %3341 }
 0x88c   :  { %v3355_v48 = vmul.f32 0.03125, %v3342_v26 }
 0x88e   :  { %v3360_v55 = vadd.f32 1e-06, %v3355_v48 }
 0x88f   :  { %v3345_v52 = vpop.xlane.xlu0 %3344 }
 0x890   :  { %9366 = vrsqrt.f32 %v3360_v55  ;;  %v3356_v61 = vmul.f32 0.03125, %v3345_v52 }
 0x892   :  { %v3361_v21 = vadd.f32 1e-06, %v3356_v61 }
 0x894   :  { %9368 = vrsqrt.f32 %v3361_v21 }
 0x89a   :  { %v9367_v10 = vpop.eup %9366 }
 0x89b   :  { %v3370_v62 = vmul.f32 %v9367_v10, %v10701_v32 }
 0x89d   :  { %v3381_v49 = vmul.f32 %v7358_v63, %v3370_v62 }
 0x89e   :  { %v9369_v18 = vpop.eup %9368 }
 0x89f   :  { %v3392_v19 = vadd.f32 %v7359_v33, %v3381_v49  ;;  %v3371_v20 = vmul.f32 %v9369_v18, %v10706_v36 }
 0x8a1   :  { %8364 = vmatmul.mubr.msk.f32.vlgmr.msra.gmra.mrb[92].mxu0 %vm224_vm1, %v3392_v19  ;;  %v3382_v23 = vmul.f32 %v7358_v63, %v3371_v20 }
 0x8a2   :  { %8366 = vmatprep.mubr.msk.f32.mxu0 %vm9539_vm4, %v9540_v13 }
 0x8a3   :  { %v3393_v42 = vadd.f32 %v7359_v33, %v3382_v23 }
 0x8a5   :  { %8367 = vmatmul.mubr.msk.f32.gmra.mrb[94].mxu0 %vm224_vm1, %v3393_v42 }
 0x8a6   :  { %8369 = vmatprep.mubr.msk.f32.mxu0 %vm9539_vm4, %v9540_v13 }
 0x8d9   :  { %v3348_v29 = vpop.xlane.xlu1 %3347 }
 0x8da   :  { %v3357_v27 = vmul.f32 0.03125, %v3348_v29 }
 0x8dc   :  { %v3362_v32 = vadd.f32 1e-06, %v3357_v27 }
 0x8dd   :  { %v3351_v30 = vpop.xlane.xlu0 %3350 }
 0x8de   :  { %9370 = vrsqrt.f32 %v3362_v32  ;;  %v3358_v4 = vmul.f32 0.03125, %v3351_v30 }
 0x8e0   :  { %v3363_v39 = vadd.f32 1e-06, %v3358_v4 }
 0x8e1   :  { %v3354_v36 = vpop.xlane.xlu1 %3353 }
 0x8e2   :  { %9372 = vrsqrt.f32 %v3363_v39  ;;  %v3359_v51 = vmul.f32 0.03125, %v3354_v36 }
 0x8e4   :  { %v3364_v54 = vadd.f32 1e-06, %v3359_v51 }
 0x8e6   :  { %9374 = vrsqrt.f32 %v3364_v54 }
 0x8e8   :  { %v9371_v15 = vpop.eup %9370 }
 0x8e9   :  { %v3372_v7 = vmul.f32 %v9371_v15, %v10727_v47  ;;  %v3544_v47 = vld [vmem:[%s11984_s19 + $0x30] sm:$0xff] }
 0x8eb   :  { %v3383_v2 = vmul.f32 %v7358_v63, %v3372_v7 }
 0x8ec   :  { %v9373_v58 = vpop.eup %9372 }
 0x8ed   :  { %v3394_v45 = vadd.f32 %v7359_v33, %v3383_v2  ;;  %v3373_v59 = vmul.f32 %v9373_v58, %v10732_v16  ;;  %v9005_v16 = vpack.c.bf16 %v3545_v3, %v3544_v47 }
 0x8ef   :  { %8370 = vmatmul.mubr.msk.f32.gmra.mrb[96].mxu0 %vm224_vm1, %v3394_v45  ;;  %v3384_v28 = vmul.f32 %v7358_v63, %v3373_v59  ;;  %9006 = vmatpush3.bf16.msra.mxu1 %v9005_v16  ;;  %v7366_v16 = vld [vmem:[%s11985_s20] ss:$0 sm:$0xff] }
 0x8f0   :  { %v9375_v37 = vpop.eup %9374  ;;  %8372 = vmatprep.mubr.msk.f32.mxu0 %vm9539_vm4, %v9540_v13  ;;  %9007 = vmatprep.subr.bf16.mxu1 %v9538_v9 }
 0x8f1   :  { %v3395_v17 = vadd.f32 %v7359_v33, %v3384_v28  ;;  %v3374_v12 = vmul.f32 %v9375_v37, %v10738_v5  ;;  %v3548_v5 = vld [vmem:[%s11984_s19 + $0x50] sm:$0xff] }
 0x8f2   :  { %v9011_v43 = vpack.c.bf16 %v3549_v25, %v3548_v5 }
 0x8f3   :  { %8373 = vmatmul.mubr.msk.f32.gmra.mrb[98].mxu0 %vm224_vm1, %v3395_v17  ;;  %v3385_v46 = vmul.f32 %v7358_v63, %v3374_v12  ;;  %9009 = vmatpush3.bf16.msra.mxu1 %v9008_v50 }
 0x8f4   :  { %8375 = vmatprep.mubr.msk.f32.mxu0 %vm9539_vm4, %v9540_v13  ;;  %9010 = vmatprep.subr.bf16.mxu1 %v9538_v9 }
 0x8f5   :  { %v3396_v31 = vadd.f32 %v7359_v33, %v3385_v46 }
 0x8f7   :  { %8376 = vmatmul.mubr.msk.f32.gmra.mrb[100].mxu0 %vm224_vm1, %v3396_v31  ;;  %9012 = vmatpush3.bf16.msra.mxu1 %v9011_v43 }
 0x8f8   :  { %8433 = vmatprep.mubr.msk.f32.mxu0 %vm9539_vm4, %v9540_v13  ;;  %9013 = vmatprep.subr.bf16.mxu1 %v9538_v9 }
 0x8fb   :  { %9015 = vmatpush3.bf16.msra.mxu1 %v9014_v8 }
 0x8fc   :  { %9016 = vmatprep.subr.bf16.mxu1 %v9538_v9 }
 0x8ff   :  { %9018 = vmatpush3.bf16.msra.mxu1 %v9017_v35 }
 0x900   :  { %9031 = vmatprep.subr.bf16.mxu1 %v9538_v9 }
 0x974   :  { %v3489_v41 = vpop.f32.mrb[92].mxu0 }
 0x975   :  { %v3490_v6 = vadd.f32 %v7360_v38, %v3489_v41  ;;  %v8365_v0 = vpop.f32.mrb[93].mxu0 }
 0x977   :  { %v3518_v26 = vmul.f32 0.70710677, %v3490_v6  ;;  %v3513_v10 = vmul.f32 0.5, %v3490_v6 }
 0x978   :  { %v3494_v48 = vpop.f32.mrb[94].mxu0 }
 0x979   :  { %9376 = verf.f32 %v3518_v26  ;;  %v3495_v55 = vadd.f32 %v7360_v38, %v3494_v48  ;;  %v8368_v52 = vpop.f32.mrb[95].mxu0 }
 0x97b   :  { %v3519_v61 = vmul.f32 0.70710677, %v3495_v55  ;;  %v3514_v49 = vmul.f32 0.5, %v3495_v55 }
 0x97d   :  { %9378 = verf.f32 %v3519_v61 }
 0x983   :  { %v9377_v21 = vpop.eup %9376 }
 0x984   :  { %v3528_v63 = vadd.f32 1.0, %v9377_v21 }
 0x986   :  { %v3533_v62 = vmul.f32 %v3528_v63, %v3513_v10 }
 0x987   :  { %v9379_v33 = vpop.eup %9378 }
 0x988   :  { %v3529_v18 = vadd.f32 1.0, %v9379_v33  ;;  %8411 = vmatmul.mubr.f32.vlgmr.msra.gmra.mrb[86].mxu1 %v3533_v62 }
 0x989   :  { %8413 = vmatprep.mubr.msk.f32.mxu1 %vm9539_vm4, %v9540_v13 }
 0x98a   :  { %v3534_v19 = vmul.f32 %v3529_v18, %v3514_v49 }
 0x98c   :  { %8414 = vmatmul.mubr.f32.gmra.mrb[88].mxu1 %v3534_v19  ;;  %v7371_v19 = vld [vmem:[%s12018_s27 + $0x20] sm:$0xff] }
 0x98d   :  { %8416 = vmatprep.mubr.msk.f32.mxu1 %vm9539_vm4, %v9540_v13 }
 0x9c2   :  { %v3499_v20 = vpop.f32.mrb[96].mxu0 }
 0x9c3   :  { %v3500_v23 = vadd.f32 %v7360_v38, %v3499_v20  ;;  %v8371_v42 = vpop.f32.mrb[97].mxu0  ;;  %v7372_v20 = vld [vmem:[%s12018_s27 + $0x28] sm:$0xff] }
 0x9c4   :  { %v9020_v42 = vpack.c.bf16 %v7372_v20, %v7371_v19 }
 0x9c5   :  { %v3520_v29 = vmul.f32 0.70710677, %v3500_v23  ;;  %v3515_v7 = vmul.f32 0.5, %v3500_v23  ;;  %v7393_v23 = vld [vmem:[%s11976_s11 + $0x20] sm:$0xff] }
 0x9c6   :  { %v3504_v27 = vpop.f32.mrb[98].mxu0  ;;  %9021 = vmatpush3.bf16.msra.mxu0 %v9020_v42 }
 0x9c7   :  { %9380 = verf.f32 %v3520_v29  ;;  %v3505_v32 = vadd.f32 %v7360_v38, %v3504_v27  ;;  %v8374_v30 = vpop.f32.mrb[99].mxu0  ;;  %v7394_v29 = vld [vmem:[%s11976_s11 + $0x28] sm:$0xff]  ;;  %9022 = vmatprep.subr.bf16.mxu0 %v9538_v9 }
 0x9c8   :  { %v9032_v27 = vpack.c.bf16 %v7394_v29, %v7393_v23  ;;  %v7374_v30 = vld [vmem:[%s12018_s27 + $0x38] sm:$0xff] }
 0x9c9   :  { %v3521_v4 = vmul.f32 0.70710677, %v3505_v32  ;;  %v3516_v59 = vmul.f32 0.5, %v3505_v32  ;;  %v7373_v32 = vld [vmem:[%s12018_s27 + $0x30] sm:$0xff] }
 0x9ca   :  { %v3509_v39 = vpop.f32.mrb[100].mxu0  ;;  %9033 = vmatpush3.bf16.msra.mxu1 %v9032_v27 }
 0x9cb   :  { %9382 = verf.f32 %v3521_v4  ;;  %v3510_v36 = vadd.f32 %v7360_v38, %v3509_v39  ;;  %v8377_v51 = vpop.f32.mrb[101].mxu0  ;;  %v7395_v4 = vld [vmem:[%s11976_s11 + $0x30] sm:$0xff]  ;;  %9034 = vmatprep.subr.bf16.mxu1 %v9538_v9  ;;  %v9023_v39 = vpack.c.bf16 %v7374_v30, %v7373_v32 }
 0x9cd   :  { %v3522_v54 = vmul.f32 0.70710677, %v3510_v36  ;;  %v3517_v12 = vmul.f32 0.5, %v3510_v36  ;;  %v7396_v36 = vld [vmem:[%s11976_s11 + $0x38] sm:$0xff]  ;;  %9024 = vmatpush3.bf16.msra.mxu0 %v9023_v39 }
 0x9ce   :  { %v9035_v51 = vpack.c.bf16 %v7396_v36, %v7395_v4  ;;  %9025 = vmatprep.subr.bf16.mxu0 %v9538_v9 }
 0x9cf   :  { %9384 = verf.f32 %v3522_v54 }
 0x9d0   :  { %9036 = vmatpush3.bf16.msra.mxu1 %v9035_v51 }
 0x9d1   :  { %v9381_v15 = vpop.eup %9380  ;;  %9041 = vmatprep.subr.bf16.mxu1 %v9538_v9 }
 0x9d2   :  { %v3530_v2 = vadd.f32 1.0, %v9381_v15 }
 0x9d4   :  { %v3535_v58 = vmul.f32 %v3530_v2, %v3515_v7 }
 0x9d5   :  { %v9383_v45 = vpop.eup %9382 }
 0x9d6   :  { %v3531_v28 = vadd.f32 1.0, %v9383_v45  ;;  %8417 = vmatmul.mubr.f32.gmra.mrb[90].mxu1 %v3535_v58 }
 0x9d7   :  { %8419 = vmatprep.mubr.msk.f32.mxu1 %vm9539_vm4, %v9540_v13 }
 0x9d8   :  { %v3536_v37 = vmul.f32 %v3531_v28, %v3516_v59 }
 0x9d9   :  { %v9385_v17 = vpop.eup %9384 }
 0x9da   :  { %v3532_v46 = vadd.f32 1.0, %v9385_v17  ;;  %8420 = vmatmul.mubr.f32.gmra.mrb[92].mxu1 %v3536_v37 }
 0x9db   :  { %8422 = vmatprep.mubr.msk.f32.mxu1 %vm9539_vm4, %v9540_v13 }
 0x9dc   :  { %v3537_v47 = vmul.f32 %v3532_v46, %v3517_v12 }
 0x9de   :  { %8423 = vmatmul.mubr.f32.gmra.mrb[94].mxu1 %v3537_v47 }
 0x9df   :  { %8479 = vmatprep.mubr.msk.f32.mxu1 %vm9539_vm4, %v9540_v13 }
 0xa5b   :  { %v3620_v3 = vpop.f32.mrb[86].mxu1 }
 0xa5c   :  { %v3644_v31 = vadd.f32 %v3620_v3, %v10656_v14  ;;  %v8412_v24 = vpop.f32.mrb[87].mxu1 }
 0xa5e   :  { %v10843_v60 = vadd.f32 %v7366_v16, %v3644_v31 }
 0xa5f   :  { %v3625_v50 = vpop.f32.mrb[88].mxu1 }
 0xa60   :  { %v3645_v5 = vadd.f32 %v3625_v50, %v10663_v44  ;;  %v8415_v25 = vpop.f32.mrb[89].mxu1  ;;  %v3665_v43 = vsel %vm224_vm1, %v10843_v60, 0.0 }
 0xa61   :  { %3666 = vadd.xlane.f32.xlu0 %v3665_v43 }
 0xa62   :  { %v10848_v57 = vadd.f32 %v7366_v16, %v3645_v5 }
 0xa64   :  { %v3668_v11 = vsel %vm224_vm1, %v10848_v57, 0.0 }
 0xa65   :  { %3669 = vadd.xlane.f32.xlu1 %v3668_v11 }
 0xaa9   :  { %v3630_v8 = vpop.f32.mrb[90].mxu1 }
 0xaaa   :  { %v3646_v14 = vadd.f32 %v3630_v8, %v10682_v1  ;;  %v8418_v56 = vpop.f32.mrb[91].mxu1  ;;  %v7369_v8 = vld [vmem:[%s12019_s7 + $0x1] ss:$0 sm:$0xff] }
 0xaab   :  { %v7370_v56 = vld [vmem:[%s12021_s9 + $0x1] ss:$0 sm:$0xff] }
 0xaac   :  { %v10853_v53 = vadd.f32 %v7366_v16, %v3646_v14 }
 0xaad   :  { %v3635_v35 = vpop.f32.mrb[92].mxu1 }
 0xaae   :  { %v3647_v44 = vadd.f32 %v3635_v35, %v10689_v40  ;;  %v8421_v38 = vpop.f32.mrb[93].mxu1  ;;  %v3671_v41 = vsel %vm224_vm1, %v10853_v53, 0.0  ;;  %v7382_v35 = vld [vmem:[%s12020_s26 + $0x20] sm:$0xff] }
 0xaaf   :  { %3672 = vadd.xlane.f32.xlu0 %v3671_v41 }
 0xab0   :  { %v10858_v6 = vadd.f32 %v7366_v16, %v3647_v44  ;;  %v7383_v44 = vld [vmem:[%s12020_s26 + $0x28] sm:$0xff] }
 0xab1   :  { %v3640_v0 = vpop.f32.mrb[94].mxu1 }
 0xab2   :  { %v3648_v26 = vadd.f32 %v3640_v0, %v10696_v22  ;;  %v8424_v48 = vpop.f32.mrb[95].mxu1  ;;  %v3674_v1 = vsel %vm224_vm1, %v10858_v6, 0.0 }
 0xab3   :  { %3675 = vadd.xlane.f32.xlu1 %v3674_v1  ;;  %v9026_v48 = vpack.c.bf16 %v7383_v44, %v7382_v35  ;;  %v7384_v1 = vld [vmem:[%s12020_s26 + $0x30] sm:$0xff] }
 0xab4   :  { %v10863_v55 = vadd.f32 %v7366_v16, %v3648_v26 }
 0xab6   :  { %v3677_v40 = vsel %vm237_vm3, %v10863_v55, 0.0 }
 0xab7   :  { %3678 = vadd.xlane.f32.xlu0 %v3677_v40  ;;  %v7385_v40 = vld [vmem:[%s12020_s26 + $0x38] sm:$0xff]  ;;  %s7220_s26 = sshll.u32 %s9544_s3, 4  ;;  %s7221_s26 = int_to_ptr.vmem [resolvable:$true] %s7220_s26 }
 0xab8   :  { %p9519_p1 = scmp.lt.s32.totalorder %s7221_s26, %s7221_s26 }
 0xaee   :  { %v3667_v52 = vpop.xlane.xlu0 %3666 }
 0xaef   :  { %v3680_v61 = vmul.f32 0.03125, %v3667_v52 }
 0xaf1   :  { %v3685_v21 = vsub.f32 %v10843_v60, %v3680_v61 }
 0xaf2   :  { %v3670_v10 = vpop.xlane.xlu1 %3669 }
 0xaf3   :  { %v3681_v63 = vmul.f32 0.03125, %v3670_v10  ;;  %v3690_v62 = vmul.f32 %v3685_v21, %v3685_v21 }
 0xaf5   :  { %v3686_v22 = vsub.f32 %v10848_v57, %v3681_v63  ;;  %v3695_v33 = vsel %vm224_vm1, %v3690_v62, 0.0 }
 0xaf6   :  { %3696 = vadd.xlane.f32.xlu1 %v3695_v33 }
 0xaf7   :  { %v3691_v49 = vmul.f32 %v3686_v22, %v3686_v22 }
 0xaf9   :  { %v3698_v18 = vsel %vm224_vm1, %v3691_v49, 0.0 }
 0xafa   :  { %3699 = vadd.xlane.f32.xlu0 %v3698_v18 }
 0xb3c   :  { %v3673_v54 = vpop.xlane.xlu0 %3672 }
 0xb3d   :  { %v3682_v15 = vmul.f32 0.03125, %v3673_v54 }
 0xb3f   :  { %v10900_v7 = vsub.f32 %v10853_v53, %v3682_v15 }
 0xb40   :  { %v3676_v2 = vpop.xlane.xlu1 %3675 }
 0xb41   :  { %v3683_v58 = vmul.f32 0.03125, %v3676_v2  ;;  %v3692_v45 = vmul.f32 %v10900_v7, %v10900_v7 }
 0xb43   :  { %v10905_v59 = vsub.f32 %v10858_v6, %v3683_v58  ;;  %v3701_v28 = vsel %vm224_vm1, %v3692_v45, 0.0 }
 0xb44   :  { %3702 = vadd.xlane.f32.xlu1 %v3701_v28  ;;  %v3679_v37 = vpop.xlane.xlu0 %3678  ;;  %v10991_v28 = vld [vmem:[%s12022_s2 + $0x1] ss:$0 sm:$0xff] }
 0xb45   :  { %v3684_v17 = vmul.f32 0.03125, %v3679_v37  ;;  %v3693_v12 = vmul.f32 %v10905_v59, %v10905_v59 }
 0xb47   :  { %v10911_v46 = vsub.f32 %v10863_v55, %v3684_v17  ;;  %v3704_v47 = vsel %vm224_vm1, %v3693_v12, 0.0 }
 0xb48   :  { %3705 = vadd.xlane.f32.xlu0 %v3704_v47 }
 0xb49   :  { %v3694_v3 = vmul.f32 %v10911_v46, %v10911_v46 }
 0xb4b   :  { %v3707_v16 = vsel %vm237_vm3, %v3694_v3, 0.0 }
 0xb4c   :  { %3708 = vadd.xlane.f32.xlu1 %v3707_v16 }
 0xb83   :  { %v3697_v31 = vpop.xlane.xlu1 %3696 }
 0xb84   :  { %v3710_v24 = vmul.f32 0.03125, %v3697_v31 }
 0xb86   :  { %v3715_v50 = vadd.f32 1e-06, %v3710_v24 }
 0xb87   :  { %v3700_v5 = vpop.xlane.xlu0 %3699 }
 0xb88   :  { %9386 = vrsqrt.f32 %v3715_v50  ;;  %v3711_v25 = vmul.f32 0.03125, %v3700_v5 }
 0xb8a   :  { %v3716_v43 = vadd.f32 1e-06, %v3711_v25 }
 0xb8c   :  { %9388 = vrsqrt.f32 %v3716_v43 }
 0xb92   :  { %v9387_v11 = vpop.eup %9386 }
 0xb93   :  { %v3725_v14 = vmul.f32 %v9387_v11, %v3685_v21  ;;  %v9029_v21 = vpack.c.bf16 %v7385_v40, %v7384_v1 }
 0xb95   :  { %v3736_v38 = vmul.f32 %v7369_v8, %v3725_v14 }
 0xb96   :  { %v9389_v41 = vpop.eup %9388 }
 0xb97   :  { %v3747_v0 = vadd.f32 %v7370_v56, %v3736_v38  ;;  %v3726_v26 = vmul.f32 %v9389_v41, %v3686_v22 }
 0xb99   :  { %8434 = vmatmul.mubr.msk.f32.vlgmr.msra.gmra.mrb[102].mxu0 %vm224_vm1, %v3747_v0  ;;  %8480 = vmatmul.mubr.msk.f32.vlgmr.msra.gmra.mrb[96].mxu1 %vm224_vm1, %v3747_v0  ;;  %v3737_v52 = vmul.f32 %v7369_v8, %v3726_v26 }
 0xb9a   :  { %8436 = vmatprep.mubr.msk.f32.mxu0 %vm9539_vm4, %v9540_v13  ;;  %8482 = vmatprep.mubr.msk.f32.mxu1 %vm9539_vm4, %v9540_v13 }
 0xb9b   :  { %v3748_v61 = vadd.f32 %v7370_v56, %v3737_v52  ;;  %9027 = vmatpush3.bf16.msra.mxu0 %v9026_v48 }
 0xb9c   :  { %9028 = vmatprep.subr.bf16.mxu0 %v9538_v9 }
 0xb9d   :  { %8437 = vmatmul.mubr.msk.f32.gmra.mrb[104].mxu0 %vm224_vm1, %v3748_v61  ;;  %8483 = vmatmul.mubr.msk.f32.gmra.mrb[98].mxu1 %vm224_vm1, %v3748_v61 }
 0xb9e   :  { %8439 = vmatprep.mubr.msk.f32.mxu0 %vm9539_vm4, %v9540_v13  ;;  %8485 = vmatprep.mubr.msk.f32.mxu1 %vm9539_vm4, %v9540_v13 }
 0xb9f   :  { %9030 = vmatpush3.bf16.msra.mxu0 %v9029_v21 }
 0xba0   :  { %9037 = vmatprep.subr.bf16.mxu0 %v9538_v9 }
 0xbd1   :  { %v3703_v10 = vpop.xlane.xlu1 %3702 }
 0xbd2   :  { %v3712_v63 = vmul.f32 0.03125, %v3703_v10 }
 0xbd4   :  { %v3717_v62 = vadd.f32 1e-06, %v3712_v63 }
 0xbd5   :  { %v3706_v22 = vpop.xlane.xlu0 %3705 }
 0xbd6   :  { %9390 = vrsqrt.f32 %v3717_v62  ;;  %v3713_v33 = vmul.f32 0.03125, %v3706_v22 }
 0xbd8   :  { %v3718_v49 = vadd.f32 1e-06, %v3713_v33 }
 0xbd9   :  { %v3709_v18 = vpop.xlane.xlu1 %3708 }
 0xbda   :  { %9392 = vrsqrt.f32 %v3718_v49  ;;  %v3714_v19 = vmul.f32 0.03125, %v3709_v18 }
 0xbdc   :  { %v3719_v20 = vadd.f32 1e-06, %v3714_v19  ;;  %v7387_v19 = vld [vmem:[%s11975_s10 + $0x1] ss:$0 sm:$0xff]  ;;  %s12026_s10 = smov 104  }
 0xbde   :  { %9394 = vrsqrt.f32 %v3719_v20 }
 0xbe0   :  { %v9391_v23 = vpop.eup %9390 }
 0xbe1   :  { %v3727_v42 = vmul.f32 %v9391_v23, %v10900_v7 }
 0xbe3   :  { %v3738_v29 = vmul.f32 %v7369_v8, %v3727_v42 }
 0xbe4   :  { %v9393_v27 = vpop.eup %9392 }
 0xbe5   :  { %v3749_v32 = vadd.f32 %v7370_v56, %v3738_v29  ;;  %v3728_v30 = vmul.f32 %v9393_v27, %v10905_v59  ;;  %v7398_v59 = vld [vmem:[%s11977_s12 + $0x1] ss:$0 sm:$0xff] }
 0xbe7   :  { %8440 = vmatmul.mubr.msk.f32.gmra.mrb[106].mxu0 %vm224_vm1, %v3749_v32  ;;  %8486 = vmatmul.mubr.msk.f32.gmra.mrb[100].mxu1 %vm224_vm1, %v3749_v32  ;;  %v3739_v4 = vmul.f32 %v7369_v8, %v3728_v30 }
 0xbe8   :  { %v9395_v39 = vpop.eup %9394  ;;  %8442 = vmatprep.mubr.msk.f32.mxu0 %vm9539_vm4, %v9540_v13  ;;  %8488 = vmatprep.mubr.msk.f32.mxu1 %vm9539_vm4, %v9540_v13 }
 0xbe9   :  { %v3750_v36 = vadd.f32 %v7370_v56, %v3739_v4  ;;  %v3729_v51 = vmul.f32 %v9395_v39, %v10911_v46 }
 0xbeb   :  { %8443 = vmatmul.mubr.msk.f32.gmra.mrb[108].mxu0 %vm224_vm1, %v3750_v36  ;;  %8489 = vmatmul.mubr.msk.f32.gmra.mrb[102].mxu1 %vm224_vm1, %v3750_v36  ;;  %v3740_v54 = vmul.f32 %v7369_v8, %v3729_v51 }
 0xbec   :  { %8445 = vmatprep.mubr.msk.f32.mxu0 %vm9539_vm4, %v9540_v13  ;;  %8491 = vmatprep.mubr.msk.f32.mxu1 %vm9539_vm4, %v9540_v13 }
 0xbed   :  { %v3751_v15 = vadd.f32 %v7370_v56, %v3740_v54 }
 0xbef   :  { %8446 = vmatmul.mubr.msk.f32.gmra.mrb[110].mxu0 %vm224_vm1, %v3751_v15  ;;  %8492 = vmatmul.mubr.msk.f32.gmra.mrb[104].mxu1 %vm224_vm1, %v3751_v15 }
 0xbf0   :  { %8456 = vmatprep.mubr.msk.f32.mxu0 %vm9539_vm4, %v9540_v13  ;;  %8515 = vmatprep.mubr.msk.f32.mxu1 %vm9539_vm4, %v9540_v13 }
 0xbf3   :  { %8457 = vmatmul.mubr.msk.f32.vlgmr.msra.gmra.mrb[112].mxu0 %vm224_vm1, %v3747_v0 }
 0xbf4   :  { %8459 = vmatprep.mubr.msk.f32.mxu0 %vm9539_vm4, %v9540_v13 }
 0xbf7   :  { %8460 = vmatmul.mubr.msk.f32.gmra.mrb[114].mxu0 %vm224_vm1, %v3748_v61 }
 0xbf8   :  { %8462 = vmatprep.mubr.msk.f32.mxu0 %vm9539_vm4, %v9540_v13 }
 0xbfb   :  { %8463 = vmatmul.mubr.msk.f32.gmra.mrb[116].mxu0 %vm224_vm1, %v3749_v32 }
 0xbfc   :  { %8465 = vmatprep.mubr.msk.f32.mxu0 %vm9539_vm4, %v9540_v13 }
 0xbff   :  { %8466 = vmatmul.mubr.msk.f32.gmra.mrb[118].mxu0 %vm224_vm1, %v3750_v36 }
 0xc00   :  { %8468 = vmatprep.mubr.msk.f32.mxu0 %vm9539_vm4, %v9540_v13 }
 0xc03   :  { %8469 = vmatmul.mubr.msk.f32.gmra.mrb[120].mxu0 %vm224_vm1, %v3751_v15 }
 0xc04   :  { %8500 = vmatprep.mubr.msk.f32.mxu0 %vm9539_vm4, %v9540_v13 }
 0xc6c   :  { %v3846_v7 = vpop.f32.mrb[102].mxu0  ;;  %v4052_v2 = vpop.f32.mrb[96].mxu1 }
 0xc6d   :  { %v8435_v58 = vpop.f32.mrb[103].mxu0  ;;  %v8481_v45 = vpop.f32.mrb[97].mxu1  ;;  %v10993_v12 = vadd.f32 %v7398_v59, %v4052_v2  ;;  %v3847_v36 = vadd.f32 %v10991_v28, %v3846_v7 }
 0xc70   :  { %v3851_v37 = vpop.f32.mrb[104].mxu0  ;;  %v4057_v17 = vpop.f32.mrb[98].mxu1 }
 0xc71   :  { %v10996_v46 = vadd.f32 %v10991_v28, %v3851_v37  ;;  %v10998_v47 = vadd.f32 %v7398_v59, %v4057_v17  ;;  %v8438_v3 = vpop.f32.mrb[105].mxu0  ;;  %v8484_v16 = vpop.f32.mrb[99].mxu1 }
 0xc73   :  { %4081 = vrot.lane.b32.xlu1 %v10996_v46, %s9541_s30  ;;  %v11004_v31 = vpack.i.bf16 %v10998_v47, %v10993_v12  ;;  %v9070_v24 = vpack.c.bf16 %v10998_v47, %v10993_v12 }
 0xcba   :  { %v3856_v50 = vpop.f32.mrb[106].mxu0  ;;  %v4062_v5 = vpop.f32.mrb[100].mxu1 }
 0xcbb   :  { %v8441_v25 = vpop.f32.mrb[107].mxu0  ;;  %v8487_v43 = vpop.f32.mrb[101].mxu1  ;;  %v11009_v11 = vadd.f32 %v10991_v28, %v3856_v50  ;;  %v11014_v41 = vadd.f32 %v7398_v59, %v4062_v5 }
 0xcbd   :  { %v4099_v26 = vrot.slane %v11009_v11, 1  ;;  %v4197_v63 = vrot.slane %v11014_v41, 1 }
 0xcbe   :  { %v3861_v8 = vpop.f32.mrb[108].mxu0  ;;  %v4067_v14 = vpop.f32.mrb[102].mxu1 }
 0xcbf   :  { %v11012_v56 = vadd.f32 %v10991_v28, %v3861_v8  ;;  %v4068_v35 = vadd.f32 %v7398_v59, %v4067_v14  ;;  %v8444_v44 = vpop.f32.mrb[109].mxu0  ;;  %v8490_v38 = vpop.f32.mrb[103].mxu1 }
 0xcc1   :  { %v4100_v0 = vrot.slane %v11012_v56, 1  ;;  %v4198_v40 = vrot.slane %v4068_v35, 1 }
 0xcc2   :  { %v3866_v48 = vpop.f32.mrb[110].mxu0  ;;  %v4072_v1 = vpop.f32.mrb[104].mxu1 }
 0xcc3   :  { %v4073_v52 = vadd.f32 %v7398_v59, %v4072_v1  ;;  %v8447_v61 = vpop.f32.mrb[111].mxu0  ;;  %v8493_v21 = vpop.f32.mrb[105].mxu1  ;;  %v11021_v10 = vsel %vm655_vm5, %v4099_v26, %v4100_v0  ;;  %v11027_v33 = vsel %vm655_vm5, %v4197_v63, %v4198_v40  ;;  %v3867_v25 = vadd.f32 %v10991_v28, %v3866_v48 }
 0xcc5   :  { %v11024_v62 = vrot.slane %v4073_v52, 1  ;;  %v11091_v43 = vrot.slane %v3867_v25, 1 }
 0xcc6   :  { %v3949_v22 = vpop.f32.mrb[112].mxu0 }
 0xcc7   :  { %v8458_v49 = vpop.f32.mrb[113].mxu0  ;;  %v11031_v18 = vsel %vm655_vm5, %v4198_v40, %v11024_v62  ;;  %v3950_v42 = vadd.f32 %v7387_v19, %v3949_v22  ;;  %v11099_v8 = vsel %vm655_vm5, %v4100_v0, %v11091_v43 }
 0xcc8   :  { %v9082_v20 = vpack.c.bf16 %v11031_v18, %v11027_v33 }
 0xcca   :  { %v3954_v23 = vpop.f32.mrb[114].mxu0 }
 0xccb   :  { %v3955_v29 = vadd.f32 %v7387_v19, %v3954_v23  ;;  %v8461_v27 = vpop.f32.mrb[115].mxu0 }
 0xccd   :  { %v9038_v32 = vpack.c.bf16 %v3955_v29, %v3950_v42  ;;  %v9205_v30 = vpack.i.bf16 %v3955_v29, %v3950_v42 }
 0xcce   :  { %v3959_v4 = vpop.f32.mrb[116].mxu0 }
 0xccf   :  { %9206 = vrot.lane.b32.xlu1 %v9205_v30, %s12025_s8  ;;  %9201 = vrot.lane.b32.xlu0 %v9205_v30, %s9541_s30  ;;  %v8464_v39 = vpop.f32.mrb[117].mxu0  ;;  %v3960_v51 = vadd.f32 %v7387_v19, %v3959_v4 }
 0xcd0   :  { %9040 = vmatpush3.bf16.xpose.msk.msra.mxu0 %vm9916_vm7, %v9038_v32 }
 0xcd1   :  { %8498 = vmatprep.subr.mxu0 %v9540_v13  ;;  %v4145_v58 = vrot.slane %v3960_v51, 1 }
 0xcd2   :  { %v3964_v54 = vpop.f32.mrb[118].mxu0 }
 0xcd3   :  { %v3965_v15 = vadd.f32 %v7387_v19, %v3964_v54  ;;  %9211 = vrot.lane.b32.xlu1 %v9205_v30, %s12026_s10  ;;  %4079 = vrot.lane.b32.xlu0 %v3847_v36, %s9541_s30  ;;  %v8467_v2 = vpop.f32.mrb[119].mxu0 }
 0xcd5   :  { %v4146_v45 = vrot.slane %v3965_v15, 1 }
 0xcd6   :  { %v3969_v59 = vpop.f32.mrb[120].mxu0 }
 0xcd7   :  { %v11047_v37 = vsel %vm655_vm5, %v4145_v58, %v4146_v45  ;;  %v3970_v17 = vadd.f32 %v7387_v19, %v3969_v59  ;;  %4087 = vrot.lane.b32.xlu0 %v10996_v46, %s12025_s8  ;;  %4129 = vrot.lane.b32.xlu1 %v3960_v51, %s9541_s30  ;;  %v8470_v7 = vpop.f32.mrb[121].mxu0 }
 0xcd8   :  { %8499 = vmatpush3.xpose.msk.msra.mxu0 %vm785_vm6, %v3960_v51 }
 0xcd9   :  { %v11053_v3 = vrot.slane %v3970_v17, 1  ;;  %9045 = vmatprep.subr.bf16.mxu0 %v9538_v9 }
 0xcdb   :  { %8501 = vmatmul.mubr.msk.f32.vlgmr.msra.gmra.mrb[122].mxu0 %vm785_vm6, %v3847_v36  ;;  %4135 = vrot.lane.b32.xlu0 %v3960_v51, %s12025_s8  ;;  %v11060_v16 = vsel %vm655_vm5, %v4146_v45, %v11053_v3 }
 0xcdc   :  { %4083 = vrot.lane.b32.xlu1 %v11009_v11, %s9541_s30  ;;  %8503 = vmatprep.mubr.msk.f32.mxu0 %vm9539_vm4, %v9540_v13  ;;  %v9215_v50 = vpack.i.bf16 %v11060_v16, %v11047_v37  ;;  %v9054_v5 = vpack.c.bf16 %v11060_v16, %v11047_v37 }
 0xcdf   :  { %8504 = vmatmul.mubr.msk.f32.gmra.mrb[124].mxu0 %vm785_vm6, %v10996_v46  ;;  %4141 = vrot.lane.b32.xlu0 %v3960_v51, %s12026_s10 }
 0xce0   :  { %4085 = vrot.lane.b32.xlu1 %v3847_v36, %s12025_s8  ;;  %8506 = vmatprep.mubr.msk.f32.mxu0 %vm9539_vm4, %v9540_v13 }
 0xce3   :  { %8507 = vmatmul.mubr.msk.f32.gmra.mrb[126].mxu0 %vm785_vm6, %v11009_v11  ;;  %9216 = vrot.lane.b32.xlu0 %v9215_v50, %s9541_s30 }
 0xce4   :  { %4091 = vrot.lane.b32.xlu1 %v3847_v36, %s12026_s10  ;;  %8530 = vmatprep.mubr.msk.f32.mxu0 %vm9539_vm4, %v9540_v13 }
 0xce5   :  { %v4082_v28 = vpop.permute.xlu1 %4081 }
 0xce7   :  { %4089 = vrot.lane.b32.xlu0 %v11009_v11, %s12025_s8 }
 0xce8   :  { %4093 = vrot.lane.b32.xlu1 %v10996_v46, %s12026_s10 }
 0xceb   :  { %4154 = vrot.lane.b32.xlu0 %v11053_v3, %s9541_s30 }
 0xcec   :  { %4095 = vrot.lane.b32.xlu1 %v11009_v11, %s12026_s10 }
 0xcef   :  { %9226 = vrot.lane.b32.xlu0 %v9215_v50, %s12026_s10 }
 0xcf0   :  { %9221 = vrot.lane.b32.xlu1 %v9215_v50, %s12025_s8 }
 0xcf3   :  { %4106 = vrot.lane.b32.xlu0 %v11099_v8, %s9541_s30 }
 0xcf4   :  { %4104 = vrot.lane.b32.xlu1 %v11021_v10, %s9541_s30 }
 0xcf7   :  { %4108 = vrot.lane.b32.xlu0 %v11091_v43, %s9541_s30 }
 0xcf8   :  { %4160 = vrot.lane.b32.xlu1 %v11053_v3, %s12025_s8 }
 0xcfb   :  { %4110 = vrot.lane.b32.xlu0 %v11021_v10, %s12025_s8 }
 0xcfc   :  { %4166 = vrot.lane.b32.xlu1 %v11053_v3, %s12026_s10 }
 0xcff   :  { %4112 = vrot.lane.b32.xlu0 %v11099_v8, %s12025_s8 }
 0xd00   :  { %4116 = vrot.lane.b32.xlu1 %v11021_v10, %s12026_s10 }
 0xd03   :  { %4114 = vrot.lane.b32.xlu0 %v11091_v43, %s12025_s8 }
 0xd04   :  { %4118 = vrot.lane.b32.xlu1 %v11099_v8, %s12026_s10 }
 0xd07   :  { %4175 = vrot.lane.b32.xlu0 %v11014_v41, %s9541_s30 }
 0xd08   :  { %4120 = vrot.lane.b32.xlu1 %v11091_v43, %s12026_s10 }
 0xd0b   :  { %4183 = vrot.lane.b32.xlu0 %v11014_v41, %s12025_s8 }
 0xd0c   :  { %9231 = vrot.lane.b32.xlu1 %v11004_v31, %s9541_s30 }
 0xd10   :  { %9236 = vrot.lane.b32.xlu1 %v11004_v31, %s12025_s8 }
 0xd14   :  { %9241 = vrot.lane.b32.xlu1 %v11004_v31, %s12026_s10 }
 0xd18   :  { %4191 = vrot.lane.b32.xlu1 %v11014_v41, %s12026_s10 }
 0xd41   :  { %v9207_v46 = vpop.permute.xlu1 %9206  ;;  %v9202_v11 = vpop.permute.xlu0 %9201 }
 0xd42   :  { %v9209_v14 = vunpack.i.h.bf16 %v9207_v46  ;;  %v9208_v56 = vunpack.i.l.bf16 %v9207_v46  ;;  %v9204_v35 = vunpack.i.h.bf16 %v9202_v11  ;;  %v9203_v44 = vunpack.i.l.bf16 %v9202_v11 }
 0xd44   :  { %v9046_v38 = vpack.c.bf16 %v9209_v14, %v9208_v56  ;;  %v9042_v0 = vpack.c.bf16 %v9204_v35, %v9203_v44 }
 0xd45   :  { %v9212_v26 = vpop.permute.xlu1 %9211  ;;  %v4080_v48 = vpop.permute.xlu0 %4079 }
 0xd46   :  { %9044 = vmatpush3.bf16.xpose.msk.msra.mxu1 %vm9916_vm7, %v9042_v0  ;;  %9048 = vmatpush3.bf16.xpose.msk.msra.mxu0 %vm9916_vm7, %v9046_v38  ;;  %v9214_v40 = vunpack.i.h.bf16 %v9212_v26  ;;  %v9213_v52 = vunpack.i.l.bf16 %v9212_v26 }
 0xd47   :  { %8513 = vmatprep.subr.mxu1 %v9540_v13  ;;  %8528 = vmatprep.subr.mxu0 %v9540_v13 }
 0xd48   :  { %v9050_v63 = vpack.c.bf16 %v9214_v40, %v9213_v52 }
 0xd49   :  { %v4088_v31 = vpop.permute.xlu0 %4087  ;;  %v4130_v1 = vpop.permute.xlu1 %4129 }
 0xd4d   :  { %v4136_v61 = vpop.permute.xlu0 %4135 }
 0xd4e   :  { %v4084_v21 = vpop.permute.xlu1 %4083  ;;  %8514 = vmatpush3.xpose.msk.msra.mxu1 %vm785_vm6, %v4130_v1  ;;  %8529 = vmatpush3.xpose.msk.msra.mxu0 %vm785_vm6, %v4136_v61 }
 0xd4f   :  { %9049 = vmatprep.subr.bf16.mxu1 %v9538_v9  ;;  %9053 = vmatprep.subr.bf16.mxu0 %v9538_v9 }
 0xd51   :  { %v4142_v22 = vpop.permute.xlu0 %4141  ;;  %8516 = vmatmul.mubr.msk.f32.vlgmr.msra.gmra.mrb[106].mxu1 %vm785_vm6, %v4080_v48 }
 0xd52   :  { %v4086_v49 = vpop.permute.xlu1 %4085  ;;  %9052 = vmatpush3.bf16.xpose.msk.msra.mxu1 %vm9916_vm7, %v9050_v63  ;;  %8518 = vmatprep.mubr.msk.f32.mxu1 %vm9539_vm4, %v9540_v13 }
 0xd53   :  { %8531 = vmatmul.mubr.msk.f32.vlgmr.msra.gmra.mrb[128].mxu0 %vm785_vm6, %v4086_v49  ;;  %8543 = vmatprep.subr.mxu1 %v9540_v13 }
 0xd54   :  { %9056 = vmatpush3.bf16.xpose.msk.msra.mxu0 %vm9916_vm7, %v9054_v5  ;;  %8533 = vmatprep.mubr.msk.f32.mxu0 %vm9539_vm4, %v9540_v13 }
 0xd55   :  { %8519 = vmatmul.mubr.msk.f32.gmra.mrb[108].mxu1 %vm785_vm6, %v4082_v28  ;;  %v9217_v19 = vpop.permute.xlu0 %9216  ;;  %8558 = vmatprep.subr.mxu0 %v9540_v13 }
 0xd56   :  { %v4092_v23 = vpop.permute.xlu1 %4091  ;;  %8521 = vmatprep.mubr.msk.f32.mxu1 %vm9539_vm4, %v9540_v13  ;;  %v9219_v42 = vunpack.i.h.bf16 %v9217_v19  ;;  %v9218_v29 = vunpack.i.l.bf16 %v9217_v19 }
 0xd57   :  { %8534 = vmatmul.mubr.msk.f32.gmra.mrb[130].mxu0 %vm785_vm6, %v4088_v31 }
 0xd58   :  { %8536 = vmatprep.mubr.msk.f32.mxu0 %vm9539_vm4, %v9540_v13  ;;  %v9058_v30 = vpack.c.bf16 %v9219_v42, %v9218_v29 }
 0xd59   :  { %8522 = vmatmul.mubr.msk.f32.gmra.mrb[110].mxu1 %vm785_vm6, %v4084_v21  ;;  %v4090_v27 = vpop.permute.xlu0 %4089 }
 0xd5a   :  { %v4094_v32 = vpop.permute.xlu1 %4093  ;;  %8544 = vmatpush3.xpose.msk.msra.mxu1 %vm785_vm6, %v4142_v22  ;;  %8545 = vmatprep.mubr.msk.f32.mxu1 %vm9539_vm4, %v9540_v13 }
 0xd5b   :  { %8537 = vmatmul.mubr.msk.f32.gmra.mrb[132].mxu0 %vm785_vm6, %v4090_v27  ;;  %9057 = vmatprep.subr.bf16.mxu1 %v9538_v9 }
 0xd5c   :  { %8559 = vmatpush3.xpose.msk.msra.mxu0 %vm785_vm6, %v11053_v3  ;;  %8560 = vmatprep.mubr.msk.f32.mxu0 %vm9539_vm4, %v9540_v13 }
 0xd5d   :  { %8546 = vmatmul.mubr.msk.f32.vlgmr.msra.gmra.mrb[112].mxu1 %vm785_vm6, %v4092_v23  ;;  %v4155_v4 = vpop.permute.xlu0 %4154  ;;  %9061 = vmatprep.subr.bf16.mxu0 %v9538_v9 }
 0xd5e   :  { %v4096_v39 = vpop.permute.xlu1 %4095  ;;  %9060 = vmatpush3.bf16.xpose.msk.msra.mxu1 %vm9916_vm7, %v9058_v30  ;;  %8548 = vmatprep.mubr.msk.f32.mxu1 %vm9539_vm4, %v9540_v13 }
 0xd5f   :  { %8561 = vmatmul.mubr.msk.f32.vlgmr.msra.gmra.mrb[134].mxu0 %vm785_vm6, %v11021_v10  ;;  %8573 = vmatprep.subr.mxu1 %v9540_v13 }
 0xd60   :  { %8563 = vmatprep.mubr.msk.f32.mxu0 %vm9539_vm4, %v9540_v13 }
 0xd61   :  { %8549 = vmatmul.mubr.msk.f32.gmra.mrb[114].mxu1 %vm785_vm6, %v4094_v32  ;;  %v9227_v36 = vpop.permute.xlu0 %9226 }
 0xd62   :  { %v9222_v51 = vpop.permute.xlu1 %9221  ;;  %8551 = vmatprep.mubr.msk.f32.mxu1 %vm9539_vm4, %v9540_v13  ;;  %v9229_v2 = vunpack.i.h.bf16 %v9227_v36  ;;  %v9228_v58 = vunpack.i.l.bf16 %v9227_v36 }
 0xd63   :  { %v9224_v54 = vunpack.i.h.bf16 %v9222_v51  ;;  %v9223_v15 = vunpack.i.l.bf16 %v9222_v51  ;;  %8564 = vmatmul.mubr.msk.f32.gmra.mrb[136].mxu0 %vm785_vm6, %v11099_v8 }
 0xd64   :  { %8566 = vmatprep.mubr.msk.f32.mxu0 %vm9539_vm4, %v9540_v13  ;;  %v9066_v37 = vpack.c.bf16 %v9229_v2, %v9228_v58 }
 0xd65   :  { %v9062_v10 = vpack.c.bf16 %v9224_v54, %v9223_v15  ;;  %8552 = vmatmul.mubr.msk.f32.gmra.mrb[116].mxu1 %vm785_vm6, %v4096_v39  ;;  %v4107_v45 = vpop.permute.xlu0 %4106 }
 0xd66   :  { %v4105_v59 = vpop.permute.xlu1 %4104  ;;  %8574 = vmatpush3.xpose.msk.msra.mxu1 %vm785_vm6, %v4155_v4  ;;  %8575 = vmatprep.mubr.msk.f32.mxu1 %vm9539_vm4, %v9540_v13 }
 0xd67   :  { %8567 = vmatmul.mubr.msk.f32.gmra.mrb[138].mxu0 %vm785_vm6, %v11091_v43  ;;  %9065 = vmatprep.subr.bf16.mxu1 %v9538_v9 }
 0xd68   :  { %9064 = vmatpush3.bf16.xpose.msk.msra.mxu0 %vm9916_vm7, %v9062_v10  ;;  %8590 = vmatprep.mubr.msk.f32.mxu0 %vm9539_vm4, %v9540_v13 }
 0xd69   :  { %v4109_v17 = vpop.permute.xlu0 %4108  ;;  %8576 = vmatmul.mubr.msk.f32.vlgmr.msra.gmra.mrb[118].mxu1 %vm785_vm6, %v4105_v59  ;;  %8588 = vmatprep.subr.mxu0 %v9540_v13 }
 0xd6a   :  { %v4161_v7 = vpop.permute.xlu1 %4160  ;;  %9068 = vmatpush3.bf16.xpose.msk.msra.mxu1 %vm9916_vm7, %v9066_v37  ;;  %8578 = vmatprep.mubr.msk.f32.mxu1 %vm9539_vm4, %v9540_v13 }
 0xd6b   :  { %8603 = vmatprep.subr.mxu1 %v9540_v13 }
 0xd6d   :  { %8579 = vmatmul.mubr.msk.f32.gmra.mrb[120].mxu1 %vm785_vm6, %v4107_v45  ;;  %v4111_v16 = vpop.permute.xlu0 %4110 }
 0xd6e   :  { %v4167_v3 = vpop.permute.xlu1 %4166  ;;  %8581 = vmatprep.mubr.msk.f32.mxu1 %vm9539_vm4, %v9540_v13 }
 0xd70   :  { %8589 = vmatpush3.xpose.msk.msra.mxu0 %vm785_vm6, %v4161_v7 }
 0xd71   :  { %8582 = vmatmul.mubr.msk.f32.gmra.mrb[122].mxu1 %vm785_vm6, %v4109_v17  ;;  %9069 = vmatprep.subr.bf16.mxu0 %v9538_v9  ;;  %v4113_v50 = vpop.permute.xlu0 %4112 }
 0xd72   :  { %v4117_v34 = vpop.permute.xlu1 %4116  ;;  %8604 = vmatpush3.xpose.msk.msra.mxu1 %vm785_vm6, %v4167_v3  ;;  %8605 = vmatprep.mubr.msk.f32.mxu1 %vm9539_vm4, %v9540_v13 }
 0xd73   :  { %8591 = vmatmul.mubr.msk.f32.vlgmr.msra.gmra.mrb[140].mxu0 %vm785_vm6, %v4111_v16  ;;  %9072 = vmatprep.subr.bf16.mxu1 %v9538_v9 }
 0xd74   :  { %9071 = vmatpush3.bf16.msra.mxu0 %v9070_v24  ;;  %8593 = vmatprep.mubr.msk.f32.mxu0 %vm9539_vm4, %v9540_v13 }
 0xd75   :  { %8606 = vmatmul.mubr.msk.f32.vlgmr.msra.gmra.mrb[124].mxu1 %vm785_vm6, %v4117_v34  ;;  %8618 = vmatprep.subr.mxu0 %v9540_v13  ;;  %v4115_v12 = vpop.permute.xlu0 %4114 }
 0xd76   :  { %v4119_v5 = vpop.permute.xlu1 %4118  ;;  %8608 = vmatprep.mubr.msk.f32.mxu1 %vm9539_vm4, %v9540_v13 }
 0xd77   :  { %8594 = vmatmul.mubr.msk.f32.gmra.mrb[142].mxu0 %vm785_vm6, %v4113_v50 }
 0xd78   :  { %8619 = vmatpush3.msk.msra.mxu0 %vm207_vm2, %v11014_v41  ;;  %8596 = vmatprep.mubr.msk.f32.mxu0 %vm9539_vm4, %v9540_v13 }
 0xd79   :  { %8609 = vmatmul.mubr.msk.f32.gmra.mrb[126].mxu1 %vm785_vm6, %v4119_v5  ;;  %9075 = vmatprep.subr.bf16.mxu0 %v9538_v9  ;;  %v4176_v8 = vpop.permute.xlu0 %4175 }
 0xd7a   :  { %v4121_v47 = vpop.permute.xlu1 %4120  ;;  %8611 = vmatprep.mubr.msk.f32.mxu1 %vm9539_vm4, %v9540_v13 }
 0xd7b   :  { %8597 = vmatmul.mubr.msk.f32.gmra.mrb[144].mxu0 %vm785_vm6, %v4115_v12 }
 0xd7c   :  { %8620 = vmatprep.mubr.msk.f32.mxu0 %vm9539_vm4, %v9540_v13 }
 0xd7d   :  { %8612 = vmatmul.mubr.msk.f32.gmra.mrb[128].mxu1 %vm785_vm6, %v4121_v47 }
 0xd7e   :  { %v9232_v24 = vpop.permute.xlu1 %9231  ;;  %8635 = vmatprep.mubr.msk.f32.mxu1 %vm9539_vm4, %v9540_v13 }
 0xd7f   :  { %v9234_v41 = vunpack.i.h.bf16 %v9232_v24  ;;  %v9233_v25 = vunpack.i.l.bf16 %v9232_v24 }
 0xd81   :  { %v9073_v43 = vpack.c.bf16 %v9234_v41, %v9233_v25 }
 0xd83   :  { %9074 = vmatpush3.bf16.msra.mxu1 %v9073_v43 }
 0xd84   :  { %8633 = vmatprep.subr.mxu1 %v9540_v13 }
 0xd87   :  { %8634 = vmatpush3.msk.msra.mxu1 %vm207_vm2, %v4176_v8 }
 0xd88   :  { %9078 = vmatprep.subr.bf16.mxu1 %v9538_v9 }
 0xdae   :  { %v11250_v28 = vpop.f32.mrb[122].mxu0 }
 0xdaf   :  { %v8502_v46 = vpop.f32.mrb[123].mxu0  ;;  %v4964_v11 = vsel %vm1522_vm8, %v11250_v28, -inf }
 0xdb0   :  { %4965 = vmax.xlane.f32.xlu0 %v4964_v11 }
 0xdb2   :  { %v11254_v14 = vpop.f32.mrb[124].mxu0 }
 0xdb3   :  { %v8505_v56 = vpop.f32.mrb[125].mxu0  ;;  %v4967_v35 = vsel %vm1522_vm8, %v11254_v14, -inf }
 0xdb4   :  { %4968 = vmax.xlane.f32.xlu0 %v4967_v35 }
 0xdb6   :  { %v11258_v44 = vpop.f32.mrb[126].mxu0 }
 0xdb7   :  { %v8508_v38 = vpop.f32.mrb[127].mxu0  ;;  %v4970_v0 = vsel %vm1529_vm9, %v11258_v44, -inf }
 0xdb8   :  { %4971 = vmax.xlane.f32.xlu0 %v4970_v0 }
 0xe24   :  { %v11262_v26 = vpop.f32.mrb[106].mxu1 }
 0xe25   :  { %v8517_v48 = vpop.f32.mrb[107].mxu1  ;;  %v4973_v31 = vsel %vm1522_vm8, %v11262_v26, -inf }
 0xe26   :  { %v11266_v1 = vpop.f32.mrb[128].mxu0  ;;  %4974 = vmax.xlane.f32.xlu1 %v4973_v31 }
 0xe27   :  { %v8532_v40 = vpop.f32.mrb[129].mxu0  ;;  %v4982_v52 = vsel %vm1522_vm8, %v11266_v1, -inf }
 0xe28   :  { %4983 = vmax.xlane.f32.xlu0 %v4982_v52  ;;  %v11270_v61 = vpop.f32.mrb[108].mxu1 }
 0xe29   :  { %v8520_v21 = vpop.f32.mrb[109].mxu1  ;;  %v4976_v63 = vsel %vm1522_vm8, %v11270_v61, -inf }
 0xe2a   :  { %v11274_v22 = vpop.f32.mrb[130].mxu0 }
 0xe2b   :  { %v8535_v49 = vpop.f32.mrb[131].mxu0  ;;  %v4985_v32 = vsel %vm1522_vm8, %v11274_v22, -inf }
 0xe2c   :  { %4977 = vmax.xlane.f32.xlu0 %v4976_v63  ;;  %v11276_v19 = vpop.f32.mrb[110].mxu1 }
 0xe2d   :  { %v8523_v23 = vpop.f32.mrb[111].mxu1  ;;  %v4979_v42 = vsel %vm1529_vm9, %v11276_v19, -inf }
 0xe2e   :  { %v11280_v29 = vpop.f32.mrb[132].mxu0  ;;  %4980 = vmax.xlane.f32.xlu1 %v4979_v42 }
 0xe2f   :  { %v8538_v27 = vpop.f32.mrb[133].mxu0  ;;  %v4988_v54 = vsel %vm1529_vm9, %v11280_v29, -inf }
 0xe30   :  { %4986 = vmax.xlane.f32.xlu0 %v4985_v32  ;;  %v11284_v30 = vpop.f32.mrb[112].mxu1  ;;  %v9250_v32 = vpack.i.bf16 %v11031_v18, %v11027_v33 }
 0xe31   :  { %v8547_v4 = vpop.f32.mrb[113].mxu1  ;;  %v4991_v39 = vsel %vm1522_vm8, %v11284_v30, -inf }
 0xe32   :  { %v11288_v36 = vpop.f32.mrb[134].mxu0  ;;  %4992 = vmax.xlane.f32.xlu1 %v4991_v39  ;;  %v11345_v4 = vpop.permute.xlu0 %4183 }
 0xe33   :  { %v8562_v51 = vpop.f32.mrb[135].mxu0  ;;  %v5000_v59 = vsel %vm1522_vm8, %v11288_v36, -inf }
 0xe34   :  { %4989 = vmax.xlane.f32.xlu0 %v4988_v54  ;;  %v11292_v15 = vpop.f32.mrb[114].mxu1 }
 0xe35   :  { %v8550_v2 = vpop.f32.mrb[115].mxu1  ;;  %v4994_v58 = vsel %vm1522_vm8, %v11292_v15, -inf }
 0xe36   :  { %v11296_v10 = vpop.f32.mrb[136].mxu0  ;;  %4995 = vmax.xlane.f32.xlu1 %v4994_v58 }
 0xe37   :  { %v8565_v45 = vpop.f32.mrb[137].mxu0  ;;  %v5003_v34 = vsel %vm1522_vm8, %v11296_v10, -inf }
 0xe38   :  { %5001 = vmax.xlane.f32.xlu0 %v5000_v59  ;;  %v11300_v37 = vpop.f32.mrb[116].mxu1 }
 0xe39   :  { %v8553_v17 = vpop.f32.mrb[117].mxu1  ;;  %v4997_v7 = vsel %vm1529_vm9, %v11300_v37, -inf }
 0xe3a   :  { %v11304_v3 = vpop.f32.mrb[138].mxu0  ;;  %4998 = vmax.xlane.f32.xlu1 %v4997_v7 }
 0xe3b   :  { %v8568_v16 = vpop.f32.mrb[139].mxu0  ;;  %v5006_v47 = vsel %vm1529_vm9, %v11304_v3, -inf }
 0xe3c   :  { %5004 = vmax.xlane.f32.xlu0 %v5003_v34  ;;  %v11308_v50 = vpop.f32.mrb[118].mxu1 }
 0xe3d   :  { %v8577_v5 = vpop.f32.mrb[119].mxu1  ;;  %v5009_v12 = vsel %vm1522_vm8, %v11308_v50, -inf  ;;  %v4966_v39 = vpop.xlane.xlu0 %4965 }
 0xe3e   :  { %5010 = vmax.xlane.f32.xlu1 %v5009_v12  ;;  %v5036_v54 = vsub.f32 %v11250_v28, %v4966_v39 }
 0xe40   :  { %5007 = vmax.xlane.f32.xlu0 %v5006_v47  ;;  %v11314_v24 = vpop.f32.mrb[120].mxu1  ;;  %v5060_v2 = vmul.f32 1.442695, %v5036_v54 }
 0xe41   :  { %v8580_v41 = vpop.f32.mrb[121].mxu1  ;;  %v5012_v25 = vsel %vm1522_vm8, %v11314_v24, -inf  ;;  %v4969_v51 = vpop.xlane.xlu0 %4968 }
 0xe42   :  { %5013 = vmax.xlane.f32.xlu1 %v5012_v25  ;;  %v5037_v58 = vsub.f32 %v11254_v14, %v4969_v51  ;;  %9396 = vpow2.f32 %v5060_v2  ;;  %v11370_v25 = vpop.permute.xlu1 %9236 }
 0xe44   :  { %v11318_v43 = vpop.f32.mrb[122].mxu1  ;;  %v5062_v59 = vmul.f32 1.442695, %v5037_v58 }
 0xe45   :  { %v8583_v8 = vpop.f32.mrb[123].mxu1  ;;  %v5015_v46 = vsel %vm1529_vm9, %v11318_v43, -inf  ;;  %v4972_v45 = vpop.xlane.xlu0 %4971 }
 0xe46   :  { %v11322_v11 = vpop.f32.mrb[140].mxu0  ;;  %5016 = vmax.xlane.f32.xlu1 %v5015_v46  ;;  %v5038_v17 = vsub.f32 %v11258_v44, %v4972_v45  ;;  %9398 = vpow2.f32 %v5062_v59  ;;  %v11372_v8 = vpop.permute.xlu1 %9241 }
 0xe47   :  { %v8592_v56 = vpop.f32.mrb[141].mxu0  ;;  %v5018_v35 = vsel %vm1522_vm8, %v11322_v11, -inf }
 0xe48   :  { %5019 = vmax.xlane.f32.xlu0 %v5018_v35  ;;  %v11326_v38 = vpop.f32.mrb[124].mxu1  ;;  %v5064_v7 = vmul.f32 1.442695, %v5038_v17 }
 0xe49   :  { %v8607_v0 = vpop.f32.mrb[125].mxu1  ;;  %v5027_v16 = vsel %vm1522_vm8, %v11326_v38, -inf }
 0xe4a   :  { %v11328_v48 = vpop.f32.mrb[142].mxu0  ;;  %9400 = vpow2.f32 %v5064_v7  ;;  %v11374_v46 = vpop.permute.xlu1 %4191 }
 0xe4b   :  { %v8595_v31 = vpop.f32.mrb[143].mxu0  ;;  %v5021_v40 = vsel %vm1522_vm8, %v11328_v48, -inf }
 0xe4c   :  { %5022 = vmax.xlane.f32.xlu0 %v5021_v40  ;;  %v11332_v52 = vpop.f32.mrb[126].mxu1  ;;  %v11353_v34 = vpop.eup %9396 }
 0xe4d   :  { %v8610_v21 = vpop.f32.mrb[127].mxu1  ;;  %v5030_v28 = vsel %vm1522_vm8, %v11332_v52, -inf  ;;  %v5108_v14 = vsel %vm1522_vm8, %v11353_v34, 0.0 }
 0xe4e   :  { %v11334_v63 = vpop.f32.mrb[144].mxu0 }
 0xe4f   :  { %v8598_v49 = vpop.f32.mrb[145].mxu0  ;;  %v5024_v23 = vsel %vm1529_vm9, %v11334_v63, -inf }
 0xe50   :  { %5025 = vmax.xlane.f32.xlu0 %v5024_v23  ;;  %v11338_v42 = vpop.f32.mrb[128].mxu1  ;;  %v11359_v5 = vpop.eup %9398 }
 0xe51   :  { %v8613_v27 = vpop.f32.mrb[129].mxu1  ;;  %v5033_v44 = vsel %vm1529_vm9, %v11338_v42, -inf  ;;  %v5111_v12 = vsel %vm1522_vm8, %v11359_v5, 0.0 }
 0xe54   :  { %v11365_v47 = vpop.eup %9400 }
 0xe55   :  { %v5114_v41 = vsel %vm1529_vm9, %v11365_v47, 0.0 }
 0xe57   :  { %4208 = vrot.lane.b32.xlu1 %v11024_v62, %s9541_s30 }
 0xe5b   :  { %9251 = vrot.lane.b32.xlu1 %v9250_v32, %s12025_s8 }
 0xe66   :  { %9246 = vrot.lane.b32.xlu0 %v9250_v32, %s9541_s30 }
 0xe7f   :  { %5028 = vmax.xlane.f32.xlu1 %v5027_v16 }
 0xe83   :  { %5031 = vmax.xlane.f32.xlu1 %v5030_v28 }
 0xe85   :  { %5109 = vadd.xlane.f32.xlu0 %v5108_v14 }
 0xe87   :  { %5034 = vmax.xlane.f32.xlu1 %v5033_v44 }
 0xe89   :  { %5112 = vadd.xlane.f32.xlu0 %v5111_v12 }
 0xe8d   :  { %5115 = vadd.xlane.f32.xlu0 %v5114_v41 }
 0xe98   :  { %9256 = vrot.lane.b32.xlu1 %v9250_v32, %s12026_s10 }
 0xeb3   :  { %v4975_v56 = vpop.xlane.xlu1 %4974 }
 0xeb4   :  { %v5039_v35 = vsub.f32 %v11262_v26, %v4975_v56 }
 0xeb5   :  { %v4984_v0 = vpop.xlane.xlu0 %4983 }
 0xeb6   :  { %v5066_v31 = vmul.f32 1.442695, %v5039_v35  ;;  %v5042_v40 = vsub.f32 %v11266_v1, %v4984_v0 }
 0xeb8   :  { %9402 = vpow2.f32 %v5066_v31  ;;  %v5072_v21 = vmul.f32 1.442695, %v5042_v40 }
 0xeb9   :  { %v4978_v49 = vpop.xlane.xlu0 %4977 }
 0xeba   :  { %9404 = vpow2.f32 %v5072_v21  ;;  %v5040_v23 = vsub.f32 %v11270_v61, %v4978_v49 }
 0xebb   :  { %v4981_v27 = vpop.xlane.xlu1 %4980 }
 0xebc   :  { %v5068_v32 = vmul.f32 1.442695, %v5040_v23  ;;  %v5041_v39 = vsub.f32 %v11276_v19, %v4981_v27 }
 0xebd   :  { %v4987_v51 = vpop.xlane.xlu0 %4986 }
 0xebe   :  { %9406 = vpow2.f32 %v5068_v32  ;;  %v5070_v54 = vmul.f32 1.442695, %v5041_v39  ;;  %v5043_v2 = vsub.f32 %v11274_v22, %v4987_v51 }
 0xebf   :  { %v4993_v26 = vpop.xlane.xlu1 %4992 }
 0xec0   :  { %9408 = vpow2.f32 %v5070_v54  ;;  %v5074_v58 = vmul.f32 1.442695, %v5043_v2  ;;  %v5045_v1 = vsub.f32 %v11284_v30, %v4993_v26 }
 0xec1   :  { %v4990_v45 = vpop.xlane.xlu0 %4989 }
 0xec2   :  { %v11382_v59 = vpop.eup %9402  ;;  %9410 = vpow2.f32 %v5074_v58  ;;  %v5078_v17 = vmul.f32 1.442695, %v5045_v1  ;;  %v5044_v61 = vsub.f32 %v11280_v29, %v4990_v45 }
 0xec3   :  { %v4996_v7 = vpop.xlane.xlu1 %4995  ;;  %v5117_v19 = vsel %vm1522_vm8, %v11382_v59, 0.0 }
 0xec4   :  { %v11387_v16 = vpop.eup %9404  ;;  %9412 = vpow2.f32 %v5078_v17  ;;  %v5076_v22 = vmul.f32 1.442695, %v5044_v61  ;;  %v5046_v28 = vsub.f32 %v11292_v15, %v4996_v7  ;;  %5118 = vadd.xlane.f32.xlu1 %v5117_v19 }
 0xec5   :  { %v5002_v14 = vpop.xlane.xlu0 %5001  ;;  %v5126_v30 = vsel %vm1522_vm8, %v11387_v16, 0.0 }
 0xec6   :  { %9414 = vpow2.f32 %v5076_v22  ;;  %v5080_v44 = vmul.f32 1.442695, %v5046_v28  ;;  %v5048_v12 = vsub.f32 %v11288_v36, %v5002_v14  ;;  %5127 = vadd.xlane.f32.xlu0 %v5126_v30 }
 0xec7   :  { %v4999_v29 = vpop.xlane.xlu1 %4998 }
 0xec8   :  { %v11393_v41 = vpop.eup %9406  ;;  %9416 = vpow2.f32 %v5080_v44  ;;  %v5084_v56 = vmul.f32 1.442695, %v5048_v12  ;;  %v5047_v35 = vsub.f32 %v11300_v37, %v4999_v29 }
 0xec9   :  { %v5005_v0 = vpop.xlane.xlu0 %5004  ;;  %v5120_v15 = vsel %vm1522_vm8, %v11393_v41, 0.0 }
 0xeca   :  { %v11398_v31 = vpop.eup %9408  ;;  %9418 = vpow2.f32 %v5084_v56  ;;  %v5082_v40 = vmul.f32 1.442695, %v5047_v35  ;;  %v5049_v21 = vsub.f32 %v11296_v10, %v5005_v0  ;;  %5121 = vadd.xlane.f32.xlu1 %v5120_v15 }
 0xecb   :  { %v5011_v36 = vpop.xlane.xlu1 %5010  ;;  %v5123_v49 = vsel %vm1529_vm9, %v11398_v31, 0.0 }
 0xecc   :  { %v11403_v23 = vpop.eup %9410  ;;  %9420 = vpow2.f32 %v5082_v40  ;;  %v5086_v27 = vmul.f32 1.442695, %v5049_v21  ;;  %v5051_v37 = vsub.f32 %v11308_v50, %v5011_v36 }
 0xecd   :  { %v5008_v32 = vpop.xlane.xlu0 %5007  ;;  %v5129_v39 = vsel %vm1522_vm8, %v11403_v23, 0.0 }
 0xece   :  { %v11408_v51 = vpop.eup %9412  ;;  %9422 = vpow2.f32 %v5086_v27  ;;  %v5050_v10 = vsub.f32 %v11304_v3, %v5008_v32  ;;  %5130 = vadd.xlane.f32.xlu0 %v5129_v39  ;;  %5124 = vadd.xlane.f32.xlu1 %v5123_v49  ;;  %v5090_v58 = vmul.f32 1.442695, %v5051_v37 }
 0xecf   :  { %v5014_v54 = vpop.xlane.xlu1 %5013  ;;  %v5135_v2 = vsel %vm1522_vm8, %v11408_v51, 0.0 }
 0xed0   :  { %v11413_v26 = vpop.eup %9414  ;;  %v5088_v1 = vmul.f32 1.442695, %v5050_v10  ;;  %v5052_v50 = vsub.f32 %v11314_v24, %v5014_v54 }
 0xed1   :  { %v5132_v45 = vsel %vm1529_vm9, %v11413_v26, 0.0 }
 0xed2   :  { %v11418_v17 = vpop.eup %9416  ;;  %9424 = vpow2.f32 %v5088_v1  ;;  %5133 = vadd.xlane.f32.xlu0 %v5132_v45  ;;  %5136 = vadd.xlane.f32.xlu1 %v5135_v2  ;;  %v5092_v19 = vmul.f32 1.442695, %v5052_v50 }
 0xed3   :  { %v5017_v3 = vpop.xlane.xlu1 %5016  ;;  %v5138_v61 = vsel %vm1522_vm8, %v11418_v17, 0.0  ;;  %9426 = vpow2.f32 %v5090_v58 }
 0xed4   :  { %v11422_v7 = vpop.eup %9418  ;;  %v5053_v22 = vsub.f32 %v11318_v43, %v5017_v3  ;;  %9428 = vpow2.f32 %v5092_v19 }
 0xed5   :  { %v5020_v28 = vpop.xlane.xlu0 %5019  ;;  %v5144_v24 = vsel %vm1522_vm8, %v11422_v7, 0.0 }
 0xed6   :  { %v11427_v14 = vpop.eup %9420  ;;  %v5054_v30 = vsub.f32 %v11322_v11, %v5020_v28  ;;  %5145 = vadd.xlane.f32.xlu0 %v5144_v24  ;;  %5139 = vadd.xlane.f32.xlu1 %v5138_v61  ;;  %v5094_v56 = vmul.f32 1.442695, %v5053_v22 }
 0xed7   :  { %v5141_v44 = vsel %vm1529_vm9, %v11427_v14, 0.0  ;;  %v11468_v45 = vpop.permute.xlu1 %4208 }
 0xed8   :  { %v11432_v12 = vpop.eup %9422  ;;  %v5096_v29 = vmul.f32 1.442695, %v5054_v30 }
 0xed9   :  { %v5023_v35 = vpop.xlane.xlu0 %5022  ;;  %v5147_v43 = vsel %vm1522_vm8, %v11432_v12, 0.0 }
 0xeda   :  { %9430 = vpow2.f32 %v5096_v29  ;;  %v5055_v0 = vsub.f32 %v11328_v48, %v5023_v35  ;;  %5142 = vadd.xlane.f32.xlu0 %v5141_v44  ;;  %5148 = vadd.xlane.f32.xlu1 %v5147_v43 }
 0xedb   :  { %9432 = vpow2.f32 %v5094_v56  ;;  %v11470_v3 = vpop.permute.xlu1 %9251 }
 0xedc   :  { %v11437_v11 = vpop.eup %9424  ;;  %v5098_v15 = vmul.f32 1.442695, %v5055_v0 }
 0xedd   :  { %v5026_v40 = vpop.xlane.xlu0 %5025  ;;  %v5150_v21 = vsel %vm1529_vm9, %v11437_v11, 0.0  ;;  %v11441_v36 = vpop.eup %9426 }
 0xede   :  { %9434 = vpow2.f32 %v5098_v15  ;;  %v5056_v49 = vsub.f32 %v11334_v63, %v5026_v40  ;;  %5151 = vadd.xlane.f32.xlu0 %v5150_v21  ;;  %v5153_v48 = vsel %vm1522_vm8, %v11441_v36, 0.0  ;;  %v11446_v37 = vpop.eup %9428  ;;  %v9239_v40 = vunpack.i.h.bf16 %v11370_v25 }
 0xedf   :  { %v5156_v10 = vsel %vm1522_vm8, %v11446_v37, 0.0  ;;  %v9238_v21 = vunpack.i.l.bf16 %v11370_v25 }
 0xee0   :  { %v5100_v27 = vmul.f32 1.442695, %v5056_v49 }
 0xee1   :  { %v11473_v22 = vpop.permute.xlu0 %9246 }
 0xee2   :  { %9436 = vpow2.f32 %v5100_v27  ;;  %5154 = vadd.xlane.f32.xlu0 %v5153_v48  ;;  %v9076_v48 = vpack.c.bf16 %v9239_v40, %v9238_v21 }
 0xee4   :  { %v11448_v32 = vpop.eup %9430 }
 0xee5   :  { %v5162_v39 = vsel %vm1522_vm8, %v11448_v32, 0.0  ;;  %v11454_v54 = vpop.eup %9432 }
 0xee6   :  { %5163 = vadd.xlane.f32.xlu1 %v5162_v39  ;;  %5157 = vadd.xlane.f32.xlu0 %v5156_v10  ;;  %v5159_v58 = vsel %vm1529_vm9, %v11454_v54, 0.0 }
 0xee8   :  { %v11456_v63 = vpop.eup %9434 }
 0xee9   :  { %v5165_v2 = vsel %vm1522_vm8, %v11456_v63, 0.0 }
 0xeea   :  { %5166 = vadd.xlane.f32.xlu1 %v5165_v2  ;;  %5160 = vadd.xlane.f32.xlu0 %v5159_v58 }
 0xeec   :  { %v11462_v1 = vpop.eup %9436 }
 0xeed   :  { %v5168_v50 = vsel %vm1529_vm9, %v11462_v1, 0.0 }
 0xeee   :  { %5169 = vadd.xlane.f32.xlu0 %v5168_v50 }
 0xefb   :  { %4216 = vrot.lane.b32.xlu1 %v11024_v62, %s12025_s8 }
 0xf0c   :  { %v5029_v61 = vpop.xlane.xlu1 %5028 }
 0xf0d   :  { %v5057_v19 = vsub.f32 %v11326_v38, %v5029_v61 }
 0xf0f   :  { %v5102_v28 = vmul.f32 1.442695, %v5057_v19 }
 0xf10   :  { %v5032_v24 = vpop.xlane.xlu1 %5031 }
 0xf11   :  { %9438 = vpow2.f32 %v5102_v28  ;;  %v5058_v30 = vsub.f32 %v11332_v52, %v5032_v24  ;;  %v9243_v28 = vunpack.i.l.bf16 %v11372_v8 }
 0xf12   :  { %v5110_v44 = vpop.xlane.xlu0 %5109 }
 0xf13   :  { %9440 = vrcp.f32 %v5110_v44  ;;  %v5104_v29 = vmul.f32 1.442695, %v5058_v30 }
 0xf14   :  { %v5035_v56 = vpop.xlane.xlu1 %5034 }
 0xf15   :  { %9442 = vpow2.f32 %v5104_v29  ;;  %v5059_v35 = vsub.f32 %v11338_v42, %v5035_v56 }
 0xf16   :  { %v5113_v43 = vpop.xlane.xlu0 %5112 }
 0xf17   :  { %9444 = vrcp.f32 %v5113_v43  ;;  %v5106_v0 = vmul.f32 1.442695, %v5059_v35 }
 0xf19   :  { %9446 = vpow2.f32 %v5106_v0 }
 0xf1a   :  { %v5116_v15 = vpop.xlane.xlu0 %5115 }
 0xf1b   :  { %v11477_v38 = vpop.eup %9438  ;;  %9448 = vrcp.f32 %v5116_v15 }
 0xf1c   :  { %v5171_v52 = vsel %vm1522_vm8, %v11477_v38, 0.0 }
 0xf1d   :  { %v9441_v49 = vpop.eup %9440  ;;  %5172 = vadd.xlane.f32.xlu0 %v5171_v52  ;;  %v9249_v52 = vunpack.i.h.bf16 %v11473_v22 }
 0xf1e   :  { %v5204_v27 = vmul.f32 %v9441_v49, %v11353_v34  ;;  %v9248_v49 = vunpack.i.l.bf16 %v11473_v22  ;;  %v9253_v22 = vunpack.i.l.bf16 %v11470_v3 }
 0xf1f   :  { %v11484_v42 = vpop.eup %9442 }
 0xf20   :  { %8621 = vmatmul.mubr.msk.f32.vlgmr.msra.gmra.mrb[146].mxu0 %vm1522_vm8, %v5204_v27  ;;  %v5174_v39 = vsel %vm1522_vm8, %v11484_v42, 0.0 }
 0xf21   :  { %v9445_v10 = vpop.eup %9444  ;;  %9077 = vmatpush3.bf16.msra.mxu0 %v9076_v48  ;;  %8623 = vmatprep.mubr.msk.f32.mxu0 %vm9539_vm4, %v9540_v13  ;;  %v9254_v48 = vunpack.i.h.bf16 %v11470_v3 }
 0xf22   :  { %8648 = vmatprep.subr.mxu0 %v9540_v13  ;;  %5175 = vadd.xlane.f32.xlu0 %v5174_v39  ;;  %v5205_v25 = vmul.f32 %v9445_v10, %v11359_v5  ;;  %v11509_v5 = vpop.permute.xlu1 %9256  ;;  %v9085_v10 = vpack.c.bf16 %v9249_v52, %v9248_v49  ;;  %v7486_v52 = vld [vmem:[%s11978_s13 + $0x50] sm:$0xff] }
 0xf23   :  { %v11493_v2 = vpop.eup %9446  ;;  %v9088_v3 = vpack.c.bf16 %v9254_v48, %v9253_v22 }
 0xf24   :  { %8624 = vmatmul.mubr.msk.f32.gmra.mrb[148].mxu0 %vm1522_vm8, %v5205_v25  ;;  %v5177_v34 = vsel %vm1529_vm9, %v11493_v2, 0.0 }
 0xf25   :  { %v9449_v58 = vpop.eup %9448  ;;  %8649 = vmatpush3.msk.msra.mxu0 %vm207_vm2, %v11345_v4  ;;  %8626 = vmatprep.mubr.msk.f32.mxu0 %vm9539_vm4, %v9540_v13 }
 0xf26   :  { %5178 = vadd.xlane.f32.xlu0 %v5177_v34  ;;  %v5206_v50 = vmul.f32 %v9449_v58, %v11365_v47  ;;  %9081 = vmatprep.subr.bf16.mxu0 %v9538_v9  ;;  %v9244_v47 = vunpack.i.h.bf16 %v11372_v8 }
 0xf28   :  { %8627 = vmatmul.mubr.msk.f32.gmra.mrb[150].mxu0 %vm1522_vm8, %v5206_v50  ;;  %v9079_v35 = vpack.c.bf16 %v9244_v47, %v9243_v28 }
 0xf29   :  { %8650 = vmatprep.mubr.msk.f32.mxu0 %vm9539_vm4, %v9540_v13 }
 0xf3c   :  { %4224 = vrot.lane.b32.xlu0 %v11024_v62, %s12026_s10 }
 0xf51   :  { %v5119_v61 = vpop.xlane.xlu1 %5118 }
 0xf52   :  { %9450 = vrcp.f32 %v5119_v61 }
 0xf53   :  { %v5128_v4 = vpop.xlane.xlu0 %5127 }
 0xf54   :  { %9452 = vrcp.f32 %v5128_v4 }
 0xf57   :  { %v5122_v19 = vpop.xlane.xlu1 %5121 }
 0xf58   :  { %9454 = vrcp.f32 %v5122_v19 }
 0xf5b   :  { %v5131_v24 = vpop.xlane.xlu0 %5130  ;;  %v5125_v30 = vpop.xlane.xlu1 %5124 }
 0xf5c   :  { %v9451_v44 = vpop.eup %9450  ;;  %9456 = vrcp.f32 %v5131_v24  ;;  %v9258_v24 = vunpack.i.l.bf16 %v11509_v5 }
 0xf5d   :  { %v5207_v29 = vmul.f32 %v9451_v44, %v11382_v59  ;;  %9458 = vrcp.f32 %v5125_v30 }
 0xf5e   :  { %v9453_v56 = vpop.eup %9452 }
 0xf5f   :  { %v5210_v43 = vmul.f32 %v9453_v56, %v11387_v16  ;;  %v5134_v0 = vpop.xlane.xlu0 %5133  ;;  %v5137_v15 = vpop.xlane.xlu1 %5136  ;;  %8636 = vmatmul.mubr.msk.f32.vlgmr.msra.gmra.mrb[130].mxu1 %vm1522_vm8, %v5207_v29 }
 0xf60   :  { %9460 = vrcp.f32 %v5134_v0  ;;  %9080 = vmatpush3.bf16.msra.mxu1 %v9079_v35  ;;  %8638 = vmatprep.mubr.msk.f32.mxu1 %vm9539_vm4, %v9540_v13  ;;  %v7484_v0 = vld [vmem:[%s11978_s13 + $0x40] sm:$0xff] }
 0xf61   :  { %9462 = vrcp.f32 %v5137_v15  ;;  %8651 = vmatmul.mubr.msk.f32.vlgmr.msra.gmra.mrb[152].mxu0 %vm1522_vm8, %v5210_v43  ;;  %8663 = vmatprep.subr.mxu1 %v9540_v13 }
 0xf62   :  { %v9455_v8 = vpop.eup %9454  ;;  %9083 = vmatpush3.bf16.msra.mxu0 %v9082_v20  ;;  %8653 = vmatprep.mubr.msk.f32.mxu0 %vm9539_vm4, %v9540_v13 }
 0xf63   :  { %v5146_v59 = vpop.xlane.xlu0 %5145  ;;  %v5140_v16 = vpop.xlane.xlu1 %5139  ;;  %8678 = vmatprep.subr.mxu0 %v9540_v13  ;;  %v5208_v40 = vmul.f32 %v9455_v8, %v11393_v41 }
 0xf64   :  { %9464 = vrcp.f32 %v5146_v59  ;;  %8664 = vmatpush3.msk.msra.mxu1 %vm207_vm2, %v11374_v46 }
 0xf65   :  { %9466 = vrcp.f32 %v5140_v16  ;;  %8639 = vmatmul.mubr.msk.f32.gmra.mrb[132].mxu1 %vm1522_vm8, %v5208_v40  ;;  %9084 = vmatprep.subr.bf16.mxu1 %v9538_v9 }
 0xf66   :  { %v9457_v33 = vpop.eup %9456  ;;  %8679 = vmatpush3.msk.msra.mxu0 %vm207_vm2, %v11024_v62  ;;  %8641 = vmatprep.mubr.msk.f32.mxu1 %vm9539_vm4, %v9540_v13 }
 0xf67   :  { %v9459_v18 = vpop.eup %9458  ;;  %v5143_v20 = vpop.xlane.xlu0 %5142  ;;  %v5211_v41 = vmul.f32 %v9457_v33, %v11403_v23  ;;  %9087 = vmatprep.subr.bf16.mxu0 %v9538_v9 }
 0xf68   :  { %v5149_v21 = vpop.xlane.xlu1 %5148  ;;  %9468 = vrcp.f32 %v5143_v20  ;;  %v5209_v46 = vmul.f32 %v9459_v18, %v11398_v31 }
 0xf69   :  { %9470 = vrcp.f32 %v5149_v21  ;;  %8654 = vmatmul.mubr.msk.f32.gmra.mrb[154].mxu0 %vm1522_vm8, %v5211_v41 }
 0xf6a   :  { %v9461_v62 = vpop.eup %9460  ;;  %8642 = vmatmul.mubr.msk.f32.gmra.mrb[134].mxu1 %vm1522_vm8, %v5209_v46  ;;  %8656 = vmatprep.mubr.msk.f32.mxu0 %vm9539_vm4, %v9540_v13 }
 0xf6b   :  { %v9463_v27 = vpop.eup %9462  ;;  %v5152_v23 = vpop.xlane.xlu0 %5151  ;;  %8665 = vmatprep.mubr.msk.f32.mxu1 %vm9539_vm4, %v9540_v13  ;;  %v5212_v31 = vmul.f32 %v9461_v62, %v11413_v26 }
 0xf6c   :  { %v5213_v39 = vmul.f32 %v9463_v27, %v11408_v51  ;;  %9472 = vrcp.f32 %v5152_v23 }
 0xf6d   :  { %8657 = vmatmul.mubr.msk.f32.gmra.mrb[156].mxu0 %vm1522_vm8, %v5212_v31  ;;  %v7487_v31 = vld [vmem:[%s11978_s13 + $0x58] sm:$0xff] }
 0xf6e   :  { %v9465_v25 = vpop.eup %9464  ;;  %8666 = vmatmul.mubr.msk.f32.vlgmr.msra.gmra.mrb[136].mxu1 %vm1522_vm8, %v5213_v39  ;;  %8680 = vmatprep.mubr.msk.f32.mxu0 %vm9539_vm4, %v9540_v13  ;;  %v7488_v39 = vld [vmem:[%s11978_s13 + $0x60] sm:$0xff] }
 0xf6f   :  { %v9467_v34 = vpop.eup %9466  ;;  %v5216_v58 = vmul.f32 %v9465_v25, %v11422_v7  ;;  %9086 = vmatpush3.bf16.msra.mxu1 %v9085_v10  ;;  %v5155_v26 = vpop.xlane.xlu0 %5154  ;;  %8668 = vmatprep.mubr.msk.f32.mxu1 %vm9539_vm4, %v9540_v13 }
 0xf70   :  { %9474 = vrcp.f32 %v5155_v26  ;;  %8693 = vmatprep.subr.mxu1 %v9540_v13  ;;  %v5214_v51 = vmul.f32 %v9467_v34, %v11418_v17 }
 0xf71   :  { %8681 = vmatmul.mubr.msk.f32.vlgmr.msra.gmra.mrb[158].mxu0 %vm1522_vm8, %v5216_v58 }
 0xf72   :  { %v9469_v50 = vpop.eup %9468  ;;  %8669 = vmatmul.mubr.msk.f32.gmra.mrb[138].mxu1 %vm1522_vm8, %v5214_v51  ;;  %9089 = vmatpush3.bf16.msra.mxu0 %v9088_v3 }
 0xf73   :  { %v9471_v61 = vpop.eup %9470  ;;  %8694 = vmatpush3.msk.msra.mxu1 %vm207_vm2, %v11468_v45  ;;  %v5164_v7 = vpop.xlane.xlu1 %5163  ;;  %8671 = vmatprep.mubr.msk.f32.mxu1 %vm9539_vm4, %v9540_v13  ;;  %v5215_v19 = vmul.f32 %v9469_v50, %v11427_v14 }
 0xf74   :  { %v5158_v4 = vpop.xlane.xlu0 %5157  ;;  %9476 = vrcp.f32 %v5164_v7  ;;  %8683 = vmatprep.mubr.msk.f32.mxu0 %vm9539_vm4, %v9540_v13  ;;  %v5217_v17 = vmul.f32 %v9471_v61, %v11432_v12  ;;  %8708 = vmatprep.subr.mxu0 %v9540_v13  ;;  %v9259_v12 = vunpack.i.h.bf16 %v11509_v5  ;;  %v7489_v7 = vld [vmem:[%s11978_s13 + $0x68] sm:$0xff] }
 0xf75   :  { %9478 = vrcp.f32 %v5158_v4  ;;  %9090 = vmatprep.subr.bf16.mxu1 %v9538_v9 }
 0xf76   :  { %v9473_v47 = vpop.eup %9472  ;;  %8672 = vmatmul.mubr.msk.f32.gmra.mrb[140].mxu1 %vm1522_vm8, %v5215_v19  ;;  %8684 = vmatmul.mubr.msk.f32.gmra.mrb[160].mxu0 %vm1522_vm8, %v5217_v17 }
 0xf77   :  { %v5167_v45 = vpop.xlane.xlu1 %5166  ;;  %8686 = vmatprep.mubr.msk.f32.mxu0 %vm9539_vm4, %v9540_v13  ;;  %v5218_v14 = vmul.f32 %v9473_v47, %v11437_v11  ;;  %8695 = vmatprep.mubr.msk.f32.mxu1 %vm9539_vm4, %v9540_v13  ;;  %v9091_v11 = vpack.c.bf16 %v9259_v12, %v9258_v24 }
 0xf78   :  { %v5161_v28 = vpop.xlane.xlu0 %5160  ;;  %9480 = vrcp.f32 %v5167_v45  ;;  %v7490_v45 = vld [vmem:[%s11978_s13 + $0x70] sm:$0xff] }
 0xf79   :  { %9482 = vrcp.f32 %v5161_v28 }
 0xf7a   :  { %v9475_v30 = vpop.eup %9474  ;;  %8687 = vmatmul.mubr.msk.f32.gmra.mrb[162].mxu0 %vm1522_vm8, %v5218_v14 }
 0xf7b   :  { %v5219_v44 = vmul.f32 %v9475_v30, %v11441_v36  ;;  %v4217_v29 = vpop.permute.xlu1 %4216  ;;  %8710 = vmatprep.mubr.msk.f32.mxu0 %vm9539_vm4, %v9540_v13 }
 0xf7c   :  { %v5170_v56 = vpop.xlane.xlu0 %5169  ;;  %8709 = vmatpush3.msk.msra.mxu0 %vm207_vm2, %v4217_v29 }
 0xf7d   :  { %9484 = vrcp.f32 %v5170_v56  ;;  %8696 = vmatmul.mubr.msk.f32.vlgmr.msra.gmra.mrb[142].mxu1 %vm1522_vm8, %v5219_v44  ;;  %8734 = vmatprep.subr.mxu0 %v9540_v13 }
 0xf7e   :  { %v9477_v5 = vpop.eup %9476  ;;  %9092 = vmatpush3.bf16.msra.mxu1 %v9091_v11  ;;  %8698 = vmatprep.mubr.msk.f32.mxu1 %vm9539_vm4, %v9540_v13 }
 0xf7f   :  { %v9479_v35 = vpop.eup %9478  ;;  %v5222_v36 = vmul.f32 %v9477_v5, %v11448_v32  ;;  %8723 = vmatprep.subr.mxu1 %v9540_v13  ;;  %v7491_v5 = vld [vmem:[%s11978_s13 + $0x78] sm:$0xff] }
 0xf80   :  { %v5220_v43 = vmul.f32 %v9479_v35, %v11446_v37 }
 0xf81   :  { %8711 = vmatmul.mubr.msk.f32.vlgmr.msra.gmra.mrb[164].mxu0 %vm1522_vm8, %v5222_v36 }
 0xf82   :  { %v9481_v15 = vpop.eup %9480  ;;  %8699 = vmatmul.mubr.msk.f32.gmra.mrb[144].mxu1 %vm1522_vm8, %v5220_v43  ;;  %8713 = vmatprep.mubr.msk.f32.mxu0 %vm9539_vm4, %v9540_v13 }
 0xf83   :  { %v9483_v8 = vpop.eup %9482  ;;  %8701 = vmatprep.mubr.msk.f32.mxu1 %vm9539_vm4, %v9540_v13  ;;  %v5223_v32 = vmul.f32 %v9481_v15, %v11456_v63  ;;  %8735 = vmatpush3.msra.mxu0 %v7484_v0 }
 0xf84   :  { %v5221_v37 = vmul.f32 %v9483_v8, %v11454_v54  ;;  %8756 = vmatprep.subr.mxu0 %v9540_v13 }
 0xf85   :  { %8714 = vmatmul.mubr.msk.f32.gmra.mrb[166].mxu0 %vm1522_vm8, %v5223_v32 }
 0xf86   :  { %8702 = vmatmul.mubr.msk.f32.gmra.mrb[146].mxu1 %vm1522_vm8, %v5221_v37  ;;  %8716 = vmatprep.mubr.msk.f32.mxu0 %vm9539_vm4, %v9540_v13 }
 0xf87   :  { %v9485_v59 = vpop.eup %9484  ;;  %8725 = vmatprep.mubr.msk.f32.mxu1 %vm9539_vm4, %v9540_v13 }
 0xf88   :  { %v5224_v16 = vmul.f32 %v9485_v59, %v11462_v1  ;;  %v7485_v1 = vld [vmem:[%s11978_s13 + $0x48] sm:$0xff] }
 0xf8a   :  { %8717 = vmatmul.mubr.msk.f32.gmra.mrb[168].mxu0 %vm1522_vm8, %v5224_v16 }
 0xf8b   :  { %8736 = vmatprep.mubr.msk.f32.mxu0 %vm9539_vm4, %v9540_v13 }
 0xfaa   :  { %v5173_v54 = vpop.xlane.xlu0 %5172 }
 0xfab   :  { %9486 = vrcp.f32 %v5173_v54 }
 0xfaf   :  { %v5176_v63 = vpop.xlane.xlu0 %5175 }
 0xfb0   :  { %9488 = vrcp.f32 %v5176_v63 }
 0xfb3   :  { %v5179_v40 = vpop.xlane.xlu0 %5178 }
 0xfb4   :  { %9490 = vrcp.f32 %v5179_v40 }
 0xfb5   :  { %v9487_v33 = vpop.eup %9486 }
 0xfb6   :  { %v5225_v18 = vmul.f32 %v9487_v33, %v11477_v38 }
 0xfb7   :  { %v4225_v20 = vpop.permute.xlu0 %4224 }
 0xfb8   :  { %8724 = vmatpush3.msk.msra.mxu1 %vm207_vm2, %v4225_v20 }
 0xfb9   :  { %8726 = vmatmul.mubr.msk.f32.vlgmr.msra.gmra.mrb[148].mxu1 %vm1522_vm8, %v5225_v18  ;;  %8745 = vmatprep.subr.mxu1 %v9540_v13 }
 0xfba   :  { %v9489_v21 = vpop.eup %9488  ;;  %8728 = vmatprep.mubr.msk.f32.mxu1 %vm9539_vm4, %v9540_v13  ;;  %8746 = vmatpush3.msra.mxu1 %v7485_v1 }
 0xfbb   :  { %v5226_v41 = vmul.f32 %v9489_v21, %v11484_v42  ;;  %8767 = vmatprep.subr.mxu1 %v9540_v13 }
 0xfbd   :  { %8729 = vmatmul.mubr.msk.f32.gmra.mrb[150].mxu1 %vm1522_vm8, %v5226_v41 }
 0xfbe   :  { %v9491_v38 = vpop.eup %9490  ;;  %8731 = vmatprep.mubr.msk.f32.mxu1 %vm9539_vm4, %v9540_v13 }
 0xfbf   :  { %v5227_v46 = vmul.f32 %v9491_v38, %v11493_v2 }
 0xfc1   :  { %8732 = vmatmul.mubr.msk.f32.gmra.mrb[152].mxu1 %vm1522_vm8, %v5227_v46 }
 0xfc2   :  { %8747 = vmatprep.mubr.msk.f32.mxu1 %vm9539_vm4, %v9540_v13 }
 0xff3   :  { %v5305_v42 = vpop.f32.mrb[146].mxu0 }
 0xff4   :  { %v8622_v49 = vpop.f32.mrb[147].mxu0  ;;  %8737 = vmatmul.mubr.msk.f32.vlgmr.msra.gmra.mrb[170].mxu0 %vm785_vm6, %v5305_v42 }
 0xff5   :  { %8739 = vmatprep.mubr.msk.f32.mxu0 %vm9539_vm4, %v9540_v13  ;;  %8757 = vmatpush3.msra.mxu0 %v7486_v52 }
 0xff6   :  { %8778 = vmatprep.subr.mxu0 %v9540_v13 }
 0xff7   :  { %v5310_v2 = vpop.f32.mrb[148].mxu0 }
 0xff8   :  { %v8625_v62 = vpop.f32.mrb[149].mxu0  ;;  %8740 = vmatmul.mubr.msk.f32.gmra.mrb[172].mxu0 %vm785_vm6, %v5310_v2 }
 0xff9   :  { %8742 = vmatprep.mubr.msk.f32.mxu0 %vm9539_vm4, %v9540_v13 }
 0xffb   :  { %v5315_v27 = vpop.f32.mrb[150].mxu0 }
 0xffc   :  { %v8628_v23 = vpop.f32.mrb[151].mxu0  ;;  %8743 = vmatmul.mubr.msk.f32.gmra.mrb[174].mxu0 %vm785_vm6, %v5315_v27 }
 0xffd   :  { %8758 = vmatprep.mubr.msk.f32.mxu0 %vm9539_vm4, %v9540_v13 }
0x1032   :  { %v5396_v48 = vpop.f32.mrb[130].mxu1 }
0x1033   :  { %v8637_v22 = vpop.f32.mrb[131].mxu1  ;;  %8748 = vmatmul.mubr.msk.f32.vlgmr.msra.gmra.mrb[154].mxu1 %vm785_vm6, %v5396_v48 }
0x1034   :  { %v5487_v10 = vpop.f32.mrb[152].mxu0  ;;  %8750 = vmatprep.mubr.msk.f32.mxu1 %vm9539_vm4, %v9540_v13  ;;  %8768 = vmatpush3.msra.mxu1 %v7487_v31 }
0x1035   :  { %v8652_v25 = vpop.f32.mrb[153].mxu0  ;;  %8759 = vmatmul.mubr.msk.f32.vlgmr.msra.gmra.mrb[176].mxu0 %vm785_vm6, %v5487_v10  ;;  %8789 = vmatprep.subr.mxu1 %v9540_v13 }
0x1036   :  { %8761 = vmatprep.mubr.msk.f32.mxu0 %vm9539_vm4, %v9540_v13  ;;  %8779 = vmatpush3.msra.mxu0 %v7488_v39 }
0x1037   :  { %8800 = vmatprep.subr.mxu0 %v9540_v13 }
0x1038   :  { %v5401_v34 = vpop.f32.mrb[132].mxu1 }
0x1039   :  { %v8640_v58 = vpop.f32.mrb[133].mxu1  ;;  %8751 = vmatmul.mubr.msk.f32.gmra.mrb[156].mxu1 %vm785_vm6, %v5401_v34 }
0x103a   :  { %8753 = vmatprep.mubr.msk.f32.mxu1 %vm9539_vm4, %v9540_v13 }
0x103c   :  { %v5492_v26 = vpop.f32.mrb[154].mxu0 }
0x103d   :  { %v5406_v3 = vpop.f32.mrb[134].mxu1  ;;  %v8655_v51 = vpop.f32.mrb[155].mxu0  ;;  %8762 = vmatmul.mubr.msk.f32.gmra.mrb[178].mxu0 %vm785_vm6, %v5492_v26 }
0x103e   :  { %v8643_v50 = vpop.f32.mrb[135].mxu1  ;;  %8754 = vmatmul.mubr.msk.f32.gmra.mrb[158].mxu1 %vm785_vm6, %v5406_v3  ;;  %8764 = vmatprep.mubr.msk.f32.mxu0 %vm9539_vm4, %v9540_v13 }
0x103f   :  { %8769 = vmatprep.mubr.msk.f32.mxu1 %vm9539_vm4, %v9540_v13 }
0x1040   :  { %v5497_v61 = vpop.f32.mrb[156].mxu0 }
0x1041   :  { %v5578_v4 = vpop.f32.mrb[136].mxu1  ;;  %v8658_v19 = vpop.f32.mrb[157].mxu0  ;;  %8765 = vmatmul.mubr.msk.f32.gmra.mrb[180].mxu0 %vm785_vm6, %v5497_v61 }
0x1042   :  { %v8667_v17 = vpop.f32.mrb[137].mxu1  ;;  %8770 = vmatmul.mubr.msk.f32.vlgmr.msra.gmra.mrb[160].mxu1 %vm785_vm6, %v5578_v4  ;;  %8780 = vmatprep.mubr.msk.f32.mxu0 %vm9539_vm4, %v9540_v13 }
0x1043   :  { %8772 = vmatprep.mubr.msk.f32.mxu1 %vm9539_vm4, %v9540_v13  ;;  %8790 = vmatpush3.msra.mxu1 %v7489_v7 }
0x1044   :  { %v5669_v47 = vpop.f32.mrb[158].mxu0  ;;  %8811 = vmatprep.subr.mxu1 %v9540_v13 }
0x1045   :  { %v5583_v28 = vpop.f32.mrb[138].mxu1  ;;  %v8682_v14 = vpop.f32.mrb[159].mxu0  ;;  %8781 = vmatmul.mubr.msk.f32.vlgmr.msra.gmra.mrb[182].mxu0 %vm785_vm6, %v5669_v47 }
0x1046   :  { %v8670_v12 = vpop.f32.mrb[139].mxu1  ;;  %8773 = vmatmul.mubr.msk.f32.gmra.mrb[162].mxu1 %vm785_vm6, %v5583_v28  ;;  %8783 = vmatprep.mubr.msk.f32.mxu0 %vm9539_vm4, %v9540_v13 }
0x1047   :  { %8775 = vmatprep.mubr.msk.f32.mxu1 %vm9539_vm4, %v9540_v13  ;;  %8801 = vmatpush3.msra.mxu0 %v7490_v45 }
0x1048   :  { %9093 = vmatprep.subr.bf16.mxu0 %v9538_v9 }
0x1049   :  { %v5588_v24 = vpop.f32.mrb[140].mxu1  ;;  %v5674_v30 = vpop.f32.mrb[160].mxu0 }
0x104a   :  { %v8673_v44 = vpop.f32.mrb[141].mxu1  ;;  %v8685_v29 = vpop.f32.mrb[161].mxu0  ;;  %8776 = vmatmul.mubr.msk.f32.gmra.mrb[164].mxu1 %vm785_vm6, %v5588_v24  ;;  %8784 = vmatmul.mubr.msk.f32.gmra.mrb[184].mxu0 %vm785_vm6, %v5674_v30 }
0x104b   :  { %8786 = vmatprep.mubr.msk.f32.mxu0 %vm9539_vm4, %v9540_v13  ;;  %8791 = vmatprep.mubr.msk.f32.mxu1 %vm9539_vm4, %v9540_v13 }
0x104d   :  { %v5679_v56 = vpop.f32.mrb[162].mxu0 }
0x104e   :  { %v8688_v11 = vpop.f32.mrb[163].mxu0  ;;  %8787 = vmatmul.mubr.msk.f32.gmra.mrb[186].mxu0 %vm785_vm6, %v5679_v56 }
0x104f   :  { %8802 = vmatprep.mubr.msk.f32.mxu0 %vm9539_vm4, %v9540_v13 }
0x1050   :  { %v5760_v35 = vpop.f32.mrb[142].mxu1 }
0x1051   :  { %v8697_v36 = vpop.f32.mrb[143].mxu1  ;;  %8792 = vmatmul.mubr.msk.f32.vlgmr.msra.gmra.mrb[166].mxu1 %vm785_vm6, %v5760_v35 }
0x1052   :  { %8794 = vmatprep.mubr.msk.f32.mxu1 %vm9539_vm4, %v9540_v13  ;;  %8812 = vmatpush3.msra.mxu1 %v7491_v5  ;;  %v11741_v5 = vld [vmem:[%s11979_s14 + $0x1] ss:$0 sm:$0xff] }
0x1053   :  { %9099 = vmatprep.subr.bf16.mxu1 %v9538_v9 }
0x1054   :  { %v5851_v43 = vpop.f32.mrb[164].mxu0 }
0x1055   :  { %v5765_v0 = vpop.f32.mrb[144].mxu1  ;;  %v8712_v15 = vpop.f32.mrb[165].mxu0  ;;  %8803 = vmatmul.mubr.msk.f32.vlgmr.msra.gmra.mrb[188].mxu0 %vm785_vm6, %v5851_v43 }
0x1056   :  { %v8700_v8 = vpop.f32.mrb[145].mxu1  ;;  %8795 = vmatmul.mubr.msk.f32.gmra.mrb[168].mxu1 %vm785_vm6, %v5765_v0  ;;  %8805 = vmatprep.mubr.msk.f32.mxu0 %vm9539_vm4, %v9540_v13 }
0x1057   :  { %8797 = vmatprep.mubr.msk.f32.mxu1 %vm9539_vm4, %v9540_v13 }
0x1058   :  { %v5856_v32 = vpop.f32.mrb[166].mxu0 }
0x1059   :  { %v5770_v37 = vpop.f32.mrb[146].mxu1  ;;  %v8715_v59 = vpop.f32.mrb[167].mxu0  ;;  %8806 = vmatmul.mubr.msk.f32.gmra.mrb[190].mxu0 %vm785_vm6, %v5856_v32 }
0x105a   :  { %v8703_v16 = vpop.f32.mrb[147].mxu1  ;;  %8798 = vmatmul.mubr.msk.f32.gmra.mrb[170].mxu1 %vm785_vm6, %v5770_v37  ;;  %8808 = vmatprep.mubr.msk.f32.mxu0 %vm9539_vm4, %v9540_v13 }
0x105b   :  { %8813 = vmatprep.mubr.msk.f32.mxu1 %vm9539_vm4, %v9540_v13 }
0x105d   :  { %v5861_v54 = vpop.f32.mrb[168].mxu0 }
0x105e   :  { %v8718_v63 = vpop.f32.mrb[169].mxu0  ;;  %8809 = vmatmul.mubr.msk.f32.gmra.mrb[192].mxu0 %vm785_vm6, %v5861_v54 }
0x105f   :  { %8830 = vmatprep.mubr.msk.f32.mxu0 %vm9539_vm4, %v9540_v13 }
0x108c   :  { %v5942_v40 = vpop.f32.mrb[148].mxu1 }
0x108d   :  { %v8727_v33 = vpop.f32.mrb[149].mxu1  ;;  %8814 = vmatmul.mubr.msk.f32.vlgmr.msra.gmra.mrb[172].mxu1 %vm785_vm6, %v5942_v40 }
0x108e   :  { %8816 = vmatprep.mubr.msk.f32.mxu1 %vm9539_vm4, %v9540_v13 }
0x1090   :  { %v5947_v18 = vpop.f32.mrb[150].mxu1 }
0x1091   :  { %v8730_v20 = vpop.f32.mrb[151].mxu1  ;;  %8817 = vmatmul.mubr.msk.f32.gmra.mrb[174].mxu1 %vm785_vm6, %v5947_v18 }
0x1092   :  { %8819 = vmatprep.mubr.msk.f32.mxu1 %vm9539_vm4, %v9540_v13 }
0x1094   :  { %v5952_v1 = vpop.f32.mrb[152].mxu1 }
0x1095   :  { %v8733_v21 = vpop.f32.mrb[153].mxu1  ;;  %8820 = vmatmul.mubr.msk.f32.gmra.mrb[176].mxu1 %vm785_vm6, %v5952_v1 }
0x1096   :  { %8877 = vmatprep.mubr.msk.f32.mxu1 %vm9539_vm4, %v9540_v13 }
0x10c7   :  { %v6040_v41 = vpop.f32.mrb[170].mxu0 }
0x10c8   :  { %v8738_v38 = vpop.f32.mrb[171].mxu0  ;;  %v6677_v62 = vsel %vm224_vm1, %v6040_v41, 0.0 }
0x10cb   :  { %v6045_v46 = vpop.f32.mrb[172].mxu0 }
0x10cc   :  { %v8741_v52 = vpop.f32.mrb[173].mxu0  ;;  %v6684_v34 = vsel %vm224_vm1, %v6045_v46, 0.0 }
0x10cf   :  { %v6050_v42 = vpop.f32.mrb[174].mxu0 }
0x10d0   :  { %v8744_v49 = vpop.f32.mrb[175].mxu0  ;;  %v6691_v4 = vsel %vm3250_vm10, %v6050_v42, 0.0 }
0x1106   :  { %v6129_v2 = vpop.f32.mrb[154].mxu1 }
0x1107   :  { %v6678_v27 = vsel %vm224_vm1, %v6129_v2, 0.0  ;;  %v8749_v23 = vpop.f32.mrb[155].mxu1 }
0x1108   :  { %v6679_v31 = vadd.f32 %v6678_v27, %v6677_v62  ;;  %v6218_v48 = vpop.f32.mrb[176].mxu0 }
0x1109   :  { %v6680_v22 = vsel %vm224_vm1, %v6218_v48, 0.0  ;;  %v8760_v39 = vpop.f32.mrb[177].mxu0 }
0x110a   :  { %v6681_v10 = vadd.f32 %v6680_v22, %v6679_v31 }
0x110c   :  { %v6134_v25 = vpop.f32.mrb[156].mxu1 }
0x110d   :  { %v6685_v58 = vsel %vm224_vm1, %v6134_v25, 0.0  ;;  %v8752_v26 = vpop.f32.mrb[157].mxu1 }
0x110e   :  { %v6686_v3 = vadd.f32 %v6685_v58, %v6684_v34 }
0x1110   :  { %v6223_v51 = vpop.f32.mrb[178].mxu0 }
0x1111   :  { %v6139_v50 = vpop.f32.mrb[158].mxu1  ;;  %v6687_v61 = vsel %vm224_vm1, %v6223_v51, 0.0  ;;  %v8763_v7 = vpop.f32.mrb[179].mxu0 }
0x1112   :  { %v6692_v19 = vsel %vm3250_vm10, %v6139_v50, 0.0  ;;  %v6688_v17 = vadd.f32 %v6687_v61, %v6686_v3  ;;  %v8755_v47 = vpop.f32.mrb[159].mxu1 }
0x1113   :  { %v6693_v45 = vadd.f32 %v6692_v19, %v6691_v4 }
0x1114   :  { %v6228_v28 = vpop.f32.mrb[180].mxu0 }
0x1115   :  { %v6694_v14 = vsel %vm3250_vm10, %v6228_v28, 0.0  ;;  %v6307_v12 = vpop.f32.mrb[160].mxu1  ;;  %v8766_v24 = vpop.f32.mrb[181].mxu0 }
0x1116   :  { %v6695_v30 = vadd.f32 %v6694_v14, %v6693_v45  ;;  %v6682_v44 = vsel %vm224_vm1, %v6307_v12, 0.0  ;;  %v8771_v29 = vpop.f32.mrb[161].mxu1 }
0x1117   :  { %v6683_v56 = vadd.f32 %v6682_v44, %v6681_v10 }
0x1118   :  { %v6396_v11 = vpop.f32.mrb[182].mxu0 }
0x1119   :  { %v6731_v35 = vadd.f32 %v6683_v56, %v10843_v60  ;;  %v6312_v36 = vpop.f32.mrb[162].mxu1  ;;  %v8782_v43 = vpop.f32.mrb[183].mxu0  ;;  %v6698_v41 = vsel %vm224_vm1, %v6396_v11, 0.0 }
0x111a   :  { %v6689_v0 = vsel %vm224_vm1, %v6312_v36, 0.0  ;;  %v8774_v15 = vpop.f32.mrb[163].mxu1 }
0x111b   :  { %v6690_v8 = vadd.f32 %v6689_v0, %v6688_v17  ;;  %v11746_v32 = vadd.f32 %v11741_v5, %v6731_v35 }
0x111d   :  { %v6732_v37 = vadd.f32 %v6690_v8, %v10848_v57  ;;  %v6317_v59 = vpop.f32.mrb[164].mxu1  ;;  %v6401_v16 = vpop.f32.mrb[184].mxu0  ;;  %v6753_v54 = vsel %vm224_vm1, %v11746_v32, 0.0 }
0x111e   :  { %v6696_v63 = vsel %vm3250_vm10, %v6317_v59, 0.0  ;;  %v8785_v40 = vpop.f32.mrb[185].mxu0  ;;  %6754 = vadd.xlane.f32.xlu1 %v6753_v54  ;;  %v8777_v60 = vpop.f32.mrb[165].mxu1  ;;  %v6705_v27 = vsel %vm224_vm1, %v6401_v16, 0.0 }
0x111f   :  { %v6697_v33 = vadd.f32 %v6696_v63, %v6695_v30  ;;  %v11753_v18 = vadd.f32 %v11741_v5, %v6732_v37 }
0x1121   :  { %v6406_v20 = vpop.f32.mrb[186].mxu0  ;;  %v6756_v1 = vsel %vm224_vm1, %v11753_v18, 0.0 }
0x1122   :  { %v8788_v21 = vpop.f32.mrb[187].mxu0  ;;  %6757 = vadd.xlane.f32.xlu0 %v6756_v1  ;;  %v6712_v58 = vsel %vm3250_vm10, %v6406_v20, 0.0 }
0x1124   :  { %v6485_v57 = vpop.f32.mrb[166].mxu1 }
0x1125   :  { %v6699_v38 = vsel %vm224_vm1, %v6485_v57, 0.0  ;;  %v8793_v46 = vpop.f32.mrb[167].mxu1 }
0x1126   :  { %v6700_v52 = vadd.f32 %v6699_v38, %v6698_v41 }
0x1128   :  { %v6574_v42 = vpop.f32.mrb[188].mxu0 }
0x1129   :  { %v6701_v49 = vsel %vm224_vm1, %v6574_v42, 0.0  ;;  %v6490_v2 = vpop.f32.mrb[168].mxu1  ;;  %v8804_v62 = vpop.f32.mrb[189].mxu0 }
0x112a   :  { %v6702_v23 = vadd.f32 %v6701_v49, %v6700_v52  ;;  %v6706_v31 = vsel %vm224_vm1, %v6490_v2, 0.0  ;;  %v8796_v48 = vpop.f32.mrb[169].mxu1  ;;  %v7523_v52 = vld [vmem:[%s11982_s17 + $0x28] sm:$0xff]  ;;  %v7525_v49 = vld [vmem:[%s11982_s17 + $0x38] sm:$0xff] }
0x112b   :  { %v6707_v22 = vadd.f32 %v6706_v31, %v6705_v27 }
0x112c   :  { %v6579_v39 = vpop.f32.mrb[190].mxu0 }
0x112d   :  { %v6708_v10 = vsel %vm224_vm1, %v6579_v39, 0.0  ;;  %v6495_v25 = vpop.f32.mrb[170].mxu1  ;;  %v8807_v34 = vpop.f32.mrb[191].mxu0 }
0x112e   :  { %v6709_v26 = vadd.f32 %v6708_v10, %v6707_v22  ;;  %v6713_v3 = vsel %vm3250_vm10, %v6495_v25, 0.0  ;;  %v8799_v51 = vpop.f32.mrb[171].mxu1 }
0x112f   :  { %v6714_v50 = vadd.f32 %v6713_v3, %v6712_v58 }
0x1131   :  { %v6584_v61 = vpop.f32.mrb[192].mxu0 }
0x1132   :  { %v6715_v7 = vsel %vm3250_vm10, %v6584_v61, 0.0  ;;  %v8810_v4 = vpop.f32.mrb[193].mxu0  ;;  %v7533_v61 = vld [vmem:[%s11984_s19 + $0x80] sm:$0xff] }
0x1133   :  { %v6716_v19 = vadd.f32 %v6715_v7, %v6714_v50  ;;  %v7534_v7 = vld [vmem:[%s11984_s19 + $0x88] sm:$0xff]  ;;  %v7535_v4 = vld [vmem:[%s11984_s19 + $0x90] sm:$0xff] }
0x1160   :  { %v6663_v17 = vpop.f32.mrb[172].mxu1 }
0x1161   :  { %v6703_v47 = vsel %vm224_vm1, %v6663_v17, 0.0  ;;  %v8815_v45 = vpop.f32.mrb[173].mxu1  ;;  %v7536_v17 = vld [vmem:[%s11984_s19 + $0x98] sm:$0xff] }
0x1162   :  { %v6704_v28 = vadd.f32 %v6703_v47, %v6702_v23  ;;  %v9103_v47 = vpack.c.bf16 %v7536_v17, %v7535_v4  ;;  %v7537_v45 = vld [vmem:[%s11984_s19 + $0xa0] sm:$0xff] }
0x1164   :  { %v6722_v14 = vrot.slane %v6704_v28, 7  ;;  %v6668_v12 = vpop.f32.mrb[174].mxu1  ;;  %v7538_v28 = vld [vmem:[%s11984_s19 + $0xa8] sm:$0xff] }
0x1165   :  { %v6710_v24 = vsel %vm224_vm1, %v6668_v12, 0.0  ;;  %v8818_v30 = vpop.f32.mrb[175].mxu1 }
0x1166   :  { %v6730_v44 = vsel %vm207_vm2, %v6697_v33, %v6722_v14  ;;  %v6711_v29 = vadd.f32 %v6710_v24, %v6709_v26 }
0x1167   :  { %v6733_v56 = vadd.f32 %v6730_v44, %v10853_v53 }
0x1168   :  { %v6723_v11 = vrot.slane %v6711_v29, 7  ;;  %v6673_v35 = vpop.f32.mrb[176].mxu1 }
0x1169   :  { %v6717_v36 = vsel %vm3250_vm10, %v6673_v35, 0.0  ;;  %v8821_v43 = vpop.f32.mrb[177].mxu1  ;;  %v11772_v0 = vadd.f32 %v11741_v5, %v6733_v56  ;;  %v7520_v35 = vld [vmem:[%s11980_s15 + $0x1] ss:$0 sm:$0xff] }
0x116a   :  { %v6724_v15 = vsel %vm207_vm2, %v6722_v14, %v6723_v11  ;;  %v6718_v8 = vadd.f32 %v6717_v36, %v6716_v19  ;;  %v9100_v19 = vpack.c.bf16 %v7534_v7, %v7533_v61  ;;  %v9106_v14 = vpack.c.bf16 %v7538_v28, %v7537_v45  ;;  %v7521_v43 = vld [vmem:[%s11981_s16 + $0x1] ss:$0 sm:$0xff] }
0x116b   :  { %v6759_v37 = vsel %vm224_vm1, %v11772_v0, 0.0  ;;  %v6734_v59 = vadd.f32 %v6724_v15, %v10858_v6  ;;  %v7527_v7 = vld [vmem:[%s11983_s18 + $0x1] ss:$0 sm:$0xff] }
0x116c   :  { %v6725_v16 = vrot.slane %v6718_v8, 7  ;;  %6760 = vadd.xlane.f32.xlu1 %v6759_v37  ;;  %9101 = vmatpush3.bf16.msra.mxu1 %v9100_v19 }
0x116d   :  { %v6747_v53 = vadd.f32 %v11741_v5, %v6734_v59  ;;  %9102 = vmatprep.subr.bf16.mxu1 %v9538_v9 }
0x116e   :  { %v6726_v54 = vsel %vm207_vm2, %v6723_v11, %v6725_v16 }
0x116f   :  { %v6735_v63 = vadd.f32 %v6726_v54, %v10863_v55  ;;  %v6762_v40 = vsel %vm224_vm1, %v6747_v53, 0.0 }
0x1170   :  { %6763 = vadd.xlane.f32.xlu1 %v6762_v40  ;;  %9104 = vmatpush3.bf16.msra.mxu1 %v9103_v47 }
0x1171   :  { %v11783_v60 = vadd.f32 %v11741_v5, %v6735_v63  ;;  %9105 = vmatprep.subr.bf16.mxu1 %v9538_v9 }
0x1173   :  { %v6765_v33 = vsel %vm237_vm3, %v11783_v60, 0.0 }
0x1174   :  { %6766 = vadd.xlane.f32.xlu1 %v6765_v33  ;;  %9107 = vmatpush3.bf16.msra.mxu1 %v9106_v14 }
0x1175   :  { %9108 = vmatprep.subr.bf16.mxu1 %v9538_v9 }
0x11ab   :  { %v6755_v20 = vpop.xlane.xlu1 %6754 }
0x11ac   :  { %v6768_v6 = vmul.f32 0.03125, %v6755_v20 }
0x11ae   :  { %v11788_v1 = vsub.f32 %v11746_v32, %v6768_v6  ;;  %v7522_v32 = vld [vmem:[%s11982_s17 + $0x20] sm:$0xff] }
0x11af   :  { %v6758_v21 = vpop.xlane.xlu0 %6757  ;;  %v9094_v42 = vpack.c.bf16 %v7523_v52, %v7522_v32 }
0x11b0   :  { %v6769_v57 = vmul.f32 0.03125, %v6758_v21  ;;  %v6778_v55 = vmul.f32 %v11788_v1, %v11788_v1 }
0x11b1   :  { %9095 = vmatpush3.bf16.msra.mxu0 %v9094_v42 }
0x11b2   :  { %v11793_v41 = vsub.f32 %v11753_v18, %v6769_v57  ;;  %v6783_v5 = vsel %vm224_vm1, %v6778_v55, 0.0  ;;  %9096 = vmatprep.subr.bf16.mxu0 %v9538_v9  ;;  %v7524_v18 = vld [vmem:[%s11982_s17 + $0x30] sm:$0xff] }
0x11b3   :  { %6784 = vadd.xlane.f32.xlu1 %v6783_v5  ;;  %v9097_v2 = vpack.c.bf16 %v7525_v49, %v7524_v18 }
0x11b4   :  { %v6779_v38 = vmul.f32 %v11793_v41, %v11793_v41 }
0x11b5   :  { %9098 = vmatpush3.bf16.msra.mxu0 %v9097_v2 }
0x11b6   :  { %v6786_v46 = vsel %vm224_vm1, %v6779_v38, 0.0  ;;  %9123 = vmatprep.subr.bf16.mxu0 %v9538_v9 }
0x11b7   :  { %6787 = vadd.xlane.f32.xlu0 %v6786_v46 }
0x11f9   :  { %v6761_v62 = vpop.xlane.xlu1 %6760 }
0x11fa   :  { %v6770_v27 = vmul.f32 0.03125, %v6761_v62  ;;  %v7539_v62 = vld [vmem:[%s11984_s19 + $0xb0] sm:$0xff] }
0x11fc   :  { %v11814_v23 = vsub.f32 %v11772_v0, %v6770_v27  ;;  %v7540_v27 = vld [vmem:[%s11984_s19 + $0xb8] sm:$0xff] }
0x11fd   :  { %v6764_v31 = vpop.xlane.xlu1 %6763 }
0x11fe   :  { %v6771_v48 = vmul.f32 0.03125, %v6764_v31  ;;  %v6780_v22 = vmul.f32 %v11814_v23, %v11814_v23 }
0x1200   :  { %v11818_v39 = vsub.f32 %v6747_v53, %v6771_v48  ;;  %v6789_v10 = vsel %vm224_vm1, %v6780_v22, 0.0  ;;  %v7541_v48 = vld [vmem:[%s11984_s19 + $0xc0] sm:$0xff]  ;;  %v7542_v22 = vld [vmem:[%s11984_s19 + $0xc8] sm:$0xff] }
0x1201   :  { %6790 = vadd.xlane.f32.xlu1 %v6789_v10  ;;  %v6767_v25 = vpop.xlane.xlu1 %6766  ;;  %v7543_v10 = vld [vmem:[%s11984_s19 + $0xd0] sm:$0xff] }
0x1202   :  { %v6772_v34 = vmul.f32 0.03125, %v6767_v25  ;;  %v6781_v58 = vmul.f32 %v11818_v39, %v11818_v39  ;;  %v7544_v25 = vld [vmem:[%s11984_s19 + $0xd8] sm:$0xff] }
0x1204   :  { %v11824_v26 = vsub.f32 %v11783_v60, %v6772_v34  ;;  %v6792_v3 = vsel %vm224_vm1, %v6781_v58, 0.0  ;;  %v9115_v34 = vpack.c.bf16 %v7544_v25, %v7543_v10  ;;  %v7545_v58 = vld [vmem:[%s11984_s19 + $0xe0] sm:$0xff] }
0x1205   :  { %6793 = vadd.xlane.f32.xlu0 %v6792_v3 }
0x1206   :  { %v6782_v51 = vmul.f32 %v11824_v26, %v11824_v26 }
0x1208   :  { %v6795_v50 = vsel %vm237_vm3, %v6782_v51, 0.0  ;;  %v7547_v51 = vld [vmem:[%s11984_s19 + $0xf0] sm:$0xff] }
0x1209   :  { %6796 = vadd.xlane.f32.xlu1 %v6795_v50  ;;  %v7548_v50 = vld [vmem:[%s11984_s19 + $0xf8] sm:$0xff] }
0x120a   :  { %v9121_v61 = vpack.c.bf16 %v7548_v50, %v7547_v51 }
0x1240   :  { %v6785_v12 = vpop.xlane.xlu1 %6784 }
0x1241   :  { %v6798_v24 = vmul.f32 0.03125, %v6785_v12 }
0x1243   :  { %v6803_v30 = vadd.f32 1e-06, %v6798_v24 }
0x1244   :  { %v6788_v44 = vpop.xlane.xlu0 %6787 }
0x1245   :  { %9492 = vrsqrt.f32 %v6803_v30  ;;  %v6799_v29 = vmul.f32 0.03125, %v6788_v44 }
0x1247   :  { %v6804_v56 = vadd.f32 1e-06, %v6799_v29 }
0x1249   :  { %9494 = vrsqrt.f32 %v6804_v56 }
0x124f   :  { %v9493_v11 = vpop.eup %9492 }
0x1250   :  { %v6813_v36 = vmul.f32 %v9493_v11, %v11788_v1 }
0x1252   :  { %v6824_v15 = vmul.f32 %v7520_v35, %v6813_v36 }
0x1253   :  { %v9495_v8 = vpop.eup %9494 }
0x1254   :  { %v6835_v37 = vadd.f32 %v7521_v43, %v6824_v15  ;;  %v6814_v59 = vmul.f32 %v9495_v8, %v11793_v41 }
0x1256   :  { %8831 = vmatmul.mubr.msk.f32.vlgmr.msra.gmra.mrb[194].mxu0 %vm224_vm1, %v6835_v37  ;;  %v6825_v16 = vmul.f32 %v7520_v35, %v6814_v59 }
0x1257   :  { %8833 = vmatprep.mubr.msk.f32.mxu0 %vm9539_vm4, %v9540_v13 }
0x1258   :  { %v6836_v53 = vadd.f32 %v7521_v43, %v6825_v16 }
0x125a   :  { %8834 = vmatmul.mubr.msk.f32.gmra.mrb[196].mxu0 %vm224_vm1, %v6836_v53 }
0x125b   :  { %8836 = vmatprep.mubr.msk.f32.mxu0 %vm9539_vm4, %v9540_v13 }
0x128e   :  { %v6791_v54 = vpop.xlane.xlu1 %6790 }
0x128f   :  { %v6800_v63 = vmul.f32 0.03125, %v6791_v54 }
0x1291   :  { %v6805_v40 = vadd.f32 1e-06, %v6800_v63 }
0x1292   :  { %v6794_v33 = vpop.xlane.xlu0 %6793 }
0x1293   :  { %9496 = vrsqrt.f32 %v6805_v40  ;;  %v6801_v20 = vmul.f32 0.03125, %v6794_v33 }
0x1295   :  { %v6806_v6 = vadd.f32 1e-06, %v6801_v20 }
0x1296   :  { %v6797_v1 = vpop.xlane.xlu1 %6796 }
0x1297   :  { %9498 = vrsqrt.f32 %v6806_v6  ;;  %v6802_v21 = vmul.f32 0.03125, %v6797_v1 }
0x1299   :  { %v6807_v57 = vadd.f32 1e-06, %v6802_v21 }
0x129b   :  { %9500 = vrsqrt.f32 %v6807_v57 }
0x129d   :  { %v9497_v55 = vpop.eup %9496 }
0x129e   :  { %v6815_v41 = vmul.f32 %v9497_v55, %v11814_v23  ;;  %v9109_v23 = vpack.c.bf16 %v7540_v27, %v7539_v62 }
0x12a0   :  { %v6826_v5 = vmul.f32 %v7520_v35, %v6815_v41  ;;  %9110 = vmatpush3.bf16.msra.mxu1 %v9109_v23 }
0x12a1   :  { %v9499_v38 = vpop.eup %9498  ;;  %9111 = vmatprep.subr.bf16.mxu1 %v9538_v9 }
0x12a2   :  { %v6837_v46 = vadd.f32 %v7521_v43, %v6826_v5  ;;  %v6816_v32 = vmul.f32 %v9499_v38, %v11818_v39  ;;  %v9112_v39 = vpack.c.bf16 %v7542_v22, %v7541_v48 }
0x12a4   :  { %8837 = vmatmul.mubr.msk.f32.gmra.mrb[198].mxu0 %vm224_vm1, %v6837_v46  ;;  %v6827_v52 = vmul.f32 %v7520_v35, %v6816_v32  ;;  %9113 = vmatpush3.bf16.msra.mxu1 %v9112_v39  ;;  %v7550_v39 = vld [vmem:[%s11985_s20 + $0x1] ss:$0 sm:$0xff] }
0x12a5   :  { %v9501_v42 = vpop.eup %9500  ;;  %8839 = vmatprep.mubr.msk.f32.mxu0 %vm9539_vm4, %v9540_v13  ;;  %9114 = vmatprep.subr.bf16.mxu1 %v9538_v9 }
0x12a6   :  { %v6838_v18 = vadd.f32 %v7521_v43, %v6827_v52  ;;  %v6817_v49 = vmul.f32 %v9501_v42, %v11824_v26  ;;  %v7546_v26 = vld [vmem:[%s11984_s19 + $0xe8] sm:$0xff] }
0x12a7   :  { %v9118_v3 = vpack.c.bf16 %v7546_v26, %v7545_v58 }
0x12a8   :  { %8840 = vmatmul.mubr.msk.f32.gmra.mrb[200].mxu0 %vm224_vm1, %v6838_v18  ;;  %v6828_v2 = vmul.f32 %v7520_v35, %v6817_v49  ;;  %9116 = vmatpush3.bf16.msra.mxu1 %v9115_v34 }
0x12a9   :  { %8842 = vmatprep.mubr.msk.f32.mxu0 %vm9539_vm4, %v9540_v13  ;;  %9117 = vmatprep.subr.bf16.mxu1 %v9538_v9 }
0x12aa   :  { %v6839_v31 = vadd.f32 %v7521_v43, %v6828_v2 }
0x12ac   :  { %8843 = vmatmul.mubr.msk.f32.gmra.mrb[202].mxu0 %vm224_vm1, %v6839_v31  ;;  %9119 = vmatpush3.bf16.msra.mxu1 %v9118_v3 }
0x12ad   :  { %8900 = vmatprep.mubr.msk.f32.mxu0 %vm9539_vm4, %v9540_v13  ;;  %9120 = vmatprep.subr.bf16.mxu1 %v9538_v9 }
0x12b0   :  { %9122 = vmatpush3.bf16.msra.mxu1 %v9121_v61 }
0x1329   :  { %v6934_v4 = vpop.f32.mrb[194].mxu0 }
0x132a   :  { %v6935_v19 = vadd.f32 %v7527_v7, %v6934_v4  ;;  %v8832_v17 = vpop.f32.mrb[195].mxu0  ;;  %v7129_v4 = vld [vmem:[%s11988_s23] sm:$0xff] }
0x132b   :  { %v7131_v17 = vld [vmem:[%s11988_s23 + $0x10] sm:$0xff] }
0x132c   :  { %v6963_v47 = vmul.f32 0.70710677, %v6935_v19  ;;  %v6958_v30 = vmul.f32 0.5, %v6935_v19 }
0x132d   :  { %v6939_v45 = vpop.f32.mrb[196].mxu0 }
0x132e   :  { %9502 = verf.f32 %v6963_v47  ;;  %v6940_v28 = vadd.f32 %v7527_v7, %v6939_v45  ;;  %v8835_v14 = vpop.f32.mrb[197].mxu0  ;;  %v7132_v47 = vld [vmem:[%s11988_s23 + $0x18] sm:$0xff] }
0x132f   :  { %v9127_v45 = vpack.c.bf16 %v7132_v47, %v7131_v17 }
0x1330   :  { %v6964_v12 = vmul.f32 0.70710677, %v6940_v28  ;;  %v6959_v11 = vmul.f32 0.5, %v6940_v28 }
0x1332   :  { %9504 = verf.f32 %v6964_v12 }
0x1338   :  { %v9503_v24 = vpop.eup %9502 }
0x1339   :  { %v6973_v44 = vadd.f32 1.0, %v9503_v24 }
0x133b   :  { %v6978_v29 = vmul.f32 %v6973_v44, %v6958_v30  ;;  %v7551_v30 = vld [vmem:[%s11986_s21] ss:$0 sm:$0xff]  ;;  %s9514_s21 = scalar_lea.vmem %s7221_s26, 32 }
0x133c   :  { %v9505_v56 = vpop.eup %9504  ;;  %v7552_v44 = vld [vmem:[%s11987_s22] ss:$0 sm:$0xff]  ;;  %p9515_p0 = scmp.ne.s32.totalorder %s7221_s26, %s9514_s21  ;;  %p9520_p2 = scmp.lt.s32.totalorder %s9514_s21, %s9514_s21 }
0x133d   :  { %v6974_v35 = vadd.f32 1.0, %v9505_v56  ;;  %8878 = vmatmul.mubr.f32.vlgmr.msra.gmra.mrb[178].mxu1 %v6978_v29 }
0x133e   :  { %8880 = vmatprep.mubr.msk.f32.mxu1 %vm9539_vm4, %v9540_v13  ;;  %p9521_p3 = por %p9520_p2, %p9519_p1 }
0x133f   :  { %v6979_v36 = vmul.f32 %v6974_v35, %v6959_v11  ;;  %v7553_v11 = vld [vmem:[%s11989_s24] ss:$0 sm:$0xff] }
0x1340   :  { %p9522_p4 = pnand %p9521_p3, %p9515_p0 }
0x1341   :  { %8881 = vmatmul.mubr.f32.gmra.mrb[180].mxu1 %v6979_v36 }
0x1342   :  { %8883 = vmatprep.mubr.msk.f32.mxu1 %vm9539_vm4, %v9540_v13 }
0x1377   :  { %v6944_v43 = vpop.f32.mrb[198].mxu0 }
0x1378   :  { %v6945_v15 = vadd.f32 %v7527_v7, %v6944_v43  ;;  %v8838_v8 = vpop.f32.mrb[199].mxu0 }
0x137a   :  { %v6965_v37 = vmul.f32 0.70710677, %v6945_v15  ;;  %v6960_v1 = vmul.f32 0.5, %v6945_v15 }
0x137b   :  { %v6949_v59 = vpop.f32.mrb[200].mxu0 }
0x137c   :  { %9506 = verf.f32 %v6965_v37  ;;  %v6950_v16 = vadd.f32 %v7527_v7, %v6949_v59  ;;  %v8841_v53 = vpop.f32.mrb[201].mxu0 }
0x137e   :  { %v6966_v54 = vmul.f32 0.70710677, %v6950_v16  ;;  %v6961_v41 = vmul.f32 0.5, %v6950_v16 }
0x137f   :  { %v6954_v63 = vpop.f32.mrb[202].mxu0 }
0x1380   :  { %9508 = verf.f32 %v6966_v54  ;;  %v6955_v40 = vadd.f32 %v7527_v7, %v6954_v63  ;;  %v8844_v33 = vpop.f32.mrb[203].mxu0 }
0x1382   :  { %v6967_v20 = vmul.f32 0.70710677, %v6955_v40  ;;  %v6962_v32 = vmul.f32 0.5, %v6955_v40 }
0x1384   :  { %9510 = verf.f32 %v6967_v20 }
0x1386   :  { %v9507_v6 = vpop.eup %9506 }
0x1387   :  { %v6975_v21 = vadd.f32 1.0, %v9507_v6 }
0x1389   :  { %v6980_v57 = vmul.f32 %v6975_v21, %v6960_v1 }
0x138a   :  { %v9509_v55 = vpop.eup %9508 }
0x138b   :  { %v6976_v5 = vadd.f32 1.0, %v9509_v55  ;;  %8884 = vmatmul.mubr.f32.gmra.mrb[182].mxu1 %v6980_v57 }
0x138c   :  { %8886 = vmatprep.mubr.msk.f32.mxu1 %vm9539_vm4, %v9540_v13 }
0x138d   :  { %v6981_v38 = vmul.f32 %v6976_v5, %v6961_v41 }
0x138e   :  { %v9511_v46 = vpop.eup %9510 }
0x138f   :  { %v6977_v52 = vadd.f32 1.0, %v9511_v46  ;;  %8887 = vmatmul.mubr.f32.gmra.mrb[184].mxu1 %v6981_v38 }
0x1390   :  { %8889 = vmatprep.mubr.msk.f32.mxu1 %vm9539_vm4, %v9540_v13 }
0x1391   :  { %v6982_v42 = vmul.f32 %v6977_v52, %v6962_v32 }
0x1393   :  { %8890 = vmatmul.mubr.f32.gmra.mrb[186].mxu1 %v6982_v42 }
0x1410   :  { %v7066_v18 = vpop.f32.mrb[178].mxu1 }
0x1411   :  { %v8879_v49 = vpop.f32.mrb[179].mxu1 }
0x1414   :  { %v7070_v2 = vpop.f32.mrb[180].mxu1 }
0x1415   :  { %v8882_v62 = vpop.f32.mrb[181].mxu1 }
0x145e   :  { %v7074_v27 = vpop.f32.mrb[182].mxu1 }
0x145f   :  { %v8885_v23 = vpop.f32.mrb[183].mxu1  ;;  %v7087_v22 = vadd.f32 %v7074_v27, %v11772_v0 }
0x1461   :  { %v7097_v34 = vadd.f32 %v7550_v39, %v7087_v22 }
0x1462   :  { %v7079_v31 = vpop.f32.mrb[184].mxu1 }
0x1463   :  { %v8888_v48 = vpop.f32.mrb[185].mxu1 }
0x1466   :  { %v7083_v10 = vpop.f32.mrb[186].mxu1 }
0x1467   :  { %v7088_v25 = vadd.f32 %v7083_v10, %v11783_v60  ;;  %v8891_v13 = vpop.f32.mrb[187].mxu1  ;;  %v7130_v60 = vld [vmem:[%s11988_s23 + $0x8] sm:$0xff] }
0x1468   :  { %v9124_v19 = vpack.c.bf16 %v7130_v60, %v7129_v4 }
0x1469   :  { %v7098_v58 = vadd.f32 %v7550_v39, %v7088_v25 }
0x146a   :  { %9125 = vmatpush3.bf16.msra.mxu0 %v9124_v19 }
0x146b   :  { %v7099_v26 = vsel %vm207_vm2, %v7097_v34, %v7098_v58  ;;  %9126 = vmatprep.subr.bf16.mxu0 %v9538_v9 }
0x146c   :  { %v7102_v3 = vsel %vm237_vm3, %v7099_v26, 0.0 }
0x146d   :  { %7103 = vadd.xlane.f32.xlu0 %v7102_v3 }
0x146e   :  { %9128 = vmatpush3.bf16.msra.mxu0 %v9127_v45 }
0x14fa   :  { %v7104_v51 = vpop.xlane.xlu0 %7103 }
0x14fb   :  { %v7105_v50 = vmul.f32 0.03125, %v7104_v51 }
0x14fd   :  { %v7106_v61 = vsub.f32 %v7099_v26, %v7105_v50 }
0x14ff   :  { %v7107_v7 = vmul.f32 %v7106_v61, %v7106_v61 }
0x1501   :  { %v7108_v0 = vsel %vm237_vm3, %v7107_v7, 0.0 }
0x1502   :  { %7109 = vadd.xlane.f32.xlu1 %v7108_v0 }
0x158f   :  { %v7110_v28 = vpop.xlane.xlu1 %7109 }
0x1590   :  { %v7111_v14 = vmul.f32 0.03125, %v7110_v28 }
0x1592   :  { %v7112_v12 = vadd.f32 1e-06, %v7111_v14 }
0x1594   :  { %9512 = vrsqrt.f32 %v7112_v12 }
0x159e   :  { %v9513_v24 = vpop.eup %9512 }
0x159f   :  { %v7114_v9 = vmul.f32 %v9513_v24, %v7106_v61 }
0x15a1   :  { %v7121_v29 = vmul.f32 %v7551_v30, %v7114_v9 }
0x15a3   :  { %v7128_v56 = vadd.f32 %v7552_v44, %v7121_v29 }
0x15a5   :  { %8901 = vmatmul.mubr.msk.f32.vlgmr.msra.gmra.mrb[204].mxu0 %vm224_vm1, %v7128_v56 }
0x1678   :  { %v7209_v35 = vpop.f32.mrb[204].mxu0 }
0x1679   :  { %v7210_v36 = vadd.f32 %v7553_v11, %v7209_v35  ;;  %v8902_v43 = vpop.f32.mrb[205].mxu0 }
0x167b   :  { %7213 = vst [vmem:[#allocation2] sm:$0x3] %v7210_v36 }
0x167c   :  { %9525 = shalt.err (!%p9522_p4)
}
0x167d   :  { %s9526_s11 = scalar_lea.hbm %s11990_s25, 32 }
0x167e   :  { %p9527_p5 = scmp.ne.s32.totalorder %s11990_s25, %s9526_s11  ;;  %p9530_p6 = scmp.lt.u32.totalorder %s9526_s11, %s11990_s25 }
0x1680   :  { %p9532_p7 = pnand %p9530_p6, %p9527_p5 }
0x1682   :  { %9535 = shalt.err (!%p9532_p7)
}
0x1683   :  { %7223 = dma.vmem_to_hbm [thread:$0]  %s7221_s26, 32, %s11990_s25, [#allocation3]  }
0x1684   :  { %9536 = dma.done.wait [#allocation3], 32  }
0x1685   :  { %9537 = vsyncadd [#allocation3], 4294967264 }
0x1686   :  { %7227 = vsyncpa [#allocation3], 1 }

</bundles_post_ra>
